<compile_context>
chip_gen: v6e
topology: v6e:2x2x1
jax: 0.10.0
libtpu: 0.0.40
codegen_flags: <defaults>
</compile_context>

<pallas_src>
import functools

import jax
import jax.numpy as jnp
from jax.experimental import pallas as pl
from jax.experimental.pallas import tpu as pltpu

_VMEM_LIMIT = 48 * 1024 * 1024        # v7x-safe (64 MiB physical per TC)
_BN_EPS = 1e-5


def _round_up(x, m):
    return (x + m - 1) // m * m


def _apply_act(x, act):
    if act == "leaky_relu":
        return jnp.where(x > 0, x, 0.2 * x)        # LeakyReLU(0.2)
    if act == "relu":
        return jnp.maximum(x, 0.0)
    if act == "tanh":
        return jnp.tanh(x)
    return x


# ---------------------------------------------------------------------------
# Pallas kernels
# ---------------------------------------------------------------------------
def _mm_bias_act_kernel(p_ref, w_ref, b_ref, o_ref, *, act):
    """(tile_m, K) @ (K, C) + bias -> activation.  bf16 in, f32 MXU accum."""
    acc = jnp.dot(p_ref[...], w_ref[...], preferred_element_type=jnp.float32)
    acc = acc + b_ref[...]
    o_ref[...] = _apply_act(acc, act).astype(o_ref.dtype)


def _mm_stats_kernel(p_ref, w_ref, y_ref, s_ref):
    """Tiled matmul + per-tile partial BN stats (sum, sum-of-squares)."""
    acc = jnp.dot(p_ref[...], w_ref[...], preferred_element_type=jnp.float32)
    y_ref[...] = acc.astype(y_ref.dtype)
    s = jnp.sum(acc, axis=0, keepdims=True)                 # (1, C)
    ss = jnp.sum(acc * acc, axis=0, keepdims=True)          # (1, C)
    st = jnp.concatenate([s, ss], axis=0)                   # (2, C)
    s_ref[...] = st.reshape((1,) + st.shape)                # (1, 2, C)


def _bn_act_kernel(y_ref, sc_ref, sh_ref, o_ref, *, act):
    """BatchNorm apply pass: y * scale + shift -> activation."""
    acc = y_ref[...].astype(jnp.float32) * sc_ref[...] + sh_ref[...]
    o_ref[...] = _apply_act(acc, act).astype(o_ref.dtype)


# ---------------------------------------------------------------------------
# pallas_call wrappers (grid over M, weights resident, lane-dense padding)
# ---------------------------------------------------------------------------
def _tile_m(m):
    return 512 if m >= 512 else _round_up(max(m, 8), 8)


def _pad2(a, rows, cols):
    r, c = a.shape
    if r == rows and c == cols:
        return a
    return jnp.pad(a, ((0, rows - r), (0, cols - c)))


def _compiler_params():
    return pltpu.CompilerParams(dimension_semantics=("parallel",),
                                vmem_limit_bytes=_VMEM_LIMIT)


def _cost(mp, kp, ct, out_bytes, trans=0):
    return pl.CostEstimate(
        flops=int(2 * mp * kp * ct),
        transcendentals=int(trans),
        bytes_accessed=int(2 * (mp * kp + kp * ct) + out_bytes))


def matmul_bias_act(patches, wmat, bias_cols, *, act, out_dtype=jnp.bfloat16):
    """Fused (patches @ W) + bias + activation, tiled over M."""
    m, k = patches.shape
    ct = wmat.shape[1]                                      # multiple of 128
    kp = _round_up(k, 128)
    tm = _tile_m(m)
    mp = _round_up(m, tm)
    p = _pad2(patches, mp, kp).astype(jnp.bfloat16)
    w = _pad2(wmat, kp, ct).astype(jnp.bfloat16)
    b = bias_cols.reshape(1, ct).astype(jnp.float32)

    out = pl.pallas_call(
        functools.partial(_mm_bias_act_kernel, act=act),
        out_shape=jax.ShapeDtypeStruct((mp, ct), out_dtype),
        grid_spec=pltpu.PrefetchScalarGridSpec(
            num_scalar_prefetch=0,
            grid=(mp // tm,),
            in_specs=[pl.BlockSpec((tm, kp), lambda i: (i, 0)),
                      pl.BlockSpec((kp, ct), lambda i: (0, 0)),   # resident
                      pl.BlockSpec((1, ct), lambda i: (0, 0))],   # resident
            out_specs=pl.BlockSpec((tm, ct), lambda i: (i, 0))),
        compiler_params=_compiler_params(),
        cost_estimate=_cost(mp, kp, ct,
                            mp * ct * jnp.dtype(out_dtype).itemsize,
                            trans=mp * ct if act == "tanh" else 0),
    )(p, w, b)
    return out[:m]


def matmul_bn_act(patches, wmat, gamma, beta, *, groups, act,
                  out_dtype=jnp.bfloat16, eps=_BN_EPS):
    """(patches @ W) + BatchNorm(batch stats) + activation, tiled over M.

    Pass 1 emits pre-BN activations plus per-tile (sum, sumsq); a tiny JAX
    finalize produces per-channel scale/shift; pass 2 applies them.  Columns
    are `groups` phase groups of `cg` channels each (groups=1 for Conv2d,
    groups=4 for the sub-pixel ConvTranspose2d).
    """
    m, k = patches.shape
    ct = wmat.shape[1]                                      # groups * cg
    cg = ct // groups
    kp = _round_up(k, 128)
    tm = _tile_m(m)
    mp = _round_up(m, tm)
    nt = mp // tm
    p = _pad2(patches, mp, kp).astype(jnp.bfloat16)
    w = _pad2(wmat, kp, ct).astype(jnp.bfloat16)

    # Pass 1: matmul -> pre-BN activations (bf16) + per-tile partial stats.
    y, stats = pl.pallas_call(
        _mm_stats_kernel,
        out_shape=(jax.ShapeDtypeStruct((mp, ct), jnp.bfloat16),
                   jax.ShapeDtypeStruct((nt, 2, ct), jnp.float32)),
        grid_spec=pltpu.PrefetchScalarGridSpec(
            num_scalar_prefetch=0,
            grid=(nt,),
            in_specs=[pl.BlockSpec((tm, kp), lambda i: (i, 0)),
                      pl.BlockSpec((kp, ct), lambda i: (0, 0))],  # resident
            out_specs=[pl.BlockSpec((tm, ct), lambda i: (i, 0)),
                       pl.BlockSpec((1, 2, ct), lambda i: (i, 0, 0))]),
        compiler_params=_compiler_params(),
        cost_estimate=_cost(mp, kp, ct, mp * ct * 2 + nt * 2 * ct * 4),
    )(p, w)

    # Finalize batch statistics (tiny per-channel math).  Zero-padded rows
    # contribute 0 to both sums, so dividing by the true count is exact.
    tot = jnp.sum(stats, axis=0)                            # (2, ct)
    cnt = float(m * groups)
    s = jnp.sum(tot[0].reshape(groups, cg), axis=0)         # (cg,)
    ss = jnp.sum(tot[1].reshape(groups, cg), axis=0)
    mean = s / cnt
    var = jnp.maximum(ss / cnt - mean * mean, 0.0)          # E[x^2] - E[x]^2
    gamma_p = jnp.zeros((cg,), jnp.float32).at[:gamma.shape[0]].set(gamma)
    beta_p = jnp.zeros((cg,), jnp.float32).at[:beta.shape[0]].set(beta)
    scale = gamma_p * jax.lax.rsqrt(var + eps)
    shift = beta_p - mean * scale
    scale_cols = jnp.tile(scale, groups).reshape(1, ct)
    shift_cols = jnp.tile(shift, groups).reshape(1, ct)

    # Pass 2: scale/shift + activation, tiled over M.
    out = pl.pallas_call(
        functools.partial(_bn_act_kernel, act=act),
        out_shape=jax.ShapeDtypeStruct((mp, ct), out_dtype),
        grid_spec=pltpu.PrefetchScalarGridSpec(
            num_scalar_prefetch=0,
            grid=(nt,),
            in_specs=[pl.BlockSpec((tm, ct), lambda i: (i, 0)),
                      pl.BlockSpec((1, ct), lambda i: (0, 0)),    # resident
                      pl.BlockSpec((1, ct), lambda i: (0, 0))],   # resident
            out_specs=pl.BlockSpec((tm, ct), lambda i: (i, 0))),
        compiler_params=_compiler_params(),
        cost_estimate=pl.CostEstimate(flops=int(2 * mp * ct), transcendentals=0,
                                      bytes_accessed=int(mp * ct * 4)),
    )(y, scale_cols, shift_cols)
    return out[:m]


# ---------------------------------------------------------------------------
# Plain-JAX glue: im2col, weight reshaping, sub-pixel ConvTranspose weights
# ---------------------------------------------------------------------------
def _im2col(x_nhwc, k, stride, pad):
    """NHWC im2col -> (N*Ho*Wo, k*k*C); K index = (i*k + j)*C + c."""
    x = x_nhwc
    if pad:
        x = jnp.pad(x, ((0, 0), (pad, pad), (pad, pad), (0, 0)))
    n, h, w, c = x.shape
    ho = (h - k) // stride + 1
    wo = (w - k) // stride + 1
    cols = []
    for i in range(k):
        for j in range(k):
            cols.append(x[:, i:i + stride * ho:stride,
                          j:j + stride * wo:stride, :])
    p = jnp.stack(cols, axis=3)                             # (N, Ho, Wo, k*k, C)
    return p.reshape(n * ho * wo, k * k * c), (n, ho, wo)


def _conv_w_to_mat(w):
    """PyTorch Conv2d weight (C_out, C_in, kH, kW) -> (kH*kW*C_in, C_out)."""
    co, ci, kh, kw = w.shape
    return jnp.transpose(w, (2, 3, 1, 0)).reshape(kh * kw * ci, co)


def _convT_phase_w_to_mat(w_t, cg):
    """ConvTranspose2d weight (C_in, C_out, 4, 4) -> (9*C_in, 4*cg).

    Column group g = 2*ry + rx holds output phase (oy%2, ox%2) = (ry, rx):
    its 2x2 sub-kernel of the spatially flipped transposed kernel embedded in
    the shared 3x3 window over the 1-padded, un-upsampled input.  C_out is
    zero-padded to cg per group so the total column count is lane-dense.
    """
    ci, co, _, _ = w_t.shape
    wf = jnp.transpose(w_t[:, :, ::-1, ::-1], (2, 3, 0, 1))  # flipped (4,4,Ci,Co)
    # flipped-kernel tap index -> shared 3x3 window position, per phase parity
    taps = {0: ((0, 0), (2, 1)), 1: ((1, 1), (3, 2))}
    mats = []
    for ry in (0, 1):
        for rx in (0, 1):
            wp = jnp.zeros((3, 3, ci, cg), w_t.dtype)
            for a, wr in taps[ry]:
                for b, wc in taps[rx]:
                    wp = wp.at[wr, wc, :, :co].set(wf[a, b])
            mats.append(wp.reshape(9 * ci, cg))
    return jnp.concatenate(mats, axis=1)                    # (9*C_in, 4*cg)


# ---------------------------------------------------------------------------
# Layer blocks
# ---------------------------------------------------------------------------
def conv_block(x_nhwc, w, gamma, beta, *, normalize, act,
               out_dtype=jnp.bfloat16):
    """Conv2d(k=4, s=2, p=1, bias=False) [+ BatchNorm] + activation."""
    # TODO(synk): fuse the im2col gather into the kernel (overlapping input
    # windows via Element-indexed BlockSpecs) to avoid the k*k HBM blow-up.
    c_out = w.shape[0]
    cg = _round_up(c_out, 128)                              # lane-dense columns
    patches, (n, ho, wo) = _im2col(x_nhwc, 4, 2, 1)
    wmat = jnp.pad(_conv_w_to_mat(w), ((0, 0), (0, cg - c_out)))
    if normalize:
        out = matmul_bn_act(patches, wmat, gamma, beta, groups=1, act=act,
                            out_dtype=out_dtype)
    else:
        out = matmul_bias_act(patches, wmat, jnp.zeros((1, cg), jnp.float32),
                              act=act, out_dtype=out_dtype)
    return out[:, :c_out].reshape(n, ho, wo, c_out)


def convT_block(x_nhwc, w_t, *, gamma, beta, bias, normalize, act,
                out_dtype=jnp.bfloat16):
    """ConvTranspose2d(k=4, s=2, p=1) [+ BatchNorm] + activation.

    Sub-pixel decomposition: the 4 output phases are 4 column groups of one
    matmul over a shared 3x3 im2col of the un-upsampled input, then a
    depth-to-space interleave.  No zero-inserted tensor is materialized.
    """
    n, h, wdt, _ = x_nhwc.shape
    c_out = w_t.shape[1]
    groups = 4
    cg = _round_up(c_out, 128 // groups)                    # 4*cg lane-dense
    xp = jnp.pad(x_nhwc, ((0, 0), (1, 1), (1, 1), (0, 0)))
    patches, _ = _im2col(xp, 3, 1, 0)                       # (N*H*W, 9*C_in)
    wmat = _convT_phase_w_to_mat(w_t, cg)                   # (9*C_in, 4*cg)
    if normalize:
        y = matmul_bn_act(patches, wmat, gamma, beta, groups=groups, act=act,
                          out_dtype=out_dtype)
    else:
        b = jnp.zeros((cg,), jnp.float32)
        if bias is not None:
            b = b.at[:c_out].set(bias)
        y = matmul_bias_act(patches, wmat,
                            jnp.tile(b, groups).reshape(1, groups * cg),
                            act=act, out_dtype=out_dtype)
    # depth-to-space interleave of the 4 phases -> (N, 2H, 2W, c_out)
    y = y.reshape(n, h, wdt, 2, 2, cg)
    y = jnp.transpose(y, (0, 1, 3, 2, 4, 5)).reshape(n, 2 * h, 2 * wdt, cg)
    return y[..., :c_out]


# ---------------------------------------------------------------------------
# Parameters (deterministic, in-script) and forward pass
# ---------------------------------------------------------------------------
def init_params(key, in_c=3, out_c=3, f=16):
    def conv_w(k, co, ci):
        return (jax.random.normal(k, (co, ci, 4, 4), jnp.float32)
                / jnp.sqrt(ci * 16.0))

    def convT_w(k, ci, co):
        return (jax.random.normal(k, (ci, co, 4, 4), jnp.float32)
                / jnp.sqrt(ci * 16.0))

    keys = jax.random.split(key, 9)
    params = {"enc": [], "dec": []}
    for i, (ci, co) in enumerate([(in_c, f), (f, 2 * f),
                                  (2 * f, 4 * f), (4 * f, 8 * f)]):
        params["enc"].append({"w": conv_w(keys[i], co, ci),
                              "gamma": jnp.ones((co,), jnp.float32),
                              "beta": jnp.zeros((co,), jnp.float32)})
    for i, (ci, co) in enumerate([(8 * f, 4 * f), (4 * f, 2 * f), (2 * f, f)]):
        params["dec"].append({"w": convT_w(keys[4 + i], ci, co),
                              "gamma": jnp.ones((co,), jnp.float32),
                              "beta": jnp.zeros((co,), jnp.float32)})
    params["final_w"] = convT_w(keys[7], f, out_c)
    params["final_b"] = 0.05 * jax.random.normal(keys[8], (out_c,), jnp.float32)
    return params


def unet_generator_forward(params, x_nchw):
    x = jnp.transpose(x_nchw, (0, 2, 3, 1)).astype(jnp.bfloat16)  # NCHW->NHWC
    # TODO(synk): fuse the tiny bottleneck layers (enc4 / dec1, M <= 32 rows)
    # into one weight-resident pallas_call to drop per-call launch/DMA latency.
    # encoder: Conv(k4,s2,p1,bias=False)[+BN]+LeakyReLU(0.2); first has no BN
    for i, lyr in enumerate(params["enc"]):
        x = conv_block(x, lyr["w"], lyr["gamma"], lyr["beta"],
                       normalize=(i != 0), act="leaky_relu")
    # decoder: ConvT(k4,s2,p1,bias=False)+BN+ReLU  (x3)
    for lyr in params["dec"]:
        x = convT_block(x, lyr["w"], gamma=lyr["gamma"], beta=lyr["beta"],
                        bias=None, normalize=True, act="relu")
    # final: ConvT(k4,s2,p1,bias=True) + Tanh, f32 output
    x = convT_block(x, params["final_w"], gamma=None, beta=None,
                    bias=params["final_b"], normalize=False, act="tanh",
                    out_dtype=jnp.float32)
    return jnp.transpose(x, (0, 3, 1, 2))                   # NHWC -> NCHW


if __name__ == "__main__":
    # Small shapes: batch=2, in_channels=3, spatial=16x16, features=16.
    x = jax.random.normal(jax.random.PRNGKey(0), (2, 3, 16, 16), jnp.float32)
    params = init_params(jax.random.PRNGKey(42), in_c=3, out_c=3, f=16)

    fwd = jax.jit(unet_generator_forward)
    y = jax.block_until_ready(fwd(params, x))

    assert y.shape == (2, 3, 16, 16), y.shape
    assert bool(jnp.all(jnp.isfinite(y)))
    assert bool(jnp.all(jnp.abs(y) <= 1.0))                 # tanh output range
    print("KERNEL_OK")
</pallas_src>

<mosaic_0001>
module attributes {stable_mosaic.version = 11 : i64} {
  func.func @_mm_bias_act_kernel(%arg0: i32, %arg1: memref<128x128xbf16, #tpu.memory_space<vmem>>, %arg2: memref<128x128xbf16, #tpu.memory_space<vmem>>, %arg3: memref<1x128xf32, #tpu.memory_space<vmem>>, %arg4: memref<128x128xbf16, #tpu.memory_space<vmem>>) attributes {dimension_semantics = [#tpu.dimension_semantics<parallel>], iteration_bounds = array<i64: 1>, scalar_prefetch = 0 : i64, scratch_operands = 0 : i64, tpu.core_type = #tpu.core_type<tc>, window_params = [{transform_indices = @transform_0, window_bounds = array<i64: 128, 128>}, {pipeline_mode = #tpu.pipeline_mode<synchronous>, transform_indices = @transform_1, window_bounds = array<i64: 128, 128>}, {pipeline_mode = #tpu.pipeline_mode<synchronous>, transform_indices = @transform_2, window_bounds = array<i64: 1, 128>}, {transform_indices = @transform_3, window_bounds = array<i64: 128, 128>}]} {
    %c0 = arith.constant 0 : index
    %c0_0 = arith.constant 0 : index
    %0 = vector.load %arg1[%c0, %c0_0] : memref<128x128xbf16, #tpu.memory_space<vmem>>, vector<128x128xbf16>
    %c0_1 = arith.constant 0 : index
    %c0_2 = arith.constant 0 : index
    %1 = vector.load %arg2[%c0_1, %c0_2] : memref<128x128xbf16, #tpu.memory_space<vmem>>, vector<128x128xbf16>
    %cst = arith.constant dense<0.000000e+00> : vector<128x128xf32>
    %2 = tpu.matmul %0, %1, %cst {dimension_numbers = #tpu.dot_dimension_numbers<[1], [0], [0], [1], [0, 0, 1, 1], [], []>} : vector<128x128xbf16>, vector<128x128xbf16>, vector<128x128xf32> -> vector<128x128xf32>
    %c0_3 = arith.constant 0 : index
    %c0_4 = arith.constant 0 : index
    %3 = vector.load %arg3[%c0_3, %c0_4] : memref<1x128xf32, #tpu.memory_space<vmem>>, vector<1x128xf32>
    %4 = vector.broadcast %3 : vector<1x128xf32> to vector<128x128xf32>
    %5 = arith.addf %2, %4 : vector<128x128xf32>
    %cst_5 = arith.constant 0.000000e+00 : f32
    %6 = vector.broadcast %cst_5 : f32 to vector<128x128xf32>
    %7 = arith.cmpf ogt, %5, %6 : vector<128x128xf32>
    %cst_6 = arith.constant 2.000000e-01 : f32
    %8 = vector.broadcast %cst_6 : f32 to vector<128x128xf32>
    %9 = arith.mulf %8, %5 : vector<128x128xf32>
    %10 = arith.select %7, %5, %9 : vector<128x128xi1>, vector<128x128xf32>
    %11 = arith.truncf %10 : vector<128x128xf32> to vector<128x128xbf16>
    %c0_7 = arith.constant 0 : index
    %c0_8 = arith.constant 0 : index
    %12 = vector.load %arg4[%c0_7, %c0_8] : memref<128x128xbf16, #tpu.memory_space<vmem>>, vector<128x128xbf16>
    tpu.vector_store %arg4[%c0_7, %c0_8], %11 {strides = array<i32>} : memref<128x128xbf16, #tpu.memory_space<vmem>>, vector<128x128xbf16>,
    return
  }
  func.func @transform_0(%arg0: i32) -> (i32, i32) {
    %c0_i32 = arith.constant 0 : i32
    %c0_i32_0 = arith.constant 0 : i32
    return %arg0, %c0_i32 : i32, i32
  }
  func.func @transform_1(%arg0: i32) -> (i32, i32) {
    %c0_i32 = arith.constant 0 : i32
    %c0_i32_0 = arith.constant 0 : i32
    %c0_i32_1 = arith.constant 0 : i32
    return %c0_i32, %c0_i32_0 : i32, i32
  }
  func.func @transform_2(%arg0: i32) -> (i32, i32) {
    %c0_i32 = arith.constant 0 : i32
    %c0_i32_0 = arith.constant 0 : i32
    %c0_i32_1 = arith.constant 0 : i32
    return %c0_i32, %c0_i32_0 : i32, i32
  }
  func.func @transform_3(%arg0: i32) -> (i32, i32) {
    %c0_i32 = arith.constant 0 : i32
    %c0_i32_0 = arith.constant 0 : i32
    return %arg0, %c0_i32 : i32, i32
  }
}

module attributes {stable_mosaic.version = 11 : i64} {
  func.func @_mm_stats_kernel(%arg0: i32, %arg1: memref<32x256xbf16, #tpu.memory_space<vmem>>, %arg2: memref<256x128xbf16, #tpu.memory_space<vmem>>, %arg3: memref<32x128xbf16, #tpu.memory_space<vmem>>, %arg4: memref<1x2x128xf32, #tpu.memory_space<vmem>>) attributes {dimension_semantics = [#tpu.dimension_semantics<parallel>], iteration_bounds = array<i64: 1>, scalar_prefetch = 0 : i64, scratch_operands = 0 : i64, tpu.core_type = #tpu.core_type<tc>, window_params = [{transform_indices = @transform_0, window_bounds = array<i64: 32, 256>}, {pipeline_mode = #tpu.pipeline_mode<synchronous>, transform_indices = @transform_1, window_bounds = array<i64: 256, 128>}, {transform_indices = @transform_2, window_bounds = array<i64: 32, 128>}, {transform_indices = @transform_3, window_bounds = array<i64: 1, 2, 128>}]} {
    %c0 = arith.constant 0 : index
    %c0_0 = arith.constant 0 : index
    %0 = vector.load %arg1[%c0, %c0_0] : memref<32x256xbf16, #tpu.memory_space<vmem>>, vector<32x256xbf16>
    %c0_1 = arith.constant 0 : index
    %c0_2 = arith.constant 0 : index
    %1 = vector.load %arg2[%c0_1, %c0_2] : memref<256x128xbf16, #tpu.memory_space<vmem>>, vector<256x128xbf16>
    %cst = arith.constant dense<0.000000e+00> : vector<32x128xf32>
    %2 = tpu.matmul %0, %1, %cst {dimension_numbers = #tpu.dot_dimension_numbers<[1], [0], [0], [1], [0, 0, 1, 1], [], []>} : vector<32x256xbf16>, vector<256x128xbf16>, vector<32x128xf32> -> vector<32x128xf32>
    %3 = arith.truncf %2 : vector<32x128xf32> to vector<32x128xbf16>
    %c0_3 = arith.constant 0 : index
    %c0_4 = arith.constant 0 : index
    %4 = vector.load %arg3[%c0_3, %c0_4] : memref<32x128xbf16, #tpu.memory_space<vmem>>, vector<32x128xbf16>
    tpu.vector_store %arg3[%c0_3, %c0_4], %3 {strides = array<i32>} : memref<32x128xbf16, #tpu.memory_space<vmem>>, vector<32x128xbf16>,
    %cst_5 = arith.constant dense<0.000000e+00> : vector<128xf32>
    %5 = vector.multi_reduction <add>, %2, %cst_5 [0] : vector<32x128xf32> to vector<128xf32>
    %6 = vector.shape_cast %5 : vector<128xf32> to vector<1x128xf32>
    %7 = arith.mulf %2, %2 : vector<32x128xf32>
    %cst_6 = arith.constant dense<0.000000e+00> : vector<128xf32>
    %8 = vector.multi_reduction <add>, %7, %cst_6 [0] : vector<32x128xf32> to vector<128xf32>
    %9 = vector.shape_cast %8 : vector<128xf32> to vector<1x128xf32>
    %10 = tpu.concatenate %6, %9 in 0 : vector<1x128xf32>, vector<1x128xf32> -> vector<2x128xf32>
    %11 = vector.shape_cast %10 : vector<2x128xf32> to vector<1x2x128xf32>
    %c0_7 = arith.constant 0 : index
    %c0_8 = arith.constant 0 : index
    %c0_9 = arith.constant 0 : index
    %12 = vector.load %arg4[%c0_7, %c0_8, %c0_9] : memref<1x2x128xf32, #tpu.memory_space<vmem>>, vector<1x2x128xf32>
    tpu.vector_store %arg4[%c0_7, %c0_8, %c0_9], %11 {strides = array<i32>} : memref<1x2x128xf32, #tpu.memory_space<vmem>>, vector<1x2x128xf32>,
    return
  }
  func.func @transform_0(%arg0: i32) -> (i32, i32) {
    %c0_i32 = arith.constant 0 : i32
    %c0_i32_0 = arith.constant 0 : i32
    return %arg0, %c0_i32 : i32, i32
  }
  func.func @transform_1(%arg0: i32) -> (i32, i32) {
    %c0_i32 = arith.constant 0 : i32
    %c0_i32_0 = arith.constant 0 : i32
    %c0_i32_1 = arith.constant 0 : i32
    return %c0_i32, %c0_i32_0 : i32, i32
  }
  func.func @transform_2(%arg0: i32) -> (i32, i32) {
    %c0_i32 = arith.constant 0 : i32
    %c0_i32_0 = arith.constant 0 : i32
    return %arg0, %c0_i32 : i32, i32
  }
  func.func @transform_3(%arg0: i32) -> (i32, i32, i32) {
    %c0_i32 = arith.constant 0 : i32
    %c0_i32_0 = arith.constant 0 : i32
    %c0_i32_1 = arith.constant 0 : i32
    return %arg0, %c0_i32, %c0_i32_0 : i32, i32, i32
  }
}

module attributes {stable_mosaic.version = 11 : i64} {
  func.func @_bn_act_kernel(%arg0: i32, %arg1: memref<32x128xbf16, #tpu.memory_space<vmem>>, %arg2: memref<1x128xf32, #tpu.memory_space<vmem>>, %arg3: memref<1x128xf32, #tpu.memory_space<vmem>>, %arg4: memref<32x128xbf16, #tpu.memory_space<vmem>>) attributes {dimension_semantics = [#tpu.dimension_semantics<parallel>], iteration_bounds = array<i64: 1>, scalar_prefetch = 0 : i64, scratch_operands = 0 : i64, tpu.core_type = #tpu.core_type<tc>, window_params = [{transform_indices = @transform_0, window_bounds = array<i64: 32, 128>}, {pipeline_mode = #tpu.pipeline_mode<synchronous>, transform_indices = @transform_1, window_bounds = array<i64: 1, 128>}, {pipeline_mode = #tpu.pipeline_mode<synchronous>, transform_indices = @transform_2, window_bounds = array<i64: 1, 128>}, {transform_indices = @transform_3, window_bounds = array<i64: 32, 128>}]} {
    %c0 = arith.constant 0 : index
    %c0_0 = arith.constant 0 : index
    %0 = vector.load %arg1[%c0, %c0_0] : memref<32x128xbf16, #tpu.memory_space<vmem>>, vector<32x128xbf16>
    %1 = arith.extf %0 : vector<32x128xbf16> to vector<32x128xf32>
    %c0_1 = arith.constant 0 : index
    %c0_2 = arith.constant 0 : index
    %2 = vector.load %arg2[%c0_1, %c0_2] : memref<1x128xf32, #tpu.memory_space<vmem>>, vector<1x128xf32>
    %3 = vector.broadcast %2 : vector<1x128xf32> to vector<32x128xf32>
    %4 = arith.mulf %1, %3 : vector<32x128xf32>
    %c0_3 = arith.constant 0 : index
    %c0_4 = arith.constant 0 : index
    %5 = vector.load %arg3[%c0_3, %c0_4] : memref<1x128xf32, #tpu.memory_space<vmem>>, vector<1x128xf32>
    %6 = vector.broadcast %5 : vector<1x128xf32> to vector<32x128xf32>
    %7 = arith.addf %4, %6 : vector<32x128xf32>
    %cst = arith.constant 0.000000e+00 : f32
    %8 = vector.broadcast %cst : f32 to vector<32x128xf32>
    %9 = arith.cmpf ogt, %7, %8 : vector<32x128xf32>
    %cst_5 = arith.constant 2.000000e-01 : f32
    %10 = vector.broadcast %cst_5 : f32 to vector<32x128xf32>
    %11 = arith.mulf %10, %7 : vector<32x128xf32>
    %12 = arith.select %9, %7, %11 : vector<32x128xi1>, vector<32x128xf32>
    %13 = arith.truncf %12 : vector<32x128xf32> to vector<32x128xbf16>
    %c0_6 = arith.constant 0 : index
    %c0_7 = arith.constant 0 : index
    %14 = vector.load %arg4[%c0_6, %c0_7] : memref<32x128xbf16, #tpu.memory_space<vmem>>, vector<32x128xbf16>
    tpu.vector_store %arg4[%c0_6, %c0_7], %13 {strides = array<i32>} : memref<32x128xbf16, #tpu.memory_space<vmem>>, vector<32x128xbf16>,
    return
  }
  func.func @transform_0(%arg0: i32) -> (i32, i32) {
    %c0_i32 = arith.constant 0 : i32
    %c0_i32_0 = arith.constant 0 : i32
    return %arg0, %c0_i32 : i32, i32
  }
  func.func @transform_1(%arg0: i32) -> (i32, i32) {
    %c0_i32 = arith.constant 0 : i32
    %c0_i32_0 = arith.constant 0 : i32
    %c0_i32_1 = arith.constant 0 : i32
    return %c0_i32, %c0_i32_0 : i32, i32
  }
  func.func @transform_2(%arg0: i32) -> (i32, i32) {
    %c0_i32 = arith.constant 0 : i32
    %c0_i32_0 = arith.constant 0 : i32
    %c0_i32_1 = arith.constant 0 : i32
    return %c0_i32, %c0_i32_0 : i32, i32
  }
  func.func @transform_3(%arg0: i32) -> (i32, i32) {
    %c0_i32 = arith.constant 0 : i32
    %c0_i32_0 = arith.constant 0 : i32
    return %arg0, %c0_i32 : i32, i32
  }
}

module attributes {stable_mosaic.version = 11 : i64} {
  func.func @_mm_stats_kernel(%arg0: i32, %arg1: memref<8x512xbf16, #tpu.memory_space<vmem>>, %arg2: memref<512x128xbf16, #tpu.memory_space<vmem>>, %arg3: memref<8x128xbf16, #tpu.memory_space<vmem>>, %arg4: memref<1x2x128xf32, #tpu.memory_space<vmem>>) attributes {dimension_semantics = [#tpu.dimension_semantics<parallel>], iteration_bounds = array<i64: 1>, scalar_prefetch = 0 : i64, scratch_operands = 0 : i64, tpu.core_type = #tpu.core_type<tc>, window_params = [{transform_indices = @transform_0, window_bounds = array<i64: 8, 512>}, {pipeline_mode = #tpu.pipeline_mode<synchronous>, transform_indices = @transform_1, window_bounds = array<i64: 512, 128>}, {transform_indices = @transform_2, window_bounds = array<i64: 8, 128>}, {transform_indices = @transform_3, window_bounds = array<i64: 1, 2, 128>}]} {
    %c0 = arith.constant 0 : index
    %c0_0 = arith.constant 0 : index
    %0 = vector.load %arg1[%c0, %c0_0] : memref<8x512xbf16, #tpu.memory_space<vmem>>, vector<8x512xbf16>
    %c0_1 = arith.constant 0 : index
    %c0_2 = arith.constant 0 : index
    %1 = vector.load %arg2[%c0_1, %c0_2] : memref<512x128xbf16, #tpu.memory_space<vmem>>, vector<512x128xbf16>
    %cst = arith.constant dense<0.000000e+00> : vector<8x128xf32>
    %2 = tpu.matmul %0, %1, %cst {dimension_numbers = #tpu.dot_dimension_numbers<[1], [0], [0], [1], [0, 0, 1, 1], [], []>} : vector<8x512xbf16>, vector<512x128xbf16>, vector<8x128xf32> -> vector<8x128xf32>
    %3 = arith.truncf %2 : vector<8x128xf32> to vector<8x128xbf16>
    %c0_3 = arith.constant 0 : index
    %c0_4 = arith.constant 0 : index
    %4 = vector.load %arg3[%c0_3, %c0_4] : memref<8x128xbf16, #tpu.memory_space<vmem>>, vector<8x128xbf16>
    tpu.vector_store %arg3[%c0_3, %c0_4], %3 {strides = array<i32>} : memref<8x128xbf16, #tpu.memory_space<vmem>>, vector<8x128xbf16>,
    %cst_5 = arith.constant dense<0.000000e+00> : vector<128xf32>
    %5 = vector.multi_reduction <add>, %2, %cst_5 [0] : vector<8x128xf32> to vector<128xf32>
    %6 = vector.shape_cast %5 : vector<128xf32> to vector<1x128xf32>
    %7 = arith.mulf %2, %2 : vector<8x128xf32>
    %cst_6 = arith.constant dense<0.000000e+00> : vector<128xf32>
    %8 = vector.multi_reduction <add>, %7, %cst_6 [0] : vector<8x128xf32> to vector<128xf32>
    %9 = vector.shape_cast %8 : vector<128xf32> to vector<1x128xf32>
    %10 = tpu.concatenate %6, %9 in 0 : vector<1x128xf32>, vector<1x128xf32> -> vector<2x128xf32>
    %11 = vector.shape_cast %10 : vector<2x128xf32> to vector<1x2x128xf32>
    %c0_7 = arith.constant 0 : index
    %c0_8 = arith.constant 0 : index
    %c0_9 = arith.constant 0 : index
    %12 = vector.load %arg4[%c0_7, %c0_8, %c0_9] : memref<1x2x128xf32, #tpu.memory_space<vmem>>, vector<1x2x128xf32>
    tpu.vector_store %arg4[%c0_7, %c0_8, %c0_9], %11 {strides = array<i32>} : memref<1x2x128xf32, #tpu.memory_space<vmem>>, vector<1x2x128xf32>,
    return
  }
  func.func @transform_0(%arg0: i32) -> (i32, i32) {
    %c0_i32 = arith.constant 0 : i32
    %c0_i32_0 = arith.constant 0 : i32
    return %arg0, %c0_i32 : i32, i32
  }
  func.func @transform_1(%arg0: i32) -> (i32, i32) {
    %c0_i32 = arith.constant 0 : i32
    %c0_i32_0 = arith.constant 0 : i32
    %c0_i32_1 = arith.constant 0 : i32
    return %c0_i32, %c0_i32_0 : i32, i32
  }
  func.func @transform_2(%arg0: i32) -> (i32, i32) {
    %c0_i32 = arith.constant 0 : i32
    %c0_i32_0 = arith.constant 0 : i32
    return %arg0, %c0_i32 : i32, i32
  }
  func.func @transform_3(%arg0: i32) -> (i32, i32, i32) {
    %c0_i32 = arith.constant 0 : i32
    %c0_i32_0 = arith.constant 0 : i32
    %c0_i32_1 = arith.constant 0 : i32
    return %arg0, %c0_i32, %c0_i32_0 : i32, i32, i32
  }
}

module attributes {stable_mosaic.version = 11 : i64} {
  func.func @_bn_act_kernel(%arg0: i32, %arg1: memref<8x128xbf16, #tpu.memory_space<vmem>>, %arg2: memref<1x128xf32, #tpu.memory_space<vmem>>, %arg3: memref<1x128xf32, #tpu.memory_space<vmem>>, %arg4: memref<8x128xbf16, #tpu.memory_space<vmem>>) attributes {dimension_semantics = [#tpu.dimension_semantics<parallel>], iteration_bounds = array<i64: 1>, scalar_prefetch = 0 : i64, scratch_operands = 0 : i64, tpu.core_type = #tpu.core_type<tc>, window_params = [{transform_indices = @transform_0, window_bounds = array<i64: 8, 128>}, {pipeline_mode = #tpu.pipeline_mode<synchronous>, transform_indices = @transform_1, window_bounds = array<i64: 1, 128>}, {pipeline_mode = #tpu.pipeline_mode<synchronous>, transform_indices = @transform_2, window_bounds = array<i64: 1, 128>}, {transform_indices = @transform_3, window_bounds = array<i64: 8, 128>}]} {
    %c0 = arith.constant 0 : index
    %c0_0 = arith.constant 0 : index
    %0 = vector.load %arg1[%c0, %c0_0] : memref<8x128xbf16, #tpu.memory_space<vmem>>, vector<8x128xbf16>
    %1 = arith.extf %0 : vector<8x128xbf16> to vector<8x128xf32>
    %c0_1 = arith.constant 0 : index
    %c0_2 = arith.constant 0 : index
    %2 = vector.load %arg2[%c0_1, %c0_2] : memref<1x128xf32, #tpu.memory_space<vmem>>, vector<1x128xf32>
    %3 = vector.broadcast %2 : vector<1x128xf32> to vector<8x128xf32>
    %4 = arith.mulf %1, %3 : vector<8x128xf32>
    %c0_3 = arith.constant 0 : index
    %c0_4 = arith.constant 0 : index
    %5 = vector.load %arg3[%c0_3, %c0_4] : memref<1x128xf32, #tpu.memory_space<vmem>>, vector<1x128xf32>
    %6 = vector.broadcast %5 : vector<1x128xf32> to vector<8x128xf32>
    %7 = arith.addf %4, %6 : vector<8x128xf32>
    %cst = arith.constant 0.000000e+00 : f32
    %8 = vector.broadcast %cst : f32 to vector<8x128xf32>
    %9 = arith.cmpf ogt, %7, %8 : vector<8x128xf32>
    %cst_5 = arith.constant 2.000000e-01 : f32
    %10 = vector.broadcast %cst_5 : f32 to vector<8x128xf32>
    %11 = arith.mulf %10, %7 : vector<8x128xf32>
    %12 = arith.select %9, %7, %11 : vector<8x128xi1>, vector<8x128xf32>
    %13 = arith.truncf %12 : vector<8x128xf32> to vector<8x128xbf16>
    %c0_6 = arith.constant 0 : index
    %c0_7 = arith.constant 0 : index
    %14 = vector.load %arg4[%c0_6, %c0_7] : memref<8x128xbf16, #tpu.memory_space<vmem>>, vector<8x128xbf16>
    tpu.vector_store %arg4[%c0_6, %c0_7], %13 {strides = array<i32>} : memref<8x128xbf16, #tpu.memory_space<vmem>>, vector<8x128xbf16>,
    return
  }
  func.func @transform_0(%arg0: i32) -> (i32, i32) {
    %c0_i32 = arith.constant 0 : i32
    %c0_i32_0 = arith.constant 0 : i32
    return %arg0, %c0_i32 : i32, i32
  }
  func.func @transform_1(%arg0: i32) -> (i32, i32) {
    %c0_i32 = arith.constant 0 : i32
    %c0_i32_0 = arith.constant 0 : i32
    %c0_i32_1 = arith.constant 0 : i32
    return %c0_i32, %c0_i32_0 : i32, i32
  }
  func.func @transform_2(%arg0: i32) -> (i32, i32) {
    %c0_i32 = arith.constant 0 : i32
    %c0_i32_0 = arith.constant 0 : i32
    %c0_i32_1 = arith.constant 0 : i32
    return %c0_i32, %c0_i32_0 : i32, i32
  }
  func.func @transform_3(%arg0: i32) -> (i32, i32) {
    %c0_i32 = arith.constant 0 : i32
    %c0_i32_0 = arith.constant 0 : i32
    return %arg0, %c0_i32 : i32, i32
  }
}

module attributes {stable_mosaic.version = 11 : i64} {
  func.func @_mm_stats_kernel(%arg0: i32, %arg1: memref<8x1024xbf16, #tpu.memory_space<vmem>>, %arg2: memref<1024x128xbf16, #tpu.memory_space<vmem>>, %arg3: memref<8x128xbf16, #tpu.memory_space<vmem>>, %arg4: memref<1x2x128xf32, #tpu.memory_space<vmem>>) attributes {dimension_semantics = [#tpu.dimension_semantics<parallel>], iteration_bounds = array<i64: 1>, scalar_prefetch = 0 : i64, scratch_operands = 0 : i64, tpu.core_type = #tpu.core_type<tc>, window_params = [{transform_indices = @transform_0, window_bounds = array<i64: 8, 1024>}, {pipeline_mode = #tpu.pipeline_mode<synchronous>, transform_indices = @transform_1, window_bounds = array<i64: 1024, 128>}, {transform_indices = @transform_2, window_bounds = array<i64: 8, 128>}, {transform_indices = @transform_3, window_bounds = array<i64: 1, 2, 128>}]} {
    %c0 = arith.constant 0 : index
    %c0_0 = arith.constant 0 : index
    %0 = vector.load %arg1[%c0, %c0_0] : memref<8x1024xbf16, #tpu.memory_space<vmem>>, vector<8x1024xbf16>
    %c0_1 = arith.constant 0 : index
    %c0_2 = arith.constant 0 : index
    %1 = vector.load %arg2[%c0_1, %c0_2] : memref<1024x128xbf16, #tpu.memory_space<vmem>>, vector<1024x128xbf16>
    %cst = arith.constant dense<0.000000e+00> : vector<8x128xf32>
    %2 = tpu.matmul %0, %1, %cst {dimension_numbers = #tpu.dot_dimension_numbers<[1], [0], [0], [1], [0, 0, 1, 1], [], []>} : vector<8x1024xbf16>, vector<1024x128xbf16>, vector<8x128xf32> -> vector<8x128xf32>
    %3 = arith.truncf %2 : vector<8x128xf32> to vector<8x128xbf16>
    %c0_3 = arith.constant 0 : index
    %c0_4 = arith.constant 0 : index
    %4 = vector.load %arg3[%c0_3, %c0_4] : memref<8x128xbf16, #tpu.memory_space<vmem>>, vector<8x128xbf16>
    tpu.vector_store %arg3[%c0_3, %c0_4], %3 {strides = array<i32>} : memref<8x128xbf16, #tpu.memory_space<vmem>>, vector<8x128xbf16>,
    %cst_5 = arith.constant dense<0.000000e+00> : vector<128xf32>
    %5 = vector.multi_reduction <add>, %2, %cst_5 [0] : vector<8x128xf32> to vector<128xf32>
    %6 = vector.shape_cast %5 : vector<128xf32> to vector<1x128xf32>
    %7 = arith.mulf %2, %2 : vector<8x128xf32>
    %cst_6 = arith.constant dense<0.000000e+00> : vector<128xf32>
    %8 = vector.multi_reduction <add>, %7, %cst_6 [0] : vector<8x128xf32> to vector<128xf32>
    %9 = vector.shape_cast %8 : vector<128xf32> to vector<1x128xf32>
    %10 = tpu.concatenate %6, %9 in 0 : vector<1x128xf32>, vector<1x128xf32> -> vector<2x128xf32>
    %11 = vector.shape_cast %10 : vector<2x128xf32> to vector<1x2x128xf32>
    %c0_7 = arith.constant 0 : index
    %c0_8 = arith.constant 0 : index
    %c0_9 = arith.constant 0 : index
    %12 = vector.load %arg4[%c0_7, %c0_8, %c0_9] : memref<1x2x128xf32, #tpu.memory_space<vmem>>, vector<1x2x128xf32>
    tpu.vector_store %arg4[%c0_7, %c0_8, %c0_9], %11 {strides = array<i32>} : memref<1x2x128xf32, #tpu.memory_space<vmem>>, vector<1x2x128xf32>,
    return
  }
  func.func @transform_0(%arg0: i32) -> (i32, i32) {
    %c0_i32 = arith.constant 0 : i32
    %c0_i32_0 = arith.constant 0 : i32
    return %arg0, %c0_i32 : i32, i32
  }
  func.func @transform_1(%arg0: i32) -> (i32, i32) {
    %c0_i32 = arith.constant 0 : i32
    %c0_i32_0 = arith.constant 0 : i32
    %c0_i32_1 = arith.constant 0 : i32
    return %c0_i32, %c0_i32_0 : i32, i32
  }
  func.func @transform_2(%arg0: i32) -> (i32, i32) {
    %c0_i32 = arith.constant 0 : i32
    %c0_i32_0 = arith.constant 0 : i32
    return %arg0, %c0_i32 : i32, i32
  }
  func.func @transform_3(%arg0: i32) -> (i32, i32, i32) {
    %c0_i32 = arith.constant 0 : i32
    %c0_i32_0 = arith.constant 0 : i32
    %c0_i32_1 = arith.constant 0 : i32
    return %arg0, %c0_i32, %c0_i32_0 : i32, i32, i32
  }
}

module attributes {stable_mosaic.version = 11 : i64} {
  func.func @_mm_stats_kernel(%arg0: i32, %arg1: memref<8x1152xbf16, #tpu.memory_space<vmem>>, %arg2: memref<1152x256xbf16, #tpu.memory_space<vmem>>, %arg3: memref<8x256xbf16, #tpu.memory_space<vmem>>, %arg4: memref<1x2x256xf32, #tpu.memory_space<vmem>>) attributes {dimension_semantics = [#tpu.dimension_semantics<parallel>], iteration_bounds = array<i64: 1>, scalar_prefetch = 0 : i64, scratch_operands = 0 : i64, tpu.core_type = #tpu.core_type<tc>, window_params = [{transform_indices = @transform_0, window_bounds = array<i64: 8, 1152>}, {pipeline_mode = #tpu.pipeline_mode<synchronous>, transform_indices = @transform_1, window_bounds = array<i64: 1152, 256>}, {transform_indices = @transform_2, window_bounds = array<i64: 8, 256>}, {transform_indices = @transform_3, window_bounds = array<i64: 1, 2, 256>}]} {
    %c0 = arith.constant 0 : index
    %c0_0 = arith.constant 0 : index
    %0 = vector.load %arg1[%c0, %c0_0] : memref<8x1152xbf16, #tpu.memory_space<vmem>>, vector<8x1152xbf16>
    %c0_1 = arith.constant 0 : index
    %c0_2 = arith.constant 0 : index
    %1 = vector.load %arg2[%c0_1, %c0_2] : memref<1152x256xbf16, #tpu.memory_space<vmem>>, vector<1152x256xbf16>
    %cst = arith.constant dense<0.000000e+00> : vector<8x256xf32>
    %2 = tpu.matmul %0, %1, %cst {dimension_numbers = #tpu.dot_dimension_numbers<[1], [0], [0], [1], [0, 0, 1, 1], [], []>} : vector<8x1152xbf16>, vector<1152x256xbf16>, vector<8x256xf32> -> vector<8x256xf32>
    %3 = arith.truncf %2 : vector<8x256xf32> to vector<8x256xbf16>
    %c0_3 = arith.constant 0 : index
    %c0_4 = arith.constant 0 : index
    %4 = vector.load %arg3[%c0_3, %c0_4] : memref<8x256xbf16, #tpu.memory_space<vmem>>, vector<8x256xbf16>
    tpu.vector_store %arg3[%c0_3, %c0_4], %3 {strides = array<i32>} : memref<8x256xbf16, #tpu.memory_space<vmem>>, vector<8x256xbf16>,
    %cst_5 = arith.constant dense<0.000000e+00> : vector<256xf32>
    %5 = vector.multi_reduction <add>, %2, %cst_5 [0] : vector<8x256xf32> to vector<256xf32>
    %6 = vector.shape_cast %5 : vector<256xf32> to vector<1x256xf32>
    %7 = arith.mulf %2, %2 : vector<8x256xf32>
    %cst_6 = arith.constant dense<0.000000e+00> : vector<256xf32>
    %8 = vector.multi_reduction <add>, %7, %cst_6 [0] : vector<8x256xf32> to vector<256xf32>
    %9 = vector.shape_cast %8 : vector<256xf32> to vector<1x256xf32>
    %10 = tpu.concatenate %6, %9 in 0 : vector<1x256xf32>, vector<1x256xf32> -> vector<2x256xf32>
    %11 = vector.shape_cast %10 : vector<2x256xf32> to vector<1x2x256xf32>
    %c0_7 = arith.constant 0 : index
    %c0_8 = arith.constant 0 : index
    %c0_9 = arith.constant 0 : index
    %12 = vector.load %arg4[%c0_7, %c0_8, %c0_9] : memref<1x2x256xf32, #tpu.memory_space<vmem>>, vector<1x2x256xf32>
    tpu.vector_store %arg4[%c0_7, %c0_8, %c0_9], %11 {strides = array<i32>} : memref<1x2x256xf32, #tpu.memory_space<vmem>>, vector<1x2x256xf32>,
    return
  }
  func.func @transform_0(%arg0: i32) -> (i32, i32) {
    %c0_i32 = arith.constant 0 : i32
    %c0_i32_0 = arith.constant 0 : i32
    return %arg0, %c0_i32 : i32, i32
  }
  func.func @transform_1(%arg0: i32) -> (i32, i32) {
    %c0_i32 = arith.constant 0 : i32
    %c0_i32_0 = arith.constant 0 : i32
    %c0_i32_1 = arith.constant 0 : i32
    return %c0_i32, %c0_i32_0 : i32, i32
  }
  func.func @transform_2(%arg0: i32) -> (i32, i32) {
    %c0_i32 = arith.constant 0 : i32
    %c0_i32_0 = arith.constant 0 : i32
    return %arg0, %c0_i32 : i32, i32
  }
  func.func @transform_3(%arg0: i32) -> (i32, i32, i32) {
    %c0_i32 = arith.constant 0 : i32
    %c0_i32_0 = arith.constant 0 : i32
    %c0_i32_1 = arith.constant 0 : i32
    return %arg0, %c0_i32, %c0_i32_0 : i32, i32, i32
  }
}

module attributes {stable_mosaic.version = 11 : i64} {
  func.func @_bn_act_kernel(%arg0: i32, %arg1: memref<8x256xbf16, #tpu.memory_space<vmem>>, %arg2: memref<1x256xf32, #tpu.memory_space<vmem>>, %arg3: memref<1x256xf32, #tpu.memory_space<vmem>>, %arg4: memref<8x256xbf16, #tpu.memory_space<vmem>>) attributes {dimension_semantics = [#tpu.dimension_semantics<parallel>], iteration_bounds = array<i64: 1>, scalar_prefetch = 0 : i64, scratch_operands = 0 : i64, tpu.core_type = #tpu.core_type<tc>, window_params = [{transform_indices = @transform_0, window_bounds = array<i64: 8, 256>}, {pipeline_mode = #tpu.pipeline_mode<synchronous>, transform_indices = @transform_1, window_bounds = array<i64: 1, 256>}, {pipeline_mode = #tpu.pipeline_mode<synchronous>, transform_indices = @transform_2, window_bounds = array<i64: 1, 256>}, {transform_indices = @transform_3, window_bounds = array<i64: 8, 256>}]} {
    %c0 = arith.constant 0 : index
    %c0_0 = arith.constant 0 : index
    %0 = vector.load %arg1[%c0, %c0_0] : memref<8x256xbf16, #tpu.memory_space<vmem>>, vector<8x256xbf16>
    %1 = arith.extf %0 : vector<8x256xbf16> to vector<8x256xf32>
    %c0_1 = arith.constant 0 : index
    %c0_2 = arith.constant 0 : index
    %2 = vector.load %arg2[%c0_1, %c0_2] : memref<1x256xf32, #tpu.memory_space<vmem>>, vector<1x256xf32>
    %3 = vector.broadcast %2 : vector<1x256xf32> to vector<8x256xf32>
    %4 = arith.mulf %1, %3 : vector<8x256xf32>
    %c0_3 = arith.constant 0 : index
    %c0_4 = arith.constant 0 : index
    %5 = vector.load %arg3[%c0_3, %c0_4] : memref<1x256xf32, #tpu.memory_space<vmem>>, vector<1x256xf32>
    %6 = vector.broadcast %5 : vector<1x256xf32> to vector<8x256xf32>
    %7 = arith.addf %4, %6 : vector<8x256xf32>
    %cst = arith.constant 0.000000e+00 : f32
    %8 = vector.broadcast %cst : f32 to vector<8x256xf32>
    %9 = arith.maximumf %7, %8 : vector<8x256xf32>
    %10 = arith.truncf %9 : vector<8x256xf32> to vector<8x256xbf16>
    %c0_5 = arith.constant 0 : index
    %c0_6 = arith.constant 0 : index
    %11 = vector.load %arg4[%c0_5, %c0_6] : memref<8x256xbf16, #tpu.memory_space<vmem>>, vector<8x256xbf16>
    tpu.vector_store %arg4[%c0_5, %c0_6], %10 {strides = array<i32>} : memref<8x256xbf16, #tpu.memory_space<vmem>>, vector<8x256xbf16>,
    return
  }
  func.func @transform_0(%arg0: i32) -> (i32, i32) {
    %c0_i32 = arith.constant 0 : i32
    %c0_i32_0 = arith.constant 0 : i32
    return %arg0, %c0_i32 : i32, i32
  }
  func.func @transform_1(%arg0: i32) -> (i32, i32) {
    %c0_i32 = arith.constant 0 : i32
    %c0_i32_0 = arith.constant 0 : i32
    %c0_i32_1 = arith.constant 0 : i32
    return %c0_i32, %c0_i32_0 : i32, i32
  }
  func.func @transform_2(%arg0: i32) -> (i32, i32) {
    %c0_i32 = arith.constant 0 : i32
    %c0_i32_0 = arith.constant 0 : i32
    %c0_i32_1 = arith.constant 0 : i32
    return %c0_i32, %c0_i32_0 : i32, i32
  }
  func.func @transform_3(%arg0: i32) -> (i32, i32) {
    %c0_i32 = arith.constant 0 : i32
    %c0_i32_0 = arith.constant 0 : i32
    return %arg0, %c0_i32 : i32, i32
  }
}

module attributes {stable_mosaic.version = 11 : i64} {
  func.func @_mm_stats_kernel(%arg0: i32, %arg1: memref<8x640xbf16, #tpu.memory_space<vmem>>, %arg2: memref<640x128xbf16, #tpu.memory_space<vmem>>, %arg3: memref<8x128xbf16, #tpu.memory_space<vmem>>, %arg4: memref<1x2x128xf32, #tpu.memory_space<vmem>>) attributes {dimension_semantics = [#tpu.dimension_semantics<parallel>], iteration_bounds = array<i64: 1>, scalar_prefetch = 0 : i64, scratch_operands = 0 : i64, tpu.core_type = #tpu.core_type<tc>, window_params = [{transform_indices = @transform_0, window_bounds = array<i64: 8, 640>}, {pipeline_mode = #tpu.pipeline_mode<synchronous>, transform_indices = @transform_1, window_bounds = array<i64: 640, 128>}, {transform_indices = @transform_2, window_bounds = array<i64: 8, 128>}, {transform_indices = @transform_3, window_bounds = array<i64: 1, 2, 128>}]} {
    %c0 = arith.constant 0 : index
    %c0_0 = arith.constant 0 : index
    %0 = vector.load %arg1[%c0, %c0_0] : memref<8x640xbf16, #tpu.memory_space<vmem>>, vector<8x640xbf16>
    %c0_1 = arith.constant 0 : index
    %c0_2 = arith.constant 0 : index
    %1 = vector.load %arg2[%c0_1, %c0_2] : memref<640x128xbf16, #tpu.memory_space<vmem>>, vector<640x128xbf16>
    %cst = arith.constant dense<0.000000e+00> : vector<8x128xf32>
    %2 = tpu.matmul %0, %1, %cst {dimension_numbers = #tpu.dot_dimension_numbers<[1], [0], [0], [1], [0, 0, 1, 1], [], []>} : vector<8x640xbf16>, vector<640x128xbf16>, vector<8x128xf32> -> vector<8x128xf32>
    %3 = arith.truncf %2 : vector<8x128xf32> to vector<8x128xbf16>
    %c0_3 = arith.constant 0 : index
    %c0_4 = arith.constant 0 : index
    %4 = vector.load %arg3[%c0_3, %c0_4] : memref<8x128xbf16, #tpu.memory_space<vmem>>, vector<8x128xbf16>
    tpu.vector_store %arg3[%c0_3, %c0_4], %3 {strides = array<i32>} : memref<8x128xbf16, #tpu.memory_space<vmem>>, vector<8x128xbf16>,
    %cst_5 = arith.constant dense<0.000000e+00> : vector<128xf32>
    %5 = vector.multi_reduction <add>, %2, %cst_5 [0] : vector<8x128xf32> to vector<128xf32>
    %6 = vector.shape_cast %5 : vector<128xf32> to vector<1x128xf32>
    %7 = arith.mulf %2, %2 : vector<8x128xf32>
    %cst_6 = arith.constant dense<0.000000e+00> : vector<128xf32>
    %8 = vector.multi_reduction <add>, %7, %cst_6 [0] : vector<8x128xf32> to vector<128xf32>
    %9 = vector.shape_cast %8 : vector<128xf32> to vector<1x128xf32>
    %10 = tpu.concatenate %6, %9 in 0 : vector<1x128xf32>, vector<1x128xf32> -> vector<2x128xf32>
    %11 = vector.shape_cast %10 : vector<2x128xf32> to vector<1x2x128xf32>
    %c0_7 = arith.constant 0 : index
    %c0_8 = arith.constant 0 : index
    %c0_9 = arith.constant 0 : index
    %12 = vector.load %arg4[%c0_7, %c0_8, %c0_9] : memref<1x2x128xf32, #tpu.memory_space<vmem>>, vector<1x2x128xf32>
    tpu.vector_store %arg4[%c0_7, %c0_8, %c0_9], %11 {strides = array<i32>} : memref<1x2x128xf32, #tpu.memory_space<vmem>>, vector<1x2x128xf32>,
    return
  }
  func.func @transform_0(%arg0: i32) -> (i32, i32) {
    %c0_i32 = arith.constant 0 : i32
    %c0_i32_0 = arith.constant 0 : i32
    return %arg0, %c0_i32 : i32, i32
  }
  func.func @transform_1(%arg0: i32) -> (i32, i32) {
    %c0_i32 = arith.constant 0 : i32
    %c0_i32_0 = arith.constant 0 : i32
    %c0_i32_1 = arith.constant 0 : i32
    return %c0_i32, %c0_i32_0 : i32, i32
  }
  func.func @transform_2(%arg0: i32) -> (i32, i32) {
    %c0_i32 = arith.constant 0 : i32
    %c0_i32_0 = arith.constant 0 : i32
    return %arg0, %c0_i32 : i32, i32
  }
  func.func @transform_3(%arg0: i32) -> (i32, i32, i32) {
    %c0_i32 = arith.constant 0 : i32
    %c0_i32_0 = arith.constant 0 : i32
    %c0_i32_1 = arith.constant 0 : i32
    return %arg0, %c0_i32, %c0_i32_0 : i32, i32, i32
  }
}

module attributes {stable_mosaic.version = 11 : i64} {
  func.func @_bn_act_kernel(%arg0: i32, %arg1: memref<8x128xbf16, #tpu.memory_space<vmem>>, %arg2: memref<1x128xf32, #tpu.memory_space<vmem>>, %arg3: memref<1x128xf32, #tpu.memory_space<vmem>>, %arg4: memref<8x128xbf16, #tpu.memory_space<vmem>>) attributes {dimension_semantics = [#tpu.dimension_semantics<parallel>], iteration_bounds = array<i64: 1>, scalar_prefetch = 0 : i64, scratch_operands = 0 : i64, tpu.core_type = #tpu.core_type<tc>, window_params = [{transform_indices = @transform_0, window_bounds = array<i64: 8, 128>}, {pipeline_mode = #tpu.pipeline_mode<synchronous>, transform_indices = @transform_1, window_bounds = array<i64: 1, 128>}, {pipeline_mode = #tpu.pipeline_mode<synchronous>, transform_indices = @transform_2, window_bounds = array<i64: 1, 128>}, {transform_indices = @transform_3, window_bounds = array<i64: 8, 128>}]} {
    %c0 = arith.constant 0 : index
    %c0_0 = arith.constant 0 : index
    %0 = vector.load %arg1[%c0, %c0_0] : memref<8x128xbf16, #tpu.memory_space<vmem>>, vector<8x128xbf16>
    %1 = arith.extf %0 : vector<8x128xbf16> to vector<8x128xf32>
    %c0_1 = arith.constant 0 : index
    %c0_2 = arith.constant 0 : index
    %2 = vector.load %arg2[%c0_1, %c0_2] : memref<1x128xf32, #tpu.memory_space<vmem>>, vector<1x128xf32>
    %3 = vector.broadcast %2 : vector<1x128xf32> to vector<8x128xf32>
    %4 = arith.mulf %1, %3 : vector<8x128xf32>
    %c0_3 = arith.constant 0 : index
    %c0_4 = arith.constant 0 : index
    %5 = vector.load %arg3[%c0_3, %c0_4] : memref<1x128xf32, #tpu.memory_space<vmem>>, vector<1x128xf32>
    %6 = vector.broadcast %5 : vector<1x128xf32> to vector<8x128xf32>
    %7 = arith.addf %4, %6 : vector<8x128xf32>
    %cst = arith.constant 0.000000e+00 : f32
    %8 = vector.broadcast %cst : f32 to vector<8x128xf32>
    %9 = arith.maximumf %7, %8 : vector<8x128xf32>
    %10 = arith.truncf %9 : vector<8x128xf32> to vector<8x128xbf16>
    %c0_5 = arith.constant 0 : index
    %c0_6 = arith.constant 0 : index
    %11 = vector.load %arg4[%c0_5, %c0_6] : memref<8x128xbf16, #tpu.memory_space<vmem>>, vector<8x128xbf16>
    tpu.vector_store %arg4[%c0_5, %c0_6], %10 {strides = array<i32>} : memref<8x128xbf16, #tpu.memory_space<vmem>>, vector<8x128xbf16>,
    return
  }
  func.func @transform_0(%arg0: i32) -> (i32, i32) {
    %c0_i32 = arith.constant 0 : i32
    %c0_i32_0 = arith.constant 0 : i32
    return %arg0, %c0_i32 : i32, i32
  }
  func.func @transform_1(%arg0: i32) -> (i32, i32) {
    %c0_i32 = arith.constant 0 : i32
    %c0_i32_0 = arith.constant 0 : i32
    %c0_i32_1 = arith.constant 0 : i32
    return %c0_i32, %c0_i32_0 : i32, i32
  }
  func.func @transform_2(%arg0: i32) -> (i32, i32) {
    %c0_i32 = arith.constant 0 : i32
    %c0_i32_0 = arith.constant 0 : i32
    %c0_i32_1 = arith.constant 0 : i32
    return %c0_i32, %c0_i32_0 : i32, i32
  }
  func.func @transform_3(%arg0: i32) -> (i32, i32) {
    %c0_i32 = arith.constant 0 : i32
    %c0_i32_0 = arith.constant 0 : i32
    return %arg0, %c0_i32 : i32, i32
  }
}

module attributes {stable_mosaic.version = 11 : i64} {
  func.func @_mm_stats_kernel(%arg0: i32, %arg1: memref<32x384xbf16, #tpu.memory_space<vmem>>, %arg2: memref<384x128xbf16, #tpu.memory_space<vmem>>, %arg3: memref<32x128xbf16, #tpu.memory_space<vmem>>, %arg4: memref<1x2x128xf32, #tpu.memory_space<vmem>>) attributes {dimension_semantics = [#tpu.dimension_semantics<parallel>], iteration_bounds = array<i64: 1>, scalar_prefetch = 0 : i64, scratch_operands = 0 : i64, tpu.core_type = #tpu.core_type<tc>, window_params = [{transform_indices = @transform_0, window_bounds = array<i64: 32, 384>}, {pipeline_mode = #tpu.pipeline_mode<synchronous>, transform_indices = @transform_1, window_bounds = array<i64: 384, 128>}, {transform_indices = @transform_2, window_bounds = array<i64: 32, 128>}, {transform_indices = @transform_3, window_bounds = array<i64: 1, 2, 128>}]} {
    %c0 = arith.constant 0 : index
    %c0_0 = arith.constant 0 : index
    %0 = vector.load %arg1[%c0, %c0_0] : memref<32x384xbf16, #tpu.memory_space<vmem>>, vector<32x384xbf16>
    %c0_1 = arith.constant 0 : index
    %c0_2 = arith.constant 0 : index
    %1 = vector.load %arg2[%c0_1, %c0_2] : memref<384x128xbf16, #tpu.memory_space<vmem>>, vector<384x128xbf16>
    %cst = arith.constant dense<0.000000e+00> : vector<32x128xf32>
    %2 = tpu.matmul %0, %1, %cst {dimension_numbers = #tpu.dot_dimension_numbers<[1], [0], [0], [1], [0, 0, 1, 1], [], []>} : vector<32x384xbf16>, vector<384x128xbf16>, vector<32x128xf32> -> vector<32x128xf32>
    %3 = arith.truncf %2 : vector<32x128xf32> to vector<32x128xbf16>
    %c0_3 = arith.constant 0 : index
    %c0_4 = arith.constant 0 : index
    %4 = vector.load %arg3[%c0_3, %c0_4] : memref<32x128xbf16, #tpu.memory_space<vmem>>, vector<32x128xbf16>
    tpu.vector_store %arg3[%c0_3, %c0_4], %3 {strides = array<i32>} : memref<32x128xbf16, #tpu.memory_space<vmem>>, vector<32x128xbf16>,
    %cst_5 = arith.constant dense<0.000000e+00> : vector<128xf32>
    %5 = vector.multi_reduction <add>, %2, %cst_5 [0] : vector<32x128xf32> to vector<128xf32>
    %6 = vector.shape_cast %5 : vector<128xf32> to vector<1x128xf32>
    %7 = arith.mulf %2, %2 : vector<32x128xf32>
    %cst_6 = arith.constant dense<0.000000e+00> : vector<128xf32>
    %8 = vector.multi_reduction <add>, %7, %cst_6 [0] : vector<32x128xf32> to vector<128xf32>
    %9 = vector.shape_cast %8 : vector<128xf32> to vector<1x128xf32>
    %10 = tpu.concatenate %6, %9 in 0 : vector<1x128xf32>, vector<1x128xf32> -> vector<2x128xf32>
    %11 = vector.shape_cast %10 : vector<2x128xf32> to vector<1x2x128xf32>
    %c0_7 = arith.constant 0 : index
    %c0_8 = arith.constant 0 : index
    %c0_9 = arith.constant 0 : index
    %12 = vector.load %arg4[%c0_7, %c0_8, %c0_9] : memref<1x2x128xf32, #tpu.memory_space<vmem>>, vector<1x2x128xf32>
    tpu.vector_store %arg4[%c0_7, %c0_8, %c0_9], %11 {strides = array<i32>} : memref<1x2x128xf32, #tpu.memory_space<vmem>>, vector<1x2x128xf32>,
    return
  }
  func.func @transform_0(%arg0: i32) -> (i32, i32) {
    %c0_i32 = arith.constant 0 : i32
    %c0_i32_0 = arith.constant 0 : i32
    return %arg0, %c0_i32 : i32, i32
  }
  func.func @transform_1(%arg0: i32) -> (i32, i32) {
    %c0_i32 = arith.constant 0 : i32
    %c0_i32_0 = arith.constant 0 : i32
    %c0_i32_1 = arith.constant 0 : i32
    return %c0_i32, %c0_i32_0 : i32, i32
  }
  func.func @transform_2(%arg0: i32) -> (i32, i32) {
    %c0_i32 = arith.constant 0 : i32
    %c0_i32_0 = arith.constant 0 : i32
    return %arg0, %c0_i32 : i32, i32
  }
  func.func @transform_3(%arg0: i32) -> (i32, i32, i32) {
    %c0_i32 = arith.constant 0 : i32
    %c0_i32_0 = arith.constant 0 : i32
    %c0_i32_1 = arith.constant 0 : i32
    return %arg0, %c0_i32, %c0_i32_0 : i32, i32, i32
  }
}

module attributes {stable_mosaic.version = 11 : i64} {
  func.func @_bn_act_kernel(%arg0: i32, %arg1: memref<32x128xbf16, #tpu.memory_space<vmem>>, %arg2: memref<1x128xf32, #tpu.memory_space<vmem>>, %arg3: memref<1x128xf32, #tpu.memory_space<vmem>>, %arg4: memref<32x128xbf16, #tpu.memory_space<vmem>>) attributes {dimension_semantics = [#tpu.dimension_semantics<parallel>], iteration_bounds = array<i64: 1>, scalar_prefetch = 0 : i64, scratch_operands = 0 : i64, tpu.core_type = #tpu.core_type<tc>, window_params = [{transform_indices = @transform_0, window_bounds = array<i64: 32, 128>}, {pipeline_mode = #tpu.pipeline_mode<synchronous>, transform_indices = @transform_1, window_bounds = array<i64: 1, 128>}, {pipeline_mode = #tpu.pipeline_mode<synchronous>, transform_indices = @transform_2, window_bounds = array<i64: 1, 128>}, {transform_indices = @transform_3, window_bounds = array<i64: 32, 128>}]} {
    %c0 = arith.constant 0 : index
    %c0_0 = arith.constant 0 : index
    %0 = vector.load %arg1[%c0, %c0_0] : memref<32x128xbf16, #tpu.memory_space<vmem>>, vector<32x128xbf16>
    %1 = arith.extf %0 : vector<32x128xbf16> to vector<32x128xf32>
    %c0_1 = arith.constant 0 : index
    %c0_2 = arith.constant 0 : index
    %2 = vector.load %arg2[%c0_1, %c0_2] : memref<1x128xf32, #tpu.memory_space<vmem>>, vector<1x128xf32>
    %3 = vector.broadcast %2 : vector<1x128xf32> to vector<32x128xf32>
    %4 = arith.mulf %1, %3 : vector<32x128xf32>
    %c0_3 = arith.constant 0 : index
    %c0_4 = arith.constant 0 : index
    %5 = vector.load %arg3[%c0_3, %c0_4] : memref<1x128xf32, #tpu.memory_space<vmem>>, vector<1x128xf32>
    %6 = vector.broadcast %5 : vector<1x128xf32> to vector<32x128xf32>
    %7 = arith.addf %4, %6 : vector<32x128xf32>
    %cst = arith.constant 0.000000e+00 : f32
    %8 = vector.broadcast %cst : f32 to vector<32x128xf32>
    %9 = arith.maximumf %7, %8 : vector<32x128xf32>
    %10 = arith.truncf %9 : vector<32x128xf32> to vector<32x128xbf16>
    %c0_5 = arith.constant 0 : index
    %c0_6 = arith.constant 0 : index
    %11 = vector.load %arg4[%c0_5, %c0_6] : memref<32x128xbf16, #tpu.memory_space<vmem>>, vector<32x128xbf16>
    tpu.vector_store %arg4[%c0_5, %c0_6], %10 {strides = array<i32>} : memref<32x128xbf16, #tpu.memory_space<vmem>>, vector<32x128xbf16>,
    return
  }
  func.func @transform_0(%arg0: i32) -> (i32, i32) {
    %c0_i32 = arith.constant 0 : i32
    %c0_i32_0 = arith.constant 0 : i32
    return %arg0, %c0_i32 : i32, i32
  }
  func.func @transform_1(%arg0: i32) -> (i32, i32) {
    %c0_i32 = arith.constant 0 : i32
    %c0_i32_0 = arith.constant 0 : i32
    %c0_i32_1 = arith.constant 0 : i32
    return %c0_i32, %c0_i32_0 : i32, i32
  }
  func.func @transform_2(%arg0: i32) -> (i32, i32) {
    %c0_i32 = arith.constant 0 : i32
    %c0_i32_0 = arith.constant 0 : i32
    %c0_i32_1 = arith.constant 0 : i32
    return %c0_i32, %c0_i32_0 : i32, i32
  }
  func.func @transform_3(%arg0: i32) -> (i32, i32) {
    %c0_i32 = arith.constant 0 : i32
    %c0_i32_0 = arith.constant 0 : i32
    return %arg0, %c0_i32 : i32, i32
  }
}

module attributes {stable_mosaic.version = 11 : i64} {
  func.func @_mm_bias_act_kernel(%arg0: i32, %arg1: memref<128x256xbf16, #tpu.memory_space<vmem>>, %arg2: memref<256x128xbf16, #tpu.memory_space<vmem>>, %arg3: memref<1x128xf32, #tpu.memory_space<vmem>>, %arg4: memref<128x128xf32, #tpu.memory_space<vmem>>) attributes {dimension_semantics = [#tpu.dimension_semantics<parallel>], iteration_bounds = array<i64: 1>, scalar_prefetch = 0 : i64, scratch_operands = 0 : i64, tpu.core_type = #tpu.core_type<tc>, window_params = [{transform_indices = @transform_0, window_bounds = array<i64: 128, 256>}, {pipeline_mode = #tpu.pipeline_mode<synchronous>, transform_indices = @transform_1, window_bounds = array<i64: 256, 128>}, {pipeline_mode = #tpu.pipeline_mode<synchronous>, transform_indices = @transform_2, window_bounds = array<i64: 1, 128>}, {transform_indices = @transform_3, window_bounds = array<i64: 128, 128>}]} {
    %c0 = arith.constant 0 : index
    %c0_0 = arith.constant 0 : index
    %0 = vector.load %arg1[%c0, %c0_0] : memref<128x256xbf16, #tpu.memory_space<vmem>>, vector<128x256xbf16>
    %c0_1 = arith.constant 0 : index
    %c0_2 = arith.constant 0 : index
    %1 = vector.load %arg2[%c0_1, %c0_2] : memref<256x128xbf16, #tpu.memory_space<vmem>>, vector<256x128xbf16>
    %cst = arith.constant dense<0.000000e+00> : vector<128x128xf32>
    %2 = tpu.matmul %0, %1, %cst {dimension_numbers = #tpu.dot_dimension_numbers<[1], [0], [0], [1], [0, 0, 1, 1], [], []>} : vector<128x256xbf16>, vector<256x128xbf16>, vector<128x128xf32> -> vector<128x128xf32>
    %c0_3 = arith.constant 0 : index
    %c0_4 = arith.constant 0 : index
    %3 = vector.load %arg3[%c0_3, %c0_4] : memref<1x128xf32, #tpu.memory_space<vmem>>, vector<1x128xf32>
    %4 = vector.broadcast %3 : vector<1x128xf32> to vector<128x128xf32>
    %5 = arith.addf %2, %4 : vector<128x128xf32>
    %6 = math.tanh %5 : vector<128x128xf32>
    %c0_5 = arith.constant 0 : index
    %c0_6 = arith.constant 0 : index
    %7 = vector.load %arg4[%c0_5, %c0_6] : memref<128x128xf32, #tpu.memory_space<vmem>>, vector<128x128xf32>
    tpu.vector_store %arg4[%c0_5, %c0_6], %6 {strides = array<i32>} : memref<128x128xf32, #tpu.memory_space<vmem>>, vector<128x128xf32>,
    return
  }
  func.func @transform_0(%arg0: i32) -> (i32, i32) {
    %c0_i32 = arith.constant 0 : i32
    %c0_i32_0 = arith.constant 0 : i32
    return %arg0, %c0_i32 : i32, i32
  }
  func.func @transform_1(%arg0: i32) -> (i32, i32) {
    %c0_i32 = arith.constant 0 : i32
    %c0_i32_0 = arith.constant 0 : i32
    %c0_i32_1 = arith.constant 0 : i32
    return %c0_i32, %c0_i32_0 : i32, i32
  }
  func.func @transform_2(%arg0: i32) -> (i32, i32) {
    %c0_i32 = arith.constant 0 : i32
    %c0_i32_0 = arith.constant 0 : i32
    %c0_i32_1 = arith.constant 0 : i32
    return %c0_i32, %c0_i32_0 : i32, i32
  }
  func.func @transform_3(%arg0: i32) -> (i32, i32) {
    %c0_i32 = arith.constant 0 : i32
    %c0_i32_0 = arith.constant 0 : i32
    return %arg0, %c0_i32 : i32, i32
  }
}

</mosaic_0001>

<bundles_post_ra>
// kernel: unet_generator_forward.14
= control target key start
LH: loop header
LB: loop body
LE: loop exit
PB: predicated region body
PF: predicated region fallthrough
CT: control target
= control target key end

     0   :  { %s674_s1 = inlined_call_operand.vmem [shape: bf16[128,128], index: 1, kind: input, shape index: {}]   ;;  %s675_s0 = inlined_call_operand.vmem [shape: bf16[128,128], index: 0, kind: input, shape index: {}]   ;;  %s676_s2 = inlined_call_operand.vmem [shape: f32[1,128], index: 2, kind: input, shape index: {}]   ;;  %s677_s3 = inlined_call_operand.vmem [shape: bf16[128,128], index: 3, kind: output, shape index: {}]  }
   0x1   :  { %v539_v0 = vld [vmem:[%s674_s1 + $0x38] sm:$0xff]   ;;  %v540_v1 = vld [vmem:[%s674_s1 + $0x30] sm:$0xff]   ;;  %v541_v2 = vld [vmem:[%s674_s1 + $0x28] sm:$0xff]  }
   0x2   :  { %491 = vmatprep.subr.bf16.mxu0 %v539_v0  ;;  %523 = vmatprep.subr.bf16.mxu1 %v539_v0  ;;  %v542_v3 = vld [vmem:[%s674_s1 + $0x20] sm:$0xff]   ;;  %v543_v6 = vld [vmem:[%s674_s1 + $0x18] sm:$0xff]   ;;  %v544_v7 = vld [vmem:[%s674_s1 + $0x10] sm:$0xff]  }
   0x3   :  { %492 = vmatpush3.bf16.msra.mxu0 %v539_v0  ;;  %531 = vmatpush3.bf16.msra.mxu1 %v539_v0  ;;  %v547_v4 = vld [vmem:[%s675_s0] sm:$0xff]   ;;  %v545_v8 = vld [vmem:[%s674_s1 + $0x8] sm:$0xff]   ;;  %v551_v12 = vld [vmem:[%s675_s0 + $0x10] sm:$0xff]  }
   0x4   :  { %493 = vmatprep.subr.bf16.mxu0 %v540_v1  ;;  %524 = vmatprep.subr.bf16.mxu1 %v540_v1  ;;  %v548_v5 = vld [vmem:[%s675_s0 + $0x20] sm:$0xff]   ;;  %v549_v10 = vld [vmem:[%s675_s0 + $0x8] sm:$0xff]   ;;  %v552_v13 = vld [vmem:[%s675_s0 + $0x30] sm:$0xff]  }
   0x5   :  { %507 = vmatprep.mubr.bf16.mxu0 %v547_v4  ;;  %515 = vmatprep.mubr.bf16.mxu1 %v548_v5  ;;  %v546_v9 = vld [vmem:[%s674_s1] sm:$0xff]   ;;  %v550_v11 = vld [vmem:[%s675_s0 + $0x28] sm:$0xff]   ;;  %v553_v14 = vld [vmem:[%s675_s0 + $0x18] sm:$0xff]  }
   0x6   :  { %v554_v15 = vld [vmem:[%s675_s0 + $0x38] sm:$0xff]   ;;  %v626_v16 = vld [vmem:[%s676_s2] ss:$0 sm:$0xff] }
   0x7   :  { %494 = vmatpush3.bf16.msra.mxu0 %v540_v1  ;;  %532 = vmatpush3.bf16.msra.mxu1 %v540_v1 }
   0x8   :  { %495 = vmatprep.subr.bf16.mxu0 %v541_v2  ;;  %525 = vmatprep.subr.bf16.mxu1 %v541_v2 }
   0xb   :  { %496 = vmatpush3.bf16.msra.mxu0 %v541_v2  ;;  %533 = vmatpush3.bf16.msra.mxu1 %v541_v2 }
   0xc   :  { %497 = vmatprep.subr.bf16.mxu0 %v542_v3  ;;  %526 = vmatprep.subr.bf16.mxu1 %v542_v3 }
   0xf   :  { %498 = vmatpush3.bf16.msra.mxu0 %v542_v3  ;;  %534 = vmatpush3.bf16.msra.mxu1 %v542_v3 }
  0x10   :  { %499 = vmatprep.subr.bf16.mxu0 %v543_v6  ;;  %527 = vmatprep.subr.bf16.mxu1 %v543_v6 }
  0x13   :  { %500 = vmatpush3.bf16.msra.mxu0 %v543_v6  ;;  %535 = vmatpush3.bf16.msra.mxu1 %v543_v6 }
  0x14   :  { %501 = vmatprep.subr.bf16.mxu0 %v544_v7  ;;  %528 = vmatprep.subr.bf16.mxu1 %v544_v7 }
  0x17   :  { %502 = vmatpush3.bf16.msra.mxu0 %v544_v7  ;;  %536 = vmatpush3.bf16.msra.mxu1 %v544_v7 }
  0x18   :  { %503 = vmatprep.subr.bf16.mxu0 %v545_v8  ;;  %529 = vmatprep.subr.bf16.mxu1 %v545_v8 }
  0x1b   :  { %504 = vmatpush3.bf16.msra.mxu0 %v545_v8  ;;  %537 = vmatpush3.bf16.msra.mxu1 %v545_v8 }
  0x1c   :  { %505 = vmatprep.subr.bf16.mxu0 %v546_v9  ;;  %530 = vmatprep.subr.bf16.mxu1 %v546_v9 }
  0x1f   :  { %506 = vmatpush3.bf16.msra.mxu0 %v546_v9  ;;  %538 = vmatpush3.bf16.msra.mxu1 %v546_v9 }
  0x22   :  { %508 = vmatmul.mubr.bf16.vlgmr.msra.gmra.mxu0 %v549_v10  ;;  %516 = vmatmul.mubr.bf16.vlgmr.msra.gmra.mxu1 %v550_v11 }
  0x23   :  { %511 = vmatprep.mubr.bf16.mxu0 %v551_v12  ;;  %519 = vmatprep.mubr.bf16.mxu1 %v552_v13 }
  0x2a   :  { %512 = vmatmul.mubr.bf16.gmra.mxu0 %v553_v14  ;;  %520 = vmatmul.mubr.bf16.gmra.mxu1 %v554_v15 }
  0xe2   :  { %v509_v17 = vpop.f32.mrf.mxu0  ;;  %v517_v18 = vpop.f32.mrf.mxu1 }
  0xe3   :  { %v193_v19 = vadd.f32 %v509_v17, %v626_v16  ;;  %v225_v20 = vadd.f32 %v517_v18, %v626_v16 }
  0xe4   :  { %v184_v21 = vpop.f32.mrf.mxu0  ;;  %v216_v22 = vpop.f32.mrf.mxu1 }
  0xe5   :  { %vm249_vm0 = vcmp.gt.f32.partialorder %v193_v19, 0.0  ;;  %v265_v23 = vmul.f32 0.2, %v193_v19  ;;  %vm257_vm1 = vcmp.gt.f32.partialorder %v225_v20, 0.0  ;;  %v273_v24 = vmul.f32 0.2, %v225_v20 }
  0xe6   :  { %v185_v25 = vadd.f32 %v626_v16, %v184_v21  ;;  %v217_v26 = vadd.f32 %v626_v16, %v216_v22  ;;  %v510_v27 = vpop.f32.mrf.mxu0  ;;  %v518_v28 = vpop.f32.mrf.mxu1 }
  0xe7   :  { %v196_v29 = vadd.f32 %v510_v27, %v626_v16  ;;  %v228_v30 = vadd.f32 %v518_v28, %v626_v16  ;;  %v281_v31 = vsel %vm249_vm0, %v193_v19, %v265_v23  ;;  %v289_v32 = vsel %vm257_vm1, %v225_v20, %v273_v24 }
  0xe8   :  { %vm247_vm2 = vcmp.gt.f32.partialorder %v185_v25, 0.0  ;;  %v263_v33 = vmul.f32 0.2, %v185_v25  ;;  %v187_v34 = vpop.f32.mrf.mxu0  ;;  %v219_v35 = vpop.f32.mrf.mxu1  ;;  %vm255_vm5 = vcmp.gt.f32.partialorder %v217_v26, 0.0  ;;  %v271_v38 = vmul.f32 0.2, %v217_v26 }
  0xe9   :  { %vm250_vm3 = vcmp.gt.f32.partialorder %v196_v29, 0.0  ;;  %v266_v36 = vmul.f32 0.2, %v196_v29  ;;  %vm258_vm4 = vcmp.gt.f32.partialorder %v228_v30, 0.0  ;;  %v274_v37 = vmul.f32 0.2, %v228_v30 }
  0xea   :  { %v188_v39 = vadd.f32 %v626_v16, %v187_v34  ;;  %v220_v40 = vadd.f32 %v626_v16, %v219_v35  ;;  %v513_v41 = vpop.f32.mrf.mxu0  ;;  %v521_v42 = vpop.f32.mrf.mxu1  ;;  %v279_v53 = vsel %vm247_vm2, %v185_v25, %v263_v33  ;;  %v287_v58 = vsel %vm255_vm5, %v217_v26, %v271_v38 }
  0xeb   :  { %v282_v43 = vsel %vm250_vm3, %v196_v29, %v266_v36  ;;  %v290_v44 = vsel %vm258_vm4, %v228_v30, %v274_v37  ;;  %v209_v45 = vadd.f32 %v513_v41, %v626_v16  ;;  %v241_v46 = vadd.f32 %v521_v42, %v626_v16 }
  0xec   :  { %v436_v47 = vpack.c.bf16 %v282_v43, %v281_v31  ;;  %v456_v48 = vpack.c.bf16 %v290_v44, %v289_v32  ;;  %vm248_vm6 = vcmp.gt.f32.partialorder %v188_v39, 0.0  ;;  %v264_v49 = vmul.f32 0.2, %v188_v39  ;;  %v200_v50 = vpop.f32.mrf.mxu0  ;;  %v232_v51 = vpop.f32.mrf.mxu1 }
  0xed   :  { %vm256_vm7 = vcmp.gt.f32.partialorder %v220_v40, 0.0  ;;  %v272_v52 = vmul.f32 0.2, %v220_v40  ;;  %v201_v55 = vadd.f32 %v626_v16, %v200_v50  ;;  %v233_v61 = vadd.f32 %v626_v16, %v232_v51 }
  0xee   :  { %468 = vst [vmem:[%s677_s3 + $0x8] sm:$0xff] %v436_v47   ;;  %472 = vst [vmem:[%s677_s3 + $0x28] sm:$0xff] %v456_v48   ;;  %v280_v54 = vsel %vm248_vm6, %v188_v39, %v264_v49  ;;  %v514_v56 = vpop.f32.mrf.mxu0  ;;  %v522_v57 = vpop.f32.mrf.mxu1  ;;  %vm253_vm8 = vcmp.gt.f32.partialorder %v209_v45, 0.0  ;;  %v269_v63 = vmul.f32 0.2, %v209_v45  ;;  %vm261_vm9 = vcmp.gt.f32.partialorder %v241_v46, 0.0 }
  0xef   :  { %v431_v59 = vpack.c.bf16 %v280_v54, %v279_v53  ;;  %v288_v60 = vsel %vm256_vm7, %v220_v40, %v272_v52  ;;  %v277_v2 = vmul.f32 0.2, %v241_v46  ;;  %vm251_vm10 = vcmp.gt.f32.partialorder %v201_v55, 0.0 }
  0xf0   :  { %v451_v62 = vpack.c.bf16 %v288_v60, %v287_v58  ;;  %v203_v0 = vpop.f32.mrf.mxu0  ;;  %v235_v1 = vpop.f32.mrf.mxu1  ;;  %v212_v3 = vadd.f32 %v514_v56, %v626_v16  ;;  %v244_v4 = vadd.f32 %v522_v57, %v626_v16  ;;  %v267_v5 = vmul.f32 0.2, %v201_v55 }
  0xf1   :  { %432 = vst [vmem:[%s677_s3] sm:$0xff] %v431_v59   ;;  %vm259_vm11 = vcmp.gt.f32.partialorder %v233_v61, 0.0  ;;  %v204_v6 = vadd.f32 %v626_v16, %v203_v0  ;;  %v236_v7 = vadd.f32 %v626_v16, %v235_v1  ;;  %v275_v8 = vmul.f32 0.2, %v233_v61 }
  0xf2   :  { %471 = vst [vmem:[%s677_s3 + $0x20] sm:$0xff] %v451_v62   ;;  %vm254_vm12 = vcmp.gt.f32.partialorder %v212_v3, 0.0  ;;  %v270_v9 = vmul.f32 0.2, %v212_v3  ;;  %vm262_vm13 = vcmp.gt.f32.partialorder %v244_v4, 0.0  ;;  %v285_v12 = vsel %vm253_vm8, %v209_v45, %v269_v63 }
  0xf3   :  { %v278_v10 = vmul.f32 0.2, %v244_v4  ;;  %vm252_vm14 = vcmp.gt.f32.partialorder %v204_v6, 0.0  ;;  %v268_v11 = vmul.f32 0.2, %v204_v6  ;;  %vm260_vm15 = vcmp.gt.f32.partialorder %v236_v7, 0.0 }
  0xf4   :  { %v293_v13 = vsel %vm261_vm9, %v241_v46, %v277_v2  ;;  %v286_v14 = vsel %vm254_vm12, %v212_v3, %v270_v9  ;;  %v276_v15 = vmul.f32 0.2, %v236_v7  ;;  %v283_v17 = vsel %vm251_vm10, %v201_v55, %v267_v5 }
  0xf5   :  { %v446_v18 = vpack.c.bf16 %v286_v14, %v285_v12  ;;  %v294_v19 = vsel %vm262_vm13, %v244_v4, %v278_v10  ;;  %v284_v20 = vsel %vm252_vm14, %v204_v6, %v268_v11  ;;  %v291_v16 = vsel %vm259_vm11, %v233_v61, %v275_v8 }
  0xf6   :  { %v466_v21 = vpack.c.bf16 %v294_v19, %v293_v13  ;;  %v441_v22 = vpack.c.bf16 %v284_v20, %v283_v17  ;;  %v292_v23 = vsel %vm260_vm15, %v236_v7, %v276_v15 }
  0xf7   :  { %470 = vst [vmem:[%s677_s3 + $0x18] sm:$0xff] %v446_v18   ;;  %v461_v24 = vpack.c.bf16 %v292_v23, %v291_v16 }
  0xf8   :  { %474 = vst [vmem:[%s677_s3 + $0x38] sm:$0xff] %v466_v21   ;;  %469 = vst [vmem:[%s677_s3 + $0x10] sm:$0xff] %v441_v22  }
  0xf9   :  { %473 = vst [vmem:[%s677_s3 + $0x30] sm:$0xff] %v461_v24  }

// kernel: unet_generator_forward.15
= control target key start
LH: loop header
LB: loop body
LE: loop exit
PB: predicated region body
PF: predicated region fallthrough
CT: control target
= control target key end

     0   :  { %vm257_vm0 = vcmask 1040384   ;;  %s462_s1 = inlined_call_operand.vmem [shape: bf16[256,128], index: 1, kind: input, shape index: {}]   ;;  %s463_s0 = inlined_call_operand.vmem [shape: bf16[32,256], index: 0, kind: input, shape index: {}]   ;;  %s464_s2 = inlined_call_operand.vmem [shape: bf16[32,128], index: 2, kind: output, shape index: {0}]   ;;  %s465_s3 = inlined_call_operand.vmem [shape: f32[1,2,128], index: 3, kind: output, shape index: {1}]  }
   0x1   :  { %v351_v0 = vld [vmem:[%s462_s1 + $0x78] sm:$0xff]   ;;  %v353_v2 = vld [vmem:[%s462_s1 + $0x70] sm:$0xff]   ;;  %v355_v4 = vld [vmem:[%s462_s1 + $0x68] sm:$0xff]  }
   0x2   :  { %v352_v1 = vld [vmem:[%s462_s1 + $0x38] sm:$0xff]   ;;  %307 = vmatprep.subr.bf16.mxu0 %v351_v0  ;;  %335 = vmatprep.subr.bf16.mxu1 %v351_v0  ;;  %v354_v3 = vld [vmem:[%s462_s1 + $0x30] sm:$0xff]   ;;  %v356_v5 = vld [vmem:[%s462_s1 + $0x28] sm:$0xff]  }
   0x3   :  { %308 = vmatpush3.bf16.msra.mxu0 %v352_v1  ;;  %343 = vmatpush3.bf16.msra.mxu1 %v352_v1  ;;  %v357_v6 = vld [vmem:[%s462_s1 + $0x60] sm:$0xff]   ;;  %v359_v8 = vld [vmem:[%s462_s1 + $0x58] sm:$0xff]   ;;  %v361_v10 = vld [vmem:[%s462_s1 + $0x50] sm:$0xff]  }
   0x4   :  { %309 = vmatprep.subr.bf16.mxu0 %v353_v2  ;;  %336 = vmatprep.subr.bf16.mxu1 %v353_v2  ;;  %v358_v7 = vld [vmem:[%s462_s1 + $0x20] sm:$0xff]   ;;  %v360_v9 = vld [vmem:[%s462_s1 + $0x18] sm:$0xff]   ;;  %v362_v13 = vld [vmem:[%s462_s1 + $0x10] sm:$0xff]  }
   0x5   :  { %v369_v11 = vld [vmem:[%s463_s0 + $0x4] ss:$8 sps:$4 sm:$0xff]   ;;  %v372_v12 = vld [vmem:[%s463_s0 + $0x14] ss:$8 sps:$4 sm:$0xff]   ;;  %v367_v18 = vld [vmem:[%s463_s0] ss:$8 sps:$4 sm:$0xff]  }
   0x6   :  { %v363_v14 = vld [vmem:[%s462_s1 + $0x48] sm:$0xff]   ;;  %198 = vmatprep.mubr.bf16.mxu0 %v369_v11  ;;  %206 = vmatprep.mubr.bf16.mxu1 %v372_v12  ;;  %v365_v16 = vld [vmem:[%s462_s1 + $0x40] sm:$0xff]   ;;  %v370_v19 = vld [vmem:[%s463_s0 + $0x10] ss:$8 sps:$4 sm:$0xff]  }
   0x7   :  { %310 = vmatpush3.bf16.msra.mxu0 %v354_v3  ;;  %344 = vmatpush3.bf16.msra.mxu1 %v354_v3  ;;  %v364_v15 = vld [vmem:[%s462_s1 + $0x8] sm:$0xff]   ;;  %v366_v17 = vld [vmem:[%s462_s1] sm:$0xff]  }
   0x8   :  { %311 = vmatprep.subr.bf16.mxu0 %v355_v4  ;;  %337 = vmatprep.subr.bf16.mxu1 %v355_v4 }
   0xb   :  { %312 = vmatpush3.bf16.msra.mxu0 %v356_v5  ;;  %345 = vmatpush3.bf16.msra.mxu1 %v356_v5 }
   0xc   :  { %313 = vmatprep.subr.bf16.mxu0 %v357_v6  ;;  %338 = vmatprep.subr.bf16.mxu1 %v357_v6 }
   0xf   :  { %314 = vmatpush3.bf16.msra.mxu0 %v358_v7  ;;  %346 = vmatpush3.bf16.msra.mxu1 %v358_v7 }
  0x10   :  { %315 = vmatprep.subr.bf16.mxu0 %v359_v8  ;;  %339 = vmatprep.subr.bf16.mxu1 %v359_v8 }
  0x13   :  { %316 = vmatpush3.bf16.msra.mxu0 %v360_v9  ;;  %347 = vmatpush3.bf16.msra.mxu1 %v360_v9 }
  0x14   :  { %317 = vmatprep.subr.bf16.mxu0 %v361_v10  ;;  %340 = vmatprep.subr.bf16.mxu1 %v361_v10 }
  0x17   :  { %318 = vmatpush3.bf16.msra.mxu0 %v362_v13  ;;  %348 = vmatpush3.bf16.msra.mxu1 %v362_v13 }
  0x18   :  { %319 = vmatprep.subr.bf16.mxu0 %v363_v14  ;;  %341 = vmatprep.subr.bf16.mxu1 %v363_v14 }
  0x1b   :  { %320 = vmatpush3.bf16.msra.mxu0 %v364_v15  ;;  %349 = vmatpush3.bf16.msra.mxu1 %v364_v15 }
  0x1c   :  { %321 = vmatprep.subr.bf16.mxu0 %v365_v16  ;;  %342 = vmatprep.subr.bf16.mxu1 %v365_v16 }
  0x1f   :  { %322 = vmatpush3.bf16.msra.mxu0 %v366_v17  ;;  %350 = vmatpush3.bf16.msra.mxu1 %v366_v17 }
  0x22   :  { %199 = vmatmul.mubr.bf16.vlgmr.msra.gmra.mxu0 %v367_v18  ;;  %207 = vmatmul.mubr.bf16.vlgmr.msra.gmra.mxu1 %v370_v19 }
  0xe2   :  { %v323_v20 = vpop.f32.mrf.mxu0  ;;  %v329_v21 = vpop.f32.mrf.mxu1 }
  0xe4   :  { %v324_v22 = vpop.f32.mrf.mxu0  ;;  %v330_v23 = vpop.f32.mrf.mxu1 }
  0xe5   :  { %v325_v24 = vadd.f32 %v324_v22, %v323_v20  ;;  %v331_v29 = vadd.f32 %v330_v23, %v329_v21 }
  0xe6   :  { %v326_v25 = vpop.f32.mrf.mxu0  ;;  %v332_v26 = vpop.f32.mrf.mxu1 }
  0xe7   :  { %v244_v32 = vmul.f32 %v325_v24, %v325_v24  ;;  %v246_v37 = vmul.f32 %v331_v29, %v331_v29 }
  0xe8   :  { %v327_v27 = vpop.f32.mrf.mxu0  ;;  %v333_v28 = vpop.f32.mrf.mxu1 }
  0xe9   :  { %v328_v30 = vadd.f32 %v327_v27, %v326_v25  ;;  %v334_v31 = vadd.f32 %v333_v28, %v332_v26 }
  0xeb   :  { %v299_v33 = vpack.c.bf16 %v328_v30, %v325_v24  ;;  %v235_v34 = vadd.f32 %v328_v30, %v325_v24  ;;  %v245_v35 = vmul.f32 %v328_v30, %v328_v30  ;;  %v304_v36 = vpack.c.bf16 %v334_v31, %v331_v29 }
  0xec   :  { %v247_v41 = vmul.f32 %v334_v31, %v334_v31 }
  0xed   :  { %300 = vst [vmem:[%s464_s2] sm:$0xff] %v299_v33   ;;  %v248_v38 = vadd.f32 %v245_v35, %v244_v32  ;;  %306 = vst [vmem:[%s464_s2 + $0x8] sm:$0xff] %v304_v36   ;;  %v236_v39 = vadd.f32 %v331_v29, %v235_v34 }
  0xef   :  { %v237_v40 = vadd.f32 %v334_v31, %v236_v39  ;;  %v249_v42 = vadd.f32 %v248_v38, %v246_v37 }
  0xf1   :  { %v238_v43 = vrot.slane %v237_v40, 4  ;;  %v250_v44 = vadd.f32 %v249_v42, %v247_v41 }
  0xf3   :  { %v239_v45 = vadd.f32 %v238_v43, %v237_v40  ;;  %v251_v46 = vrot.slane %v250_v44, 4 }
  0xf5   :  { %v240_v47 = vrot.slane %v239_v45, 2  ;;  %v252_v48 = vadd.f32 %v251_v46, %v250_v44 }
  0xf7   :  { %v241_v49 = vadd.f32 %v240_v47, %v239_v45  ;;  %v253_v50 = vrot.slane %v252_v48, 2 }
  0xf9   :  { %v242_v51 = vrot.slane %v241_v49, 1  ;;  %v254_v52 = vadd.f32 %v253_v50, %v252_v48 }
  0xfb   :  { %v255_v53 = vrot.slane %v254_v52, 1  ;;  %v243_v54 = vadd.f32 %v242_v51, %v241_v49 }
  0xfd   :  { %v256_v55 = vadd.f32 %v255_v53, %v254_v52 }
  0xff   :  { %v258_v56 = vsel %vm257_vm0, %v243_v54, %v256_v55 }
 0x100   :  { %259 = vst [vmem:[%s465_s3] sm:$0x3] %v258_v56 }

// kernel: unet_generator_forward.16
= control target key start
LH: loop header
LB: loop body
LE: loop exit
PB: predicated region body
PF: predicated region fallthrough
CT: control target
= control target key end

     0   :  { %s148_s0 = inlined_call_operand.vmem [shape: bf16[32,128], index: 0, kind: input, shape index: {}]   ;;  %s149_s1 = inlined_call_operand.vmem [shape: f32[1,128], index: 1, kind: input, shape index: {}]   ;;  %s150_s2 = inlined_call_operand.vmem [shape: f32[1,128], index: 2, kind: input, shape index: {}]   ;;  %s151_s3 = inlined_call_operand.vmem [shape: bf16[32,128], index: 3, kind: output, shape index: {}]  }
   0x1   :  { %v91_v0 = vld [vmem:[%s148_s0] sm:$0xff]   ;;  %v108_v4 = vld [vmem:[%s148_s0 + $0x8] sm:$0xff]  }
   0x2   :  { %v80_v1 = vld [vmem:[%s149_s1] ss:$0 sm:$0xff]  ;;  %v92_v2 = vunpack.c.l.bf16 %v91_v0  ;;  %v93_v3 = vunpack.c.h.bf16 %v91_v0  ;;  %v96_v6 = vunpack.c.l.bf16 %v108_v4  ;;  %v97_v7 = vunpack.c.h.bf16 %v108_v4 }
   0x3   :  { %v81_v5 = vld [vmem:[%s150_s2] ss:$0 sm:$0xff] }
   0x4   :  { %v29_v8 = vmul.f32 %v92_v2, %v80_v1  ;;  %v30_v9 = vmul.f32 %v93_v3, %v80_v1  ;;  %v31_v10 = vmul.f32 %v96_v6, %v80_v1  ;;  %v32_v11 = vmul.f32 %v97_v7, %v80_v1 }
   0x6   :  { %v40_v12 = vadd.f32 %v81_v5, %v29_v8  ;;  %v41_v13 = vadd.f32 %v81_v5, %v30_v9  ;;  %v42_v14 = vadd.f32 %v81_v5, %v31_v10  ;;  %v43_v15 = vadd.f32 %v81_v5, %v32_v11 }
   0x8   :  { %vm44_vm0 = vcmp.gt.f32.partialorder %v40_v12, 0.0  ;;  %vm45_vm1 = vcmp.gt.f32.partialorder %v41_v13, 0.0  ;;  %v48_v16 = vmul.f32 0.2, %v40_v12  ;;  %v49_v17 = vmul.f32 0.2, %v41_v13 }
   0x9   :  { %vm46_vm2 = vcmp.gt.f32.partialorder %v42_v14, 0.0  ;;  %vm47_vm3 = vcmp.gt.f32.partialorder %v43_v15, 0.0  ;;  %v50_v18 = vmul.f32 0.2, %v42_v14  ;;  %v51_v19 = vmul.f32 0.2, %v43_v15 }
   0xa   :  { %v52_v20 = vsel %vm44_vm0, %v40_v12, %v48_v16  ;;  %v53_v21 = vsel %vm45_vm1, %v41_v13, %v49_v17 }
   0xb   :  { %v101_v22 = vpack.c.bf16 %v53_v21, %v52_v20  ;;  %v54_v23 = vsel %vm46_vm2, %v42_v14, %v50_v18  ;;  %v55_v24 = vsel %vm47_vm3, %v43_v15, %v51_v19 }
   0xc   :  { %v106_v25 = vpack.c.bf16 %v55_v24, %v54_v23 }
   0xd   :  { %102 = vst [vmem:[%s151_s3] sm:$0xff] %v101_v22  }
   0xe   :  { %109 = vst [vmem:[%s151_s3 + $0x8] sm:$0xff] %v106_v25  }

// kernel: unet_generator_forward.18
= control target key start
LH: loop header
LB: loop body
LE: loop exit
PB: predicated region body
PF: predicated region fallthrough
CT: control target
= control target key end

     0   :  { %s75_s0 = inlined_call_operand.vmem [shape: bf16[8,128], index: 0, kind: input, shape index: {}]   ;;  %s76_s1 = inlined_call_operand.vmem [shape: f32[1,128], index: 1, kind: input, shape index: {}]   ;;  %s77_s2 = inlined_call_operand.vmem [shape: f32[1,128], index: 2, kind: input, shape index: {}]   ;;  %s78_s3 = inlined_call_operand.vmem [shape: bf16[8,128], index: 3, kind: output, shape index: {}]  }
   0x1   :  { %v14_v0 = vld [vmem:[%s75_s0] sm:$0xf] }
   0x2   :  { %v41_v1 = vld [vmem:[%s76_s1] ss:$0 sm:$0xff]  ;;  %v15_v2 = vunpack.c.l.bf16 %v14_v0 }
   0x3   :  { %v42_v3 = vld [vmem:[%s77_s2] ss:$0 sm:$0xff] }
   0x4   :  { %v23_v4 = vmul.f32 %v41_v1, %v15_v2 }
   0x6   :  { %v31_v5 = vadd.f32 %v42_v3, %v23_v4 }
   0x8   :  { %vm32_vm0 = vcmp.gt.f32.partialorder %v31_v5, 0.0  ;;  %v33_v6 = vmul.f32 0.2, %v31_v5 }
   0xa   :  { %v34_v7 = vsel %vm32_vm0, %v31_v5, %v33_v6 }
   0xb   :  { %v35_v8 = vpack.c.bf16 %v34_v7, %v34_v7 }
   0xd   :  { %36 = vst [vmem:[%s78_s3] sm:$0xf] %v35_v8 }

// kernel: unet_generator_forward.17
= control target key start
LH: loop header
LB: loop body
LE: loop exit
PB: predicated region body
PF: predicated region fallthrough
CT: control target
= control target key end

     0   :  { %vm381_vm0 = vcmask 1040384   ;;  %s636_s1 = inlined_call_operand.vmem [shape: bf16[512,128], index: 1, kind: input, shape index: {}]   ;;  %s637_s0 = inlined_call_operand.vmem [shape: bf16[8,512], index: 0, kind: input, shape index: {}]   ;;  %s638_s2 = inlined_call_operand.vmem [shape: bf16[8,128], index: 2, kind: output, shape index: {0}]   ;;  %s639_s3 = inlined_call_operand.vmem [shape: f32[1,2,128], index: 3, kind: output, shape index: {1}]  }
   0x1   :  { %v472_v0 = vld [vmem:[%s636_s1 + $0x78] sm:$0xff]   ;;  %v476_v4 = vld [vmem:[%s636_s1 + $0x70] sm:$0xff]   ;;  %v480_v8 = vld [vmem:[%s636_s1 + $0x68] sm:$0xff]  }
   0x2   :  { %v473_v1 = vld [vmem:[%s636_s1 + $0xf8] sm:$0xff]   ;;  %428 = vmatprep.subr.bf16.mxu0 %v472_v0  ;;  %v477_v5 = vld [vmem:[%s636_s1 + $0xf0] sm:$0xff]   ;;  %v481_v9 = vld [vmem:[%s636_s1 + $0xe8] sm:$0xff]  }
   0x3   :  { %v474_v2 = vld [vmem:[%s636_s1 + $0x38] sm:$0xff]   ;;  %450 = vmatprep.subr.bf16.mxu1 %v473_v1  ;;  %v478_v6 = vld [vmem:[%s636_s1 + $0x30] sm:$0xff]   ;;  %v482_v10 = vld [vmem:[%s636_s1 + $0x28] sm:$0xff]  }
   0x4   :  { %v475_v3 = vld [vmem:[%s636_s1 + $0xb8] sm:$0xff]   ;;  %429 = vmatpush3.bf16.msra.mxu0 %v474_v2  ;;  %v479_v7 = vld [vmem:[%s636_s1 + $0xb0] sm:$0xff]   ;;  %v483_v11 = vld [vmem:[%s636_s1 + $0xa8] sm:$0xff]  }
   0x5   :  { %451 = vmatpush3.bf16.msra.mxu1 %v475_v3  ;;  %430 = vmatprep.subr.bf16.mxu0 %v476_v4  ;;  %v484_v12 = vld [vmem:[%s636_s1 + $0x60] sm:$0xff]   ;;  %v488_v16 = vld [vmem:[%s636_s1 + $0x58] sm:$0xff]   ;;  %v492_v20 = vld [vmem:[%s636_s1 + $0x50] sm:$0xff]  }
   0x6   :  { %452 = vmatprep.subr.bf16.mxu1 %v477_v5  ;;  %v485_v13 = vld [vmem:[%s636_s1 + $0xe0] sm:$0xff]   ;;  %v489_v17 = vld [vmem:[%s636_s1 + $0xd8] sm:$0xff]   ;;  %v493_v21 = vld [vmem:[%s636_s1 + $0xd0] sm:$0xff]  }
   0x7   :  { %v486_v14 = vld [vmem:[%s636_s1 + $0x20] sm:$0xff]   ;;  %v490_v18 = vld [vmem:[%s636_s1 + $0x18] sm:$0xff]   ;;  %v494_v22 = vld [vmem:[%s636_s1 + $0x10] sm:$0xff]  }
   0x8   :  { %431 = vmatpush3.bf16.msra.mxu0 %v478_v6  ;;  %v487_v15 = vld [vmem:[%s636_s1 + $0xa0] sm:$0xff]   ;;  %v491_v19 = vld [vmem:[%s636_s1 + $0x98] sm:$0xff]   ;;  %v495_v23 = vld [vmem:[%s636_s1 + $0x90] sm:$0xff]  }
   0x9   :  { %453 = vmatpush3.bf16.msra.mxu1 %v479_v7  ;;  %432 = vmatprep.subr.bf16.mxu0 %v480_v8  ;;  %v496_v24 = vld [vmem:[%s636_s1 + $0x48] sm:$0xff]   ;;  %v500_v28 = vld [vmem:[%s636_s1 + $0x40] sm:$0xff]  }
   0xa   :  { %454 = vmatprep.subr.bf16.mxu1 %v481_v9  ;;  %v497_v25 = vld [vmem:[%s636_s1 + $0xc8] sm:$0xff]   ;;  %v501_v29 = vld [vmem:[%s636_s1 + $0xc0] sm:$0xff]  }
   0xb   :  { %v498_v26 = vld [vmem:[%s636_s1 + $0x8] sm:$0xff]   ;;  %v502_v30 = vld [vmem:[%s636_s1] sm:$0xff]  }
   0xc   :  { %433 = vmatpush3.bf16.msra.mxu0 %v482_v10  ;;  %v499_v27 = vld [vmem:[%s636_s1 + $0x88] sm:$0xff]   ;;  %v503_v31 = vld [vmem:[%s636_s1 + $0x80] sm:$0xff]  }
   0xd   :  { %455 = vmatpush3.bf16.msra.mxu1 %v483_v11  ;;  %434 = vmatprep.subr.bf16.mxu0 %v484_v12  ;;  %v14_v32 = vld [vmem:[%s637_s0] sm:$0xff]  ;;  %v15_v33 = vld [vmem:[%s637_s0 + $0x8] sm:$0xff] }
   0xe   :  { %456 = vmatprep.subr.bf16.mxu1 %v485_v13  ;;  %v392_v34 = vcombine.low %v14_v32, %v14_v32  ;;  %v393_v35 = vcombine.high %v14_v32, %v14_v32  ;;  %v394_v36 = vcombine.low %v15_v33, %v15_v33  ;;  %v395_v37 = vcombine.high %v15_v33, %v15_v33 }
  0x10   :  { %435 = vmatpush3.bf16.msra.mxu0 %v486_v14  ;;  %318 = vmatprep.mubr.bf16.mxu0 %v393_v35 }
  0x11   :  { %457 = vmatpush3.bf16.msra.mxu1 %v487_v15  ;;  %436 = vmatprep.subr.bf16.mxu0 %v488_v16 }
  0x12   :  { %458 = vmatprep.subr.bf16.mxu1 %v489_v17  ;;  %358 = vmatprep.mubr.bf16.mxu1 %v395_v37 }
  0x14   :  { %437 = vmatpush3.bf16.msra.mxu0 %v490_v18 }
  0x15   :  { %459 = vmatpush3.bf16.msra.mxu1 %v491_v19  ;;  %438 = vmatprep.subr.bf16.mxu0 %v492_v20 }
  0x16   :  { %460 = vmatprep.subr.bf16.mxu1 %v493_v21 }
  0x18   :  { %439 = vmatpush3.bf16.msra.mxu0 %v494_v22 }
  0x19   :  { %461 = vmatpush3.bf16.msra.mxu1 %v495_v23  ;;  %440 = vmatprep.subr.bf16.mxu0 %v496_v24 }
  0x1a   :  { %462 = vmatprep.subr.bf16.mxu1 %v497_v25 }
  0x1c   :  { %441 = vmatpush3.bf16.msra.mxu0 %v498_v26 }
  0x1d   :  { %463 = vmatpush3.bf16.msra.mxu1 %v499_v27  ;;  %442 = vmatprep.subr.bf16.mxu0 %v500_v28 }
  0x1e   :  { %464 = vmatprep.subr.bf16.mxu1 %v501_v29 }
  0x20   :  { %443 = vmatpush3.bf16.msra.mxu0 %v502_v30 }
  0x21   :  { %465 = vmatpush3.bf16.msra.mxu1 %v503_v31 }
  0x23   :  { %319 = vmatmul.mubr.bf16.vlgmr.msra.gmra.mxu0 %v392_v34 }
  0x24   :  { %359 = vmatmul.mubr.bf16.vlgmr.msra.gmra.mxu1 %v394_v36 }
  0xe3   :  { %v444_v38 = vpop.f32.mrf.mxu0 }
  0xe4   :  { %v466_v39 = vpop.f32.mrf.mxu1 }
  0xe5   :  { %v445_v40 = vpop.f32.mrf.mxu0 }
  0xe6   :  { %v467_v41 = vpop.f32.mrf.mxu1  ;;  %v446_v42 = vadd.f32 %v445_v40, %v444_v38 }
  0xe7   :  { %v468_v43 = vadd.f32 %v467_v41, %v466_v39  ;;  %v447_v44 = vpop.f32.mrf.mxu0 }
  0xe8   :  { %v469_v45 = vpop.f32.mrf.mxu1 }
  0xe9   :  { %v361_v46 = vadd.f32 %v468_v43, %v446_v42  ;;  %v448_v47 = vpop.f32.mrf.mxu0 }
  0xea   :  { %v470_v48 = vpop.f32.mrf.mxu1 }
  0xeb   :  { %v366_v49 = vpack.c.bf16 %v361_v46, %v361_v46  ;;  %v368_v50 = vrot.slane %v361_v46, 4  ;;  %v374_v51 = vmul.f32 %v361_v46, %v361_v46 }
  0xed   :  { %367 = vst [vmem:[%s638_s2] sm:$0xf] %v366_v49  ;;  %v369_v52 = vadd.f32 %v368_v50, %v361_v46  ;;  %v375_v53 = vrot.slane %v374_v51, 4 }
  0xef   :  { %v370_v54 = vrot.slane %v369_v52, 2  ;;  %v376_v55 = vadd.f32 %v375_v53, %v374_v51 }
  0xf1   :  { %v371_v56 = vadd.f32 %v370_v54, %v369_v52  ;;  %v377_v57 = vrot.slane %v376_v55, 2 }
  0xf3   :  { %v372_v58 = vrot.slane %v371_v56, 1  ;;  %v378_v59 = vadd.f32 %v377_v57, %v376_v55 }
  0xf5   :  { %v379_v60 = vrot.slane %v378_v59, 1  ;;  %v373_v61 = vadd.f32 %v372_v58, %v371_v56 }
  0xf7   :  { %v380_v62 = vadd.f32 %v379_v60, %v378_v59 }
  0xf9   :  { %v382_v63 = vsel %vm381_vm0, %v373_v61, %v380_v62 }
  0xfa   :  { %383 = vst [vmem:[%s639_s3] sm:$0x3] %v382_v63 }

// kernel: unet_generator_forward.19
= control target key start
LH: loop header
LB: loop body
LE: loop exit
PB: predicated region body
PF: predicated region fallthrough
CT: control target
= control target key end

     0   :  { %vm733_vm0 = vcmask 1040384   ;;  %s1206_s1 = inlined_call_operand.vmem [shape: bf16[1024,128], index: 1, kind: input, shape index: {}]   ;;  %s1207_s0 = inlined_call_operand.vmem [shape: bf16[8,1024], index: 0, kind: input, shape index: {}]   ;;  %s1208_s2 = inlined_call_operand.vmem [shape: bf16[8,128], index: 2, kind: output, shape index: {0}]   ;;  %s1209_s3 = inlined_call_operand.vmem [shape: f32[1,2,128], index: 3, kind: output, shape index: {1}]  }
   0x1   :  { %v904_v0 = vld [vmem:[%s1206_s1 + $0x78] sm:$0xff]   ;;  %v908_v4 = vld [vmem:[%s1206_s1 + $0x70] sm:$0xff]   ;;  %v912_v8 = vld [vmem:[%s1206_s1 + $0x68] sm:$0xff]  }
   0x2   :  { %v905_v1 = vld [vmem:[%s1206_s1 + $0xf8] sm:$0xff]   ;;  %816 = vmatprep.subr.bf16.mxu0 %v904_v0  ;;  %v909_v5 = vld [vmem:[%s1206_s1 + $0xf0] sm:$0xff]   ;;  %v913_v9 = vld [vmem:[%s1206_s1 + $0xe8] sm:$0xff]  }
   0x3   :  { %v906_v2 = vld [vmem:[%s1206_s1 + $0x38] sm:$0xff]   ;;  %838 = vmatprep.subr.bf16.mxu1 %v905_v1  ;;  %v910_v6 = vld [vmem:[%s1206_s1 + $0x30] sm:$0xff]   ;;  %v914_v10 = vld [vmem:[%s1206_s1 + $0x28] sm:$0xff]  }
   0x4   :  { %v907_v3 = vld [vmem:[%s1206_s1 + $0xb8] sm:$0xff]   ;;  %817 = vmatpush3.bf16.msra.mxu0 %v906_v2  ;;  %v911_v7 = vld [vmem:[%s1206_s1 + $0xb0] sm:$0xff]   ;;  %v915_v11 = vld [vmem:[%s1206_s1 + $0xa8] sm:$0xff]  }
   0x5   :  { %839 = vmatpush3.bf16.msra.mxu1 %v907_v3  ;;  %818 = vmatprep.subr.bf16.mxu0 %v908_v4  ;;  %v916_v12 = vld [vmem:[%s1206_s1 + $0x60] sm:$0xff]   ;;  %v920_v16 = vld [vmem:[%s1206_s1 + $0x58] sm:$0xff]   ;;  %v924_v20 = vld [vmem:[%s1206_s1 + $0x50] sm:$0xff]  }
   0x6   :  { %840 = vmatprep.subr.bf16.mxu1 %v909_v5  ;;  %v917_v13 = vld [vmem:[%s1206_s1 + $0xe0] sm:$0xff]   ;;  %v921_v17 = vld [vmem:[%s1206_s1 + $0xd8] sm:$0xff]   ;;  %v925_v21 = vld [vmem:[%s1206_s1 + $0xd0] sm:$0xff]  }
   0x7   :  { %v918_v14 = vld [vmem:[%s1206_s1 + $0x20] sm:$0xff]   ;;  %v922_v18 = vld [vmem:[%s1206_s1 + $0x18] sm:$0xff]   ;;  %v926_v22 = vld [vmem:[%s1206_s1 + $0x10] sm:$0xff]  }
   0x8   :  { %819 = vmatpush3.bf16.msra.mxu0 %v910_v6  ;;  %v919_v15 = vld [vmem:[%s1206_s1 + $0xa0] sm:$0xff]   ;;  %v923_v19 = vld [vmem:[%s1206_s1 + $0x98] sm:$0xff]   ;;  %v927_v23 = vld [vmem:[%s1206_s1 + $0x90] sm:$0xff]  }
   0x9   :  { %841 = vmatpush3.bf16.msra.mxu1 %v911_v7  ;;  %820 = vmatprep.subr.bf16.mxu0 %v912_v8  ;;  %v928_v24 = vld [vmem:[%s1206_s1 + $0x48] sm:$0xff]   ;;  %v932_v28 = vld [vmem:[%s1206_s1 + $0x40] sm:$0xff]   ;;  %v940_v38 = vld [vmem:[%s1206_s1 + $0x178] sm:$0xff]  }
   0xa   :  { %842 = vmatprep.subr.bf16.mxu1 %v913_v9  ;;  %v929_v25 = vld [vmem:[%s1206_s1 + $0xc8] sm:$0xff]   ;;  %v933_v29 = vld [vmem:[%s1206_s1 + $0xc0] sm:$0xff]   ;;  %v941_v39 = vld [vmem:[%s1206_s1 + $0x1f8] sm:$0xff]  }
   0xb   :  { %v930_v26 = vld [vmem:[%s1206_s1 + $0x8] sm:$0xff]   ;;  %v934_v30 = vld [vmem:[%s1206_s1] sm:$0xff]   ;;  %v942_v40 = vld [vmem:[%s1206_s1 + $0x138] sm:$0xff]  }
   0xc   :  { %821 = vmatpush3.bf16.msra.mxu0 %v914_v10  ;;  %v931_v27 = vld [vmem:[%s1206_s1 + $0x88] sm:$0xff]   ;;  %v935_v31 = vld [vmem:[%s1206_s1 + $0x80] sm:$0xff]   ;;  %v943_v41 = vld [vmem:[%s1206_s1 + $0x1b8] sm:$0xff]  }
   0xd   :  { %843 = vmatpush3.bf16.msra.mxu1 %v915_v11  ;;  %822 = vmatprep.subr.bf16.mxu0 %v916_v12  ;;  %v14_v32 = vld [vmem:[%s1207_s0] sm:$0xff]  ;;  %v15_v33 = vld [vmem:[%s1207_s0 + $0x8] sm:$0xff]  ;;  %v944_v42 = vld [vmem:[%s1206_s1 + $0x170] sm:$0xff]  }
   0xe   :  { %844 = vmatprep.subr.bf16.mxu1 %v917_v13  ;;  %v744_v34 = vcombine.low %v14_v32, %v14_v32  ;;  %v745_v35 = vcombine.high %v14_v32, %v14_v32  ;;  %v746_v36 = vcombine.low %v15_v33, %v15_v33  ;;  %v747_v37 = vcombine.high %v15_v33, %v15_v33  ;;  %v945_v43 = vld [vmem:[%s1206_s1 + $0x1f0] sm:$0xff]   ;;  %v948_v46 = vld [vmem:[%s1206_s1 + $0x168] sm:$0xff]   ;;  %v952_v50 = vld [vmem:[%s1206_s1 + $0x160] sm:$0xff]  }
   0xf   :  { %v946_v44 = vld [vmem:[%s1206_s1 + $0x130] sm:$0xff]   ;;  %v949_v47 = vld [vmem:[%s1206_s1 + $0x1e8] sm:$0xff]   ;;  %v953_v51 = vld [vmem:[%s1206_s1 + $0x1e0] sm:$0xff]  }
  0x10   :  { %823 = vmatpush3.bf16.msra.mxu0 %v918_v14  ;;  %590 = vmatprep.mubr.bf16.mxu0 %v745_v35  ;;  %v947_v45 = vld [vmem:[%s1206_s1 + $0x1b0] sm:$0xff]   ;;  %v950_v48 = vld [vmem:[%s1206_s1 + $0x128] sm:$0xff]   ;;  %v954_v52 = vld [vmem:[%s1206_s1 + $0x120] sm:$0xff]  }
  0x11   :  { %845 = vmatpush3.bf16.msra.mxu1 %v919_v15  ;;  %824 = vmatprep.subr.bf16.mxu0 %v920_v16  ;;  %v951_v49 = vld [vmem:[%s1206_s1 + $0x1a8] sm:$0xff]   ;;  %v955_v53 = vld [vmem:[%s1206_s1 + $0x1a0] sm:$0xff]   ;;  %v956_v54 = vld [vmem:[%s1206_s1 + $0x158] sm:$0xff]  }
  0x12   :  { %846 = vmatprep.subr.bf16.mxu1 %v921_v17  ;;  %630 = vmatprep.mubr.bf16.mxu1 %v747_v37  ;;  %v957_v55 = vld [vmem:[%s1206_s1 + $0x1d8] sm:$0xff]   ;;  %v960_v58 = vld [vmem:[%s1206_s1 + $0x150] sm:$0xff]   ;;  %v964_v62 = vld [vmem:[%s1206_s1 + $0x148] sm:$0xff]  }
  0x13   :  { %v958_v56 = vld [vmem:[%s1206_s1 + $0x118] sm:$0xff]   ;;  %v961_v59 = vld [vmem:[%s1206_s1 + $0x1d0] sm:$0xff]   ;;  %v965_v63 = vld [vmem:[%s1206_s1 + $0x1c8] sm:$0xff]  }
  0x14   :  { %825 = vmatpush3.bf16.msra.mxu0 %v922_v18  ;;  %v959_v57 = vld [vmem:[%s1206_s1 + $0x198] sm:$0xff]   ;;  %v962_v60 = vld [vmem:[%s1206_s1 + $0x110] sm:$0xff]   ;;  %v966_v0 = vld [vmem:[%s1206_s1 + $0x108] sm:$0xff]  }
  0x15   :  { %847 = vmatpush3.bf16.msra.mxu1 %v923_v19  ;;  %826 = vmatprep.subr.bf16.mxu0 %v924_v20  ;;  %v963_v61 = vld [vmem:[%s1206_s1 + $0x190] sm:$0xff]   ;;  %v967_v1 = vld [vmem:[%s1206_s1 + $0x188] sm:$0xff]   ;;  %v968_v2 = vld [vmem:[%s1206_s1 + $0x140] sm:$0xff]  }
  0x16   :  { %848 = vmatprep.subr.bf16.mxu1 %v925_v21  ;;  %v969_v3 = vld [vmem:[%s1206_s1 + $0x1c0] sm:$0xff]   ;;  %v16_v6 = vld [vmem:[%s1207_s0 + $0x10] sm:$0xff]  ;;  %v17_v9 = vld [vmem:[%s1207_s0 + $0x18] sm:$0xff] }
  0x17   :  { %v970_v4 = vld [vmem:[%s1206_s1 + $0x100] sm:$0xff]   ;;  %v748_v7 = vcombine.low %v16_v6, %v16_v6  ;;  %v749_v8 = vcombine.high %v16_v6, %v16_v6  ;;  %v750_v10 = vcombine.low %v17_v9, %v17_v9  ;;  %v751_v11 = vcombine.high %v17_v9, %v17_v9 }
  0x18   :  { %827 = vmatpush3.bf16.msra.mxu0 %v926_v22  ;;  %v971_v5 = vld [vmem:[%s1206_s1 + $0x180] sm:$0xff]  }
  0x19   :  { %849 = vmatpush3.bf16.msra.mxu1 %v927_v23  ;;  %828 = vmatprep.subr.bf16.mxu0 %v928_v24 }
  0x1a   :  { %850 = vmatprep.subr.bf16.mxu1 %v929_v25 }
  0x1c   :  { %829 = vmatpush3.bf16.msra.mxu0 %v930_v26 }
  0x1d   :  { %851 = vmatpush3.bf16.msra.mxu1 %v931_v27  ;;  %830 = vmatprep.subr.bf16.mxu0 %v932_v28 }
  0x1e   :  { %852 = vmatprep.subr.bf16.mxu1 %v933_v29 }
  0x20   :  { %831 = vmatpush3.bf16.msra.mxu0 %v934_v30 }
  0x21   :  { %853 = vmatpush3.bf16.msra.mxu1 %v935_v31  ;;  %860 = vmatprep.subr.bf16.mxu0 %v940_v38 }
  0x22   :  { %882 = vmatprep.subr.bf16.mxu1 %v941_v39 }
  0x23   :  { %591 = vmatmul.mubr.bf16.vlgmr.msra.gmra.mxu0 %v744_v34 }
  0x24   :  { %631 = vmatmul.mubr.bf16.vlgmr.msra.gmra.mxu1 %v746_v36  ;;  %861 = vmatpush3.bf16.msra.mxu0 %v942_v40 }
  0x25   :  { %883 = vmatpush3.bf16.msra.mxu1 %v943_v41  ;;  %862 = vmatprep.subr.bf16.mxu0 %v944_v42 }
  0x26   :  { %884 = vmatprep.subr.bf16.mxu1 %v945_v43  ;;  %670 = vmatprep.mubr.bf16.mxu0 %v749_v8 }
  0x27   :  { %710 = vmatprep.mubr.bf16.mxu1 %v751_v11 }
  0x28   :  { %863 = vmatpush3.bf16.msra.mxu0 %v946_v44 }
  0x29   :  { %885 = vmatpush3.bf16.msra.mxu1 %v947_v45  ;;  %864 = vmatprep.subr.bf16.mxu0 %v948_v46 }
  0x2a   :  { %886 = vmatprep.subr.bf16.mxu1 %v949_v47 }
  0x2c   :  { %865 = vmatpush3.bf16.msra.mxu0 %v950_v48 }
  0x2d   :  { %887 = vmatpush3.bf16.msra.mxu1 %v951_v49  ;;  %866 = vmatprep.subr.bf16.mxu0 %v952_v50 }
  0x2e   :  { %888 = vmatprep.subr.bf16.mxu1 %v953_v51 }
  0x30   :  { %867 = vmatpush3.bf16.msra.mxu0 %v954_v52 }
  0x31   :  { %889 = vmatpush3.bf16.msra.mxu1 %v955_v53  ;;  %868 = vmatprep.subr.bf16.mxu0 %v956_v54 }
  0x32   :  { %890 = vmatprep.subr.bf16.mxu1 %v957_v55 }
  0x34   :  { %869 = vmatpush3.bf16.msra.mxu0 %v958_v56 }
  0x35   :  { %891 = vmatpush3.bf16.msra.mxu1 %v959_v57  ;;  %870 = vmatprep.subr.bf16.mxu0 %v960_v58 }
  0x36   :  { %892 = vmatprep.subr.bf16.mxu1 %v961_v59 }
  0x38   :  { %871 = vmatpush3.bf16.msra.mxu0 %v962_v60 }
  0x39   :  { %893 = vmatpush3.bf16.msra.mxu1 %v963_v61  ;;  %872 = vmatprep.subr.bf16.mxu0 %v964_v62 }
  0x3a   :  { %894 = vmatprep.subr.bf16.mxu1 %v965_v63 }
  0x3c   :  { %873 = vmatpush3.bf16.msra.mxu0 %v966_v0 }
  0x3d   :  { %895 = vmatpush3.bf16.msra.mxu1 %v967_v1  ;;  %874 = vmatprep.subr.bf16.mxu0 %v968_v2 }
  0x3e   :  { %896 = vmatprep.subr.bf16.mxu1 %v969_v3 }
  0x40   :  { %875 = vmatpush3.bf16.msra.mxu0 %v970_v4 }
  0x41   :  { %897 = vmatpush3.bf16.msra.mxu1 %v971_v5 }
  0x43   :  { %671 = vmatmul.mubr.bf16.vlgmr.msra.gmra.mxu0 %v748_v7 }
  0x44   :  { %711 = vmatmul.mubr.bf16.vlgmr.msra.gmra.mxu1 %v750_v10 }
  0xe3   :  { %v832_v12 = vpop.f32.mrf.mxu0 }
  0xe4   :  { %v854_v13 = vpop.f32.mrf.mxu1 }
  0xe5   :  { %v833_v14 = vpop.f32.mrf.mxu0 }
  0xe6   :  { %v855_v15 = vpop.f32.mrf.mxu1  ;;  %v834_v20 = vadd.f32 %v833_v14, %v832_v12 }
  0xe7   :  { %v835_v16 = vpop.f32.mrf.mxu0  ;;  %v856_v21 = vadd.f32 %v855_v15, %v854_v13 }
  0xe8   :  { %v857_v17 = vpop.f32.mrf.mxu1 }
  0xe9   :  { %v836_v18 = vpop.f32.mrf.mxu0  ;;  %v633_v26 = vadd.f32 %v856_v21, %v834_v20 }
  0xea   :  { %v858_v19 = vpop.f32.mrf.mxu1 }
 0x103   :  { %v876_v22 = vpop.f32.mrf.mxu0 }
 0x104   :  { %v898_v23 = vpop.f32.mrf.mxu1 }
 0x105   :  { %v877_v24 = vpop.f32.mrf.mxu0 }
 0x106   :  { %v899_v25 = vpop.f32.mrf.mxu1  ;;  %v878_v27 = vadd.f32 %v877_v24, %v876_v22 }
 0x107   :  { %v879_v28 = vpop.f32.mrf.mxu0  ;;  %v900_v31 = vadd.f32 %v899_v25, %v898_v23 }
 0x108   :  { %v901_v29 = vpop.f32.mrf.mxu1  ;;  %v673_v30 = vadd.f32 %v878_v27, %v633_v26 }
 0x109   :  { %v880_v32 = vpop.f32.mrf.mxu0 }
 0x10a   :  { %v902_v33 = vpop.f32.mrf.mxu1  ;;  %v713_v34 = vadd.f32 %v900_v31, %v673_v30 }
 0x10c   :  { %v718_v35 = vpack.c.bf16 %v713_v34, %v713_v34  ;;  %v720_v36 = vrot.slane %v713_v34, 4  ;;  %v726_v37 = vmul.f32 %v713_v34, %v713_v34 }
 0x10e   :  { %719 = vst [vmem:[%s1208_s2] sm:$0xf] %v718_v35  ;;  %v721_v38 = vadd.f32 %v720_v36, %v713_v34  ;;  %v727_v39 = vrot.slane %v726_v37, 4 }
 0x110   :  { %v722_v40 = vrot.slane %v721_v38, 2  ;;  %v728_v41 = vadd.f32 %v727_v39, %v726_v37 }
 0x112   :  { %v723_v42 = vadd.f32 %v722_v40, %v721_v38  ;;  %v729_v43 = vrot.slane %v728_v41, 2 }
 0x114   :  { %v724_v44 = vrot.slane %v723_v42, 1  ;;  %v730_v45 = vadd.f32 %v729_v43, %v728_v41 }
 0x116   :  { %v731_v46 = vrot.slane %v730_v45, 1  ;;  %v725_v47 = vadd.f32 %v724_v44, %v723_v42 }
 0x118   :  { %v732_v48 = vadd.f32 %v731_v46, %v730_v45 }
 0x11a   :  { %v734_v49 = vsel %vm733_vm0, %v725_v47, %v732_v48 }
 0x11b   :  { %735 = vst [vmem:[%s1209_s3] sm:$0x3] %v734_v49 }

// kernel: squeeze.86
= control target key start
LH: loop header
LB: loop body
LE: loop exit
PB: predicated region body
PF: predicated region fallthrough
CT: control target
= control target key end

     0   :  { %vm8_vm0 = vcmask 523264   ;;  %s42_s0 = inlined_call_operand.vmem [shape: f32[256], index: 0, kind: input, shape index: {}]   ;;  %s43_s1 = inlined_call_operand.vmem [shape: f32[4,64], index: 1, kind: output, shape index: {}]  }
   0x1   :  { %v5_v0 = vld [vmem:[%s42_s0] sm:$0x3]  ;;  %s25_s0 = smov 64  }
   0x2   :  { %6 = vst [vmem:[#allocation1] sm:$0x3] %v5_v0 }
   0x9   :  { %v10_v1 = vld [vmem:[#allocation1] sm:$0x3]  }
   0xa   :  { %v7_v2 = vld [vmem:[#allocation1] sm:$0x3]   ;;  %11 = vrot.lane.b32.xlu0 %v10_v1, %s25_s0 }
   0xb   :  { %9 = vst.msk [vmem:[#allocation0] ss:$2 sm:$0x3] %vm8_vm0, %v7_v2  }
  0x7c   :  { %v12_v3 = vpop.permute.xlu0 %11  }
  0x7d   :  { %15 = vst.msk [vmem:[#allocation0 + $0x1] ss:$2 sm:$0x3] %vm8_vm0, %v12_v3  }
  0x84   :  { %v20_v4 = vld [vmem:[#allocation0] sm:$0xf] }
  0x85   :  { %23 = vst [vmem:[%s43_s1] sm:$0xf] %v20_v4 }

// kernel: tile.50
= control target key start
LH: loop header
LB: loop body
LE: loop exit
PB: predicated region body
PF: predicated region fallthrough
CT: control target
= control target key end

     0   :  { %s22_s0 = inlined_call_operand.vmem [shape: f32[64], index: 0, kind: input, shape index: {}]   ;;  %s23_s1 = inlined_call_operand.vmem [shape: f32[4,64], index: 1, kind: output, shape index: {}]  }
   0x1   :  { %v4_v0 = vld [vmem:[%s22_s0] ss:$0 sm:$0xff] }
   0x2   :  { %5 = vst [vmem:[%s23_s1] sm:$0xf] %v4_v0 }

// kernel: tile.51
= control target key start
LH: loop header
LB: loop body
LE: loop exit
PB: predicated region body
PF: predicated region fallthrough
CT: control target
= control target key end

     0   :  { %s7_s8 = smov 3  ;;  %vm9_vm0 = vcmask 523264   ;;  %s34_s9 = smov 64   ;;  %vm16_vm1 = vcmask 1048064   ;;  %s54_s0 = inlined_call_operand.vmem [shape: f32[4,64], index: 0, kind: input, shape index: {}]   ;;  %s55_s1 = inlined_call_operand.vmem [shape: f32[1,256], index: 1, kind: output, shape index: {}]  }
   0x1   :  { %v5_v0 = vld [vmem:[%s54_s0] sm:$0xf]  ;;  %s12_s0 = smov 3 }
   0x2   :  { %6 = vst [vmem:[#allocation1] sm:$0xf] %v5_v0 }
   0x9   :  { %v13_v1 = vld [vmem:[#allocation1 + $0x1] ss:$2 sm:%s12_s0]   ;;  %v8_v2 = vld [vmem:[#allocation1] ss:$2 sm:%s7_s8]  }
   0xa   :  { %14 = vrot.lane.b32.xlu0 %v13_v1, %s34_s9  ;;  %10 = vst.msk [vmem:[#allocation0] ss:$8 sm:$0x3] %vm9_vm0, %v8_v2  }
  0x7c   :  { %v15_v3 = vpop.permute.xlu0 %14  }
  0x7d   :  { %17 = vst.msk [vmem:[#allocation0] ss:$8 sm:$0x3] %vm16_vm1, %v15_v3  }
  0x84   :  { %v22_v4 = vld [vmem:[#allocation0] sm:$0x1]  ;;  %v27_v5 = vld [vmem:[#allocation0 + $0x8] sm:$0x1] }
  0x85   :  { %25 = vst [vmem:[%s55_s1] sm:$0x1] %v22_v4  ;;  %32 = vst [vmem:[%s55_s1 + $0x1] sm:$0x1] %v27_v5 }

// kernel: unet_generator_forward.22
= control target key start
LH: loop header
LB: loop body
LE: loop exit
PB: predicated region body
PF: predicated region fallthrough
CT: control target
= control target key end

     0   :  { %v19_v0 = vlaneseq  ;;  %s94_s0 = inlined_call_operand.vmem [shape: bf16[8,256], index: 0, kind: input, shape index: {}]   ;;  %s95_s1 = inlined_call_operand.vmem [shape: f32[1,256], index: 1, kind: input, shape index: {}]   ;;  %s96_s2 = inlined_call_operand.vmem [shape: f32[1,256], index: 2, kind: input, shape index: {}]   ;;  %s97_s3 = inlined_call_operand.vmem [shape: bf16[8,256], index: 3, kind: output, shape index: {}]  }
   0x1   :  { %v14_v1 = vld [vmem:[%s94_s0] sm:$0xff] }
   0x2   :  { %v20_v2 = vshrl.u32 %v19_v0, 7  ;;  %v17_v3 = vld [vmem:[%s95_s1] sm:$0x3]  ;;  %v15_v5 = vunpack.c.l.bf16 %v14_v1  ;;  %v16_v6 = vunpack.c.h.bf16 %v14_v1 }
   0x3   :  { %v31_v4 = vld [vmem:[%s96_s2] sm:$0x3] }
   0x4   :  { %v21_v7 = vsub.s32 0, %v20_v2  ;;  %v25_v8 = vsub.s32 1, %v20_v2 }
   0x6   :  { %v22_v9 = vrot.slane %v17_v3, %v21_v7  ;;  %v26_v10 = vrot.slane %v17_v3, %v25_v8  ;;  %v36_v11 = vrot.slane %v31_v4, %v21_v7  ;;  %v40_v12 = vrot.slane %v31_v4, %v25_v8 }
   0x8   :  { %v29_v13 = vmul.f32 %v22_v9, %v15_v5  ;;  %v30_v14 = vmul.f32 %v26_v10, %v16_v6 }
   0xa   :  { %v43_v15 = vadd.f32 %v36_v11, %v29_v13  ;;  %v44_v16 = vadd.f32 %v40_v12, %v30_v14 }
   0xc   :  { %v45_v17 = vmax.f32 %v43_v15, 0.0  ;;  %v46_v18 = vmax.f32 %v44_v16, 0.0 }
   0xe   :  { %v61_v19 = vpack.c.bf16 %v46_v18, %v45_v17 }
  0x10   :  { %55 = vst [vmem:[%s97_s3] sm:$0xff] %v61_v19 }

// kernel: unet_generator_forward.21
= control target key start
LH: loop header
LB: loop body
LE: loop exit
PB: predicated region body
PF: predicated region fallthrough
CT: control target
= control target key end

     0   :  { %vm1155_vm0 = vcmask 1040384   ;;  %s2046_s1 = inlined_call_operand.vmem [shape: bf16[1152,256], index: 1, kind: input, shape index: {}]   ;;  %s2047_s0 = inlined_call_operand.vmem [shape: bf16[8,1152], index: 0, kind: input, shape index: {}]   ;;  %s2048_s2 = inlined_call_operand.vmem [shape: bf16[8,256], index: 2, kind: output, shape index: {0}]   ;;  %s2049_s3 = inlined_call_operand.vmem [shape: f32[1,2,256], index: 3, kind: output, shape index: {1}]  }
   0x1   :  { %v1335_v0 = vld [vmem:[%s2046_s1 + $0x74] ss:$8 sps:$4 sm:$0xff]   ;;  %v1339_v2 = vld [vmem:[%s2046_s1 + $0x70] ss:$8 sps:$4 sm:$0xff]   ;;  %v1341_v4 = vld [vmem:[%s2046_s1 + $0x64] ss:$8 sps:$4 sm:$0xff]  }
   0x2   :  { %v1337_v1 = vld [vmem:[%s2046_s1 + $0x174] ss:$8 sps:$4 sm:$0xff]   ;;  %915 = vmatprep.subr.bf16.mxu0 %v1335_v0  ;;  %v1340_v3 = vld [vmem:[%s2046_s1 + $0x170] ss:$8 sps:$4 sm:$0xff]   ;;  %v1343_v5 = vld [vmem:[%s2046_s1 + $0x164] ss:$8 sps:$4 sm:$0xff]  }
   0x3   :  { %956 = vmatprep.subr.bf16.mxu1 %v1337_v1  ;;  %916 = vmatpush1.bf16.msra.mxu0 %v1339_v2  ;;  %v1345_v6 = vld [vmem:[%s2046_s1 + $0x60] ss:$8 sps:$4 sm:$0xff]   ;;  %v1347_v8 = vld [vmem:[%s2046_s1 + $0x54] ss:$8 sps:$4 sm:$0xff]   ;;  %v1351_v10 = vld [vmem:[%s2046_s1 + $0x50] ss:$8 sps:$4 sm:$0xff]  }
   0x4   :  { %957 = vmatpush1.bf16.msra.mxu1 %v1340_v3  ;;  %917 = vmatprep.subr.bf16.mxu0 %v1341_v4  ;;  %v1346_v7 = vld [vmem:[%s2046_s1 + $0x160] ss:$8 sps:$4 sm:$0xff]   ;;  %v1349_v9 = vld [vmem:[%s2046_s1 + $0x154] ss:$8 sps:$4 sm:$0xff]   ;;  %v1352_v11 = vld [vmem:[%s2046_s1 + $0x150] ss:$8 sps:$4 sm:$0xff]  }
   0x5   :  { %958 = vmatprep.subr.bf16.mxu1 %v1343_v5  ;;  %v1353_v12 = vld [vmem:[%s2046_s1 + $0x44] ss:$8 sps:$4 sm:$0xff]   ;;  %v1357_v14 = vld [vmem:[%s2046_s1 + $0x40] ss:$8 sps:$4 sm:$0xff]   ;;  %v1359_v16 = vld [vmem:[%s2046_s1 + $0x34] ss:$8 sps:$4 sm:$0xff]  }
   0x6   :  { %v1355_v13 = vld [vmem:[%s2046_s1 + $0x144] ss:$8 sps:$4 sm:$0xff]   ;;  %v1358_v15 = vld [vmem:[%s2046_s1 + $0x140] ss:$8 sps:$4 sm:$0xff]   ;;  %v1361_v17 = vld [vmem:[%s2046_s1 + $0x134] ss:$8 sps:$4 sm:$0xff]  }
   0x7   :  { %918 = vmatpush1.bf16.msra.mxu0 %v1345_v6  ;;  %v1363_v18 = vld [vmem:[%s2046_s1 + $0x30] ss:$8 sps:$4 sm:$0xff]   ;;  %v1365_v20 = vld [vmem:[%s2046_s1 + $0x24] ss:$8 sps:$4 sm:$0xff]   ;;  %v1369_v22 = vld [vmem:[%s2046_s1 + $0x20] ss:$8 sps:$4 sm:$0xff]  }
   0x8   :  { %959 = vmatpush1.bf16.msra.mxu1 %v1346_v7  ;;  %919 = vmatprep.subr.bf16.mxu0 %v1347_v8  ;;  %v1364_v19 = vld [vmem:[%s2046_s1 + $0x130] ss:$8 sps:$4 sm:$0xff]   ;;  %v1367_v21 = vld [vmem:[%s2046_s1 + $0x124] ss:$8 sps:$4 sm:$0xff]   ;;  %v1370_v23 = vld [vmem:[%s2046_s1 + $0x120] ss:$8 sps:$4 sm:$0xff]  }
   0x9   :  { %960 = vmatprep.subr.bf16.mxu1 %v1349_v9  ;;  %v1371_v24 = vld [vmem:[%s2046_s1 + $0x14] ss:$8 sps:$4 sm:$0xff]   ;;  %v1375_v26 = vld [vmem:[%s2046_s1 + $0x10] ss:$8 sps:$4 sm:$0xff]   ;;  %v1377_v28 = vld [vmem:[%s2046_s1 + $0x4] ss:$8 sps:$4 sm:$0xff]  }
   0xa   :  { %v1373_v25 = vld [vmem:[%s2046_s1 + $0x114] ss:$8 sps:$4 sm:$0xff]   ;;  %v1376_v27 = vld [vmem:[%s2046_s1 + $0x110] ss:$8 sps:$4 sm:$0xff]   ;;  %v1379_v29 = vld [vmem:[%s2046_s1 + $0x104] ss:$8 sps:$4 sm:$0xff]  }
   0xb   :  { %920 = vmatpush1.bf16.msra.mxu0 %v1351_v10  ;;  %v1381_v30 = vld [vmem:[%s2046_s1] ss:$8 sps:$4 sm:$0xff]   ;;  %v1383_v32 = vld [vmem:[%s2046_s1 + $0xf4] ss:$8 sps:$4 sm:$0xff]   ;;  %v1387_v34 = vld [vmem:[%s2046_s1 + $0xf0] ss:$8 sps:$4 sm:$0xff]  }
   0xc   :  { %961 = vmatpush1.bf16.msra.mxu1 %v1352_v11  ;;  %921 = vmatprep.subr.bf16.mxu0 %v1353_v12  ;;  %v1382_v31 = vld [vmem:[%s2046_s1 + $0x100] ss:$8 sps:$4 sm:$0xff]   ;;  %v1385_v33 = vld [vmem:[%s2046_s1 + $0x1f4] ss:$8 sps:$4 sm:$0xff]   ;;  %v1388_v35 = vld [vmem:[%s2046_s1 + $0x1f0] ss:$8 sps:$4 sm:$0xff]  }
   0xd   :  { %962 = vmatprep.subr.bf16.mxu1 %v1355_v13  ;;  %v1389_v36 = vld [vmem:[%s2046_s1 + $0xe4] ss:$8 sps:$4 sm:$0xff]   ;;  %v1393_v38 = vld [vmem:[%s2046_s1 + $0xe0] ss:$8 sps:$4 sm:$0xff]   ;;  %v1395_v40 = vld [vmem:[%s2046_s1 + $0xd4] ss:$8 sps:$4 sm:$0xff]  }
   0xe   :  { %v1391_v37 = vld [vmem:[%s2046_s1 + $0x1e4] ss:$8 sps:$4 sm:$0xff]   ;;  %v1394_v39 = vld [vmem:[%s2046_s1 + $0x1e0] ss:$8 sps:$4 sm:$0xff]   ;;  %v1397_v41 = vld [vmem:[%s2046_s1 + $0x1d4] ss:$8 sps:$4 sm:$0xff]  }
   0xf   :  { %922 = vmatpush1.bf16.msra.mxu0 %v1357_v14  ;;  %v1399_v42 = vld [vmem:[%s2046_s1 + $0xd0] ss:$8 sps:$4 sm:$0xff]   ;;  %v1401_v44 = vld [vmem:[%s2046_s1 + $0xc4] ss:$8 sps:$4 sm:$0xff]   ;;  %v1405_v49 = vld [vmem:[%s2046_s1 + $0xc0] ss:$8 sps:$4 sm:$0xff]  }
  0x10   :  { %963 = vmatpush1.bf16.msra.mxu1 %v1358_v15  ;;  %923 = vmatprep.subr.bf16.mxu0 %v1359_v16  ;;  %v1400_v43 = vld [vmem:[%s2046_s1 + $0x1d0] ss:$8 sps:$4 sm:$0xff]   ;;  %v1403_v45 = vld [vmem:[%s2046_s1 + $0x1c4] ss:$8 sps:$4 sm:$0xff]   ;;  %v1406_v50 = vld [vmem:[%s2046_s1 + $0x1c0] ss:$8 sps:$4 sm:$0xff]  }
  0x11   :  { %964 = vmatprep.subr.bf16.mxu1 %v1361_v17  ;;  %v14_v46 = vld [vmem:[%s2047_s0] sm:$0xff]  ;;  %v15_v48 = vld [vmem:[%s2047_s0 + $0x8] sm:$0xff]  ;;  %v1407_v52 = vld [vmem:[%s2046_s1 + $0xb4] ss:$8 sps:$4 sm:$0xff]  }
  0x12   :  { %v1179_v47 = vcombine.high %v14_v46, %v14_v46  ;;  %v1181_v51 = vcombine.high %v15_v48, %v15_v48  ;;  %v1409_v53 = vld [vmem:[%s2046_s1 + $0x1b4] ss:$8 sps:$4 sm:$0xff]   ;;  %v1411_v54 = vld [vmem:[%s2046_s1 + $0xb0] ss:$8 sps:$4 sm:$0xff]   ;;  %v1413_v56 = vld [vmem:[%s2046_s1 + $0xa4] ss:$8 sps:$4 sm:$0xff]   ;;  %v1178_v6 = vcombine.low %v14_v46, %v14_v46  ;;  %v1180_v7 = vcombine.low %v15_v48, %v15_v48 }
  0x13   :  { %924 = vmatpush1.bf16.msra.mxu0 %v1363_v18  ;;  %v1412_v55 = vld [vmem:[%s2046_s1 + $0x1b0] ss:$8 sps:$4 sm:$0xff]   ;;  %v1415_v57 = vld [vmem:[%s2046_s1 + $0x1a4] ss:$8 sps:$4 sm:$0xff]   ;;  %v1417_v58 = vld [vmem:[%s2046_s1 + $0xa0] ss:$8 sps:$4 sm:$0xff]  }
  0x14   :  { %965 = vmatpush1.bf16.msra.mxu1 %v1364_v19  ;;  %925 = vmatprep.subr.bf16.mxu0 %v1365_v20  ;;  %v1418_v59 = vld [vmem:[%s2046_s1 + $0x1a0] ss:$8 sps:$4 sm:$0xff]   ;;  %v1419_v60 = vld [vmem:[%s2046_s1 + $0x94] ss:$8 sps:$4 sm:$0xff]   ;;  %v1423_v62 = vld [vmem:[%s2046_s1 + $0x90] ss:$8 sps:$4 sm:$0xff]  }
  0x15   :  { %966 = vmatprep.subr.bf16.mxu1 %v1367_v21  ;;  %947 = vmatprep.mubr.bf16.mxu0 %v1179_v47  ;;  %v1421_v61 = vld [vmem:[%s2046_s1 + $0x194] ss:$8 sps:$4 sm:$0xff]   ;;  %v1424_v63 = vld [vmem:[%s2046_s1 + $0x190] ss:$8 sps:$4 sm:$0xff]   ;;  %v1425_v0 = vld [vmem:[%s2046_s1 + $0x84] ss:$8 sps:$4 sm:$0xff]  }
  0x16   :  { %988 = vmatprep.mubr.bf16.mxu1 %v1181_v51  ;;  %v1427_v1 = vld [vmem:[%s2046_s1 + $0x184] ss:$8 sps:$4 sm:$0xff]   ;;  %v1429_v2 = vld [vmem:[%s2046_s1 + $0x80] ss:$8 sps:$4 sm:$0xff]   ;;  %v1437_v4 = vld [vmem:[%s2046_s1 + $0x274] ss:$8 sps:$4 sm:$0xff]  }
  0x17   :  { %926 = vmatpush1.bf16.msra.mxu0 %v1369_v22  ;;  %v1430_v3 = vld [vmem:[%s2046_s1 + $0x180] ss:$8 sps:$4 sm:$0xff]   ;;  %v1440_v5 = vld [vmem:[%s2046_s1 + $0x374] ss:$8 sps:$4 sm:$0xff]   ;;  %v1435_v8 = vld [vmem:[%s2046_s1 + $0x270] ss:$8 sps:$4 sm:$0xff]  }
  0x18   :  { %967 = vmatpush1.bf16.msra.mxu1 %v1370_v23  ;;  %927 = vmatprep.subr.bf16.mxu0 %v1371_v24  ;;  %v1438_v9 = vld [vmem:[%s2046_s1 + $0x370] ss:$8 sps:$4 sm:$0xff]   ;;  %v1443_v10 = vld [vmem:[%s2046_s1 + $0x264] ss:$8 sps:$4 sm:$0xff]   ;;  %v1441_v12 = vld [vmem:[%s2046_s1 + $0x260] ss:$8 sps:$4 sm:$0xff]  }
  0x19   :  { %968 = vmatprep.subr.bf16.mxu1 %v1373_v25  ;;  %v1446_v11 = vld [vmem:[%s2046_s1 + $0x364] ss:$8 sps:$4 sm:$0xff]   ;;  %v1444_v13 = vld [vmem:[%s2046_s1 + $0x360] ss:$8 sps:$4 sm:$0xff]   ;;  %v1449_v14 = vld [vmem:[%s2046_s1 + $0x254] ss:$8 sps:$4 sm:$0xff]  }
  0x1a   :  { %v1452_v15 = vld [vmem:[%s2046_s1 + $0x354] ss:$8 sps:$4 sm:$0xff]   ;;  %v1447_v16 = vld [vmem:[%s2046_s1 + $0x250] ss:$8 sps:$4 sm:$0xff]   ;;  %v1455_v18 = vld [vmem:[%s2046_s1 + $0x244] ss:$8 sps:$4 sm:$0xff]  }
  0x1b   :  { %928 = vmatpush1.bf16.msra.mxu0 %v1375_v26  ;;  %v1450_v17 = vld [vmem:[%s2046_s1 + $0x350] ss:$8 sps:$4 sm:$0xff]   ;;  %v1458_v19 = vld [vmem:[%s2046_s1 + $0x344] ss:$8 sps:$4 sm:$0xff]   ;;  %v1453_v20 = vld [vmem:[%s2046_s1 + $0x240] ss:$8 sps:$4 sm:$0xff]  }
  0x1c   :  { %969 = vmatpush1.bf16.msra.mxu1 %v1376_v27  ;;  %929 = vmatprep.subr.bf16.mxu0 %v1377_v28  ;;  %v1456_v21 = vld [vmem:[%s2046_s1 + $0x340] ss:$8 sps:$4 sm:$0xff]   ;;  %v1461_v22 = vld [vmem:[%s2046_s1 + $0x234] ss:$8 sps:$4 sm:$0xff]   ;;  %v1459_v24 = vld [vmem:[%s2046_s1 + $0x230] ss:$8 sps:$4 sm:$0xff]  }
  0x1d   :  { %970 = vmatprep.subr.bf16.mxu1 %v1379_v29  ;;  %v1464_v23 = vld [vmem:[%s2046_s1 + $0x334] ss:$8 sps:$4 sm:$0xff]   ;;  %v1462_v25 = vld [vmem:[%s2046_s1 + $0x330] ss:$8 sps:$4 sm:$0xff]   ;;  %v1467_v26 = vld [vmem:[%s2046_s1 + $0x224] ss:$8 sps:$4 sm:$0xff]  }
  0x1e   :  { %v1470_v27 = vld [vmem:[%s2046_s1 + $0x324] ss:$8 sps:$4 sm:$0xff]   ;;  %v1465_v28 = vld [vmem:[%s2046_s1 + $0x220] ss:$8 sps:$4 sm:$0xff]   ;;  %v1500_v51 = vld [vmem:[%s2046_s1 + $0x3d4] ss:$8 sps:$4 sm:$0xff]  }
  0x1f   :  { %930 = vmatpush1.bf16.msra.mxu0 %v1381_v30  ;;  %v1468_v29 = vld [vmem:[%s2046_s1 + $0x320] ss:$8 sps:$4 sm:$0xff]   ;;  %v1473_v30 = vld [vmem:[%s2046_s1 + $0x214] ss:$8 sps:$4 sm:$0xff]   ;;  %v1491_v46 = vld [vmem:[%s2046_s1 + $0x2e4] ss:$8 sps:$4 sm:$0xff]  }
  0x20   :  { %971 = vmatpush1.bf16.msra.mxu1 %v1382_v31  ;;  %931 = vmatprep.subr.bf16.mxu0 %v1383_v32  ;;  %v1476_v31 = vld [vmem:[%s2046_s1 + $0x314] ss:$8 sps:$4 sm:$0xff]   ;;  %v1494_v47 = vld [vmem:[%s2046_s1 + $0x3e4] ss:$8 sps:$4 sm:$0xff]   ;;  %v1489_v48 = vld [vmem:[%s2046_s1 + $0x2e0] ss:$8 sps:$4 sm:$0xff]  }
  0x21   :  { %972 = vmatprep.subr.bf16.mxu1 %v1385_v33  ;;  %v1860_v32 = vld [vmem:[%s2047_s0 + $0x10] sm:$0xff] }
  0x22   :  { %v1471_v33 = vld [vmem:[%s2046_s1 + $0x210] ss:$8 sps:$4 sm:$0xff]  }
  0x23   :  { %932 = vmatpush2.bf16.msra.mxu0 %v1387_v34  ;;  %v1474_v34 = vld [vmem:[%s2046_s1 + $0x310] ss:$8 sps:$4 sm:$0xff]  }
  0x24   :  { %973 = vmatpush2.bf16.msra.mxu1 %v1388_v35  ;;  %933 = vmatprep.subr.bf16.mxu0 %v1389_v36  ;;  %v1183_v35 = vcombine.high %v1860_v32, %v1860_v32  ;;  %v1873_v36 = vld [vmem:[%s2047_s0 + $0x18] sm:$0xff] }
  0x25   :  { %974 = vmatprep.subr.bf16.mxu1 %v1391_v37  ;;  %v1479_v37 = vld [vmem:[%s2046_s1 + $0x204] ss:$8 sps:$4 sm:$0xff]  }
  0x27   :  { %934 = vmatpush2.bf16.msra.mxu0 %v1393_v38  ;;  %v1185_v38 = vcombine.high %v1873_v36, %v1873_v36 }
  0x28   :  { %975 = vmatpush2.bf16.msra.mxu1 %v1394_v39  ;;  %935 = vmatprep.subr.bf16.mxu0 %v1395_v40  ;;  %v1482_v39 = vld [vmem:[%s2046_s1 + $0x304] ss:$8 sps:$4 sm:$0xff]   ;;  %v1477_v40 = vld [vmem:[%s2046_s1 + $0x200] ss:$8 sps:$4 sm:$0xff]  }
  0x29   :  { %976 = vmatprep.subr.bf16.mxu1 %v1397_v41  ;;  %v1480_v41 = vld [vmem:[%s2046_s1 + $0x300] ss:$8 sps:$4 sm:$0xff]  }
  0x2b   :  { %936 = vmatpush2.bf16.msra.mxu0 %v1399_v42  ;;  %v1485_v42 = vld [vmem:[%s2046_s1 + $0x2f4] ss:$8 sps:$4 sm:$0xff]  }
  0x2c   :  { %977 = vmatpush2.bf16.msra.mxu1 %v1400_v43  ;;  %937 = vmatprep.subr.bf16.mxu0 %v1401_v44  ;;  %v1488_v43 = vld [vmem:[%s2046_s1 + $0x3f4] ss:$8 sps:$4 sm:$0xff]   ;;  %v1483_v44 = vld [vmem:[%s2046_s1 + $0x2f0] ss:$8 sps:$4 sm:$0xff]  }
  0x2d   :  { %978 = vmatprep.subr.bf16.mxu1 %v1403_v45  ;;  %v1486_v45 = vld [vmem:[%s2046_s1 + $0x3f0] ss:$8 sps:$4 sm:$0xff]  }
  0x2f   :  { %938 = vmatpush2.bf16.msra.mxu0 %v1405_v49  ;;  %v1492_v49 = vld [vmem:[%s2046_s1 + $0x3e0] ss:$8 sps:$4 sm:$0xff]  }
  0x30   :  { %979 = vmatpush2.bf16.msra.mxu1 %v1406_v50  ;;  %939 = vmatprep.subr.bf16.mxu0 %v1407_v52  ;;  %v1497_v50 = vld [vmem:[%s2046_s1 + $0x2d4] ss:$8 sps:$4 sm:$0xff]   ;;  %v1495_v52 = vld [vmem:[%s2046_s1 + $0x2d0] ss:$8 sps:$4 sm:$0xff]  }
  0x31   :  { %980 = vmatprep.subr.bf16.mxu1 %v1409_v53  ;;  %v1498_v53 = vld [vmem:[%s2046_s1 + $0x3d0] ss:$8 sps:$4 sm:$0xff]  }
  0x33   :  { %940 = vmatpush2.bf16.msra.mxu0 %v1411_v54  ;;  %v1503_v54 = vld [vmem:[%s2046_s1 + $0x2c4] ss:$8 sps:$4 sm:$0xff]  }
  0x34   :  { %981 = vmatpush2.bf16.msra.mxu1 %v1412_v55  ;;  %941 = vmatprep.subr.bf16.mxu0 %v1413_v56  ;;  %v1506_v55 = vld [vmem:[%s2046_s1 + $0x3c4] ss:$8 sps:$4 sm:$0xff]   ;;  %v1501_v56 = vld [vmem:[%s2046_s1 + $0x2c0] ss:$8 sps:$4 sm:$0xff]  }
  0x35   :  { %982 = vmatprep.subr.bf16.mxu1 %v1415_v57  ;;  %v1504_v57 = vld [vmem:[%s2046_s1 + $0x3c0] ss:$8 sps:$4 sm:$0xff]  }
  0x37   :  { %942 = vmatpush2.bf16.msra.mxu0 %v1417_v58  ;;  %v1509_v58 = vld [vmem:[%s2046_s1 + $0x2b4] ss:$8 sps:$4 sm:$0xff]  }
  0x38   :  { %983 = vmatpush2.bf16.msra.mxu1 %v1418_v59  ;;  %943 = vmatprep.subr.bf16.mxu0 %v1419_v60  ;;  %v1512_v59 = vld [vmem:[%s2046_s1 + $0x3b4] ss:$8 sps:$4 sm:$0xff]   ;;  %v1507_v60 = vld [vmem:[%s2046_s1 + $0x2b0] ss:$8 sps:$4 sm:$0xff]  }
  0x39   :  { %984 = vmatprep.subr.bf16.mxu1 %v1421_v61  ;;  %v1510_v61 = vld [vmem:[%s2046_s1 + $0x3b0] ss:$8 sps:$4 sm:$0xff]  }
  0x3b   :  { %944 = vmatpush2.bf16.msra.mxu0 %v1423_v62  ;;  %v1515_v62 = vld [vmem:[%s2046_s1 + $0x2a4] ss:$8 sps:$4 sm:$0xff]  }
  0x3c   :  { %985 = vmatpush2.bf16.msra.mxu1 %v1424_v63  ;;  %945 = vmatprep.subr.bf16.mxu0 %v1425_v0  ;;  %v1518_v63 = vld [vmem:[%s2046_s1 + $0x3a4] ss:$8 sps:$4 sm:$0xff]   ;;  %v1513_v0 = vld [vmem:[%s2046_s1 + $0x2a0] ss:$8 sps:$4 sm:$0xff]  }
  0x3d   :  { %986 = vmatprep.subr.bf16.mxu1 %v1427_v1  ;;  %v1516_v1 = vld [vmem:[%s2046_s1 + $0x3a0] ss:$8 sps:$4 sm:$0xff]  }
  0x3f   :  { %946 = vmatpush2.bf16.msra.mxu0 %v1429_v2  ;;  %v1521_v2 = vld [vmem:[%s2046_s1 + $0x294] ss:$8 sps:$4 sm:$0xff]  }
  0x40   :  { %987 = vmatpush2.bf16.msra.mxu1 %v1430_v3  ;;  %997 = vmatprep.subr.bf16.mxu0 %v1437_v4  ;;  %v1524_v3 = vld [vmem:[%s2046_s1 + $0x394] ss:$8 sps:$4 sm:$0xff]   ;;  %v1519_v4 = vld [vmem:[%s2046_s1 + $0x290] ss:$8 sps:$4 sm:$0xff]  }
  0x41   :  { %1038 = vmatprep.subr.bf16.mxu1 %v1440_v5  ;;  %v1522_v5 = vld [vmem:[%s2046_s1 + $0x390] ss:$8 sps:$4 sm:$0xff]  }
  0x42   :  { %948 = vmatmul.mubr.bf16.vlgmr.msra.gmra.mxu0 %v1178_v6  ;;  %v1527_v6 = vld [vmem:[%s2046_s1 + $0x284] ss:$8 sps:$4 sm:$0xff]  }
  0x43   :  { %989 = vmatmul.mubr.bf16.vlgmr.msra.gmra.mxu1 %v1180_v7  ;;  %998 = vmatpush1.bf16.msra.mxu0 %v1435_v8  ;;  %v1530_v7 = vld [vmem:[%s2046_s1 + $0x384] ss:$8 sps:$4 sm:$0xff]   ;;  %v1525_v8 = vld [vmem:[%s2046_s1 + $0x280] ss:$8 sps:$4 sm:$0xff]  }
  0x44   :  { %1039 = vmatpush1.bf16.msra.mxu1 %v1438_v9  ;;  %999 = vmatprep.subr.bf16.mxu0 %v1443_v10  ;;  %v1528_v9 = vld [vmem:[%s2046_s1 + $0x380] ss:$8 sps:$4 sm:$0xff]   ;;  %v1535_v10 = vld [vmem:[%s2046_s1 + $0x474] ss:$8 sps:$4 sm:$0xff]  }
  0x45   :  { %1040 = vmatprep.subr.bf16.mxu1 %v1446_v11  ;;  %1029 = vmatprep.mubr.bf16.mxu0 %v1183_v35  ;;  %v1182_v11 = vcombine.low %v1860_v32, %v1860_v32 }
  0x46   :  { %1070 = vmatprep.mubr.bf16.mxu1 %v1185_v38 }
  0x47   :  { %1000 = vmatpush1.bf16.msra.mxu0 %v1441_v12  ;;  %v1184_v12 = vcombine.low %v1873_v36, %v1873_v36 }
  0x48   :  { %1041 = vmatpush1.bf16.msra.mxu1 %v1444_v13  ;;  %1001 = vmatprep.subr.bf16.mxu0 %v1449_v14  ;;  %v1533_v13 = vld [vmem:[%s2046_s1 + $0x470] ss:$8 sps:$4 sm:$0xff]   ;;  %v1540_v14 = vld [vmem:[%s2046_s1 + $0x464] ss:$8 sps:$4 sm:$0xff]  }
  0x49   :  { %1042 = vmatprep.subr.bf16.mxu1 %v1452_v15  ;;  %v1538_v15 = vld [vmem:[%s2046_s1 + $0x460] ss:$8 sps:$4 sm:$0xff]  }
  0x4b   :  { %1002 = vmatpush1.bf16.msra.mxu0 %v1447_v16  ;;  %v1560_v16 = vmov 0  }
  0x4c   :  { %1043 = vmatpush1.bf16.msra.mxu1 %v1450_v17  ;;  %1003 = vmatprep.subr.bf16.mxu0 %v1455_v18  ;;  %v1543_v17 = vld [vmem:[%s2046_s1 + $0x454] ss:$8 sps:$4 sm:$0xff]   ;;  %v1541_v18 = vld [vmem:[%s2046_s1 + $0x450] ss:$8 sps:$4 sm:$0xff]  }
  0x4d   :  { %1044 = vmatprep.subr.bf16.mxu1 %v1458_v19  ;;  %v1546_v19 = vld [vmem:[%s2046_s1 + $0x444] ss:$8 sps:$4 sm:$0xff]  }
  0x4f   :  { %1004 = vmatpush1.bf16.msra.mxu0 %v1453_v20  ;;  %v1544_v20 = vld [vmem:[%s2046_s1 + $0x440] ss:$8 sps:$4 sm:$0xff]  }
  0x50   :  { %1045 = vmatpush1.bf16.msra.mxu1 %v1456_v21  ;;  %1005 = vmatprep.subr.bf16.mxu0 %v1461_v22  ;;  %v1549_v21 = vld [vmem:[%s2046_s1 + $0x434] ss:$8 sps:$4 sm:$0xff]   ;;  %v1547_v22 = vld [vmem:[%s2046_s1 + $0x430] ss:$8 sps:$4 sm:$0xff]  }
  0x51   :  { %1046 = vmatprep.subr.bf16.mxu1 %v1464_v23  ;;  %v1552_v23 = vld [vmem:[%s2046_s1 + $0x424] ss:$8 sps:$4 sm:$0xff]  }
  0x53   :  { %1006 = vmatpush1.bf16.msra.mxu0 %v1459_v24  ;;  %v1550_v24 = vld [vmem:[%s2046_s1 + $0x420] ss:$8 sps:$4 sm:$0xff]  }
  0x54   :  { %1047 = vmatpush1.bf16.msra.mxu1 %v1462_v25  ;;  %1007 = vmatprep.subr.bf16.mxu0 %v1467_v26  ;;  %v1555_v25 = vld [vmem:[%s2046_s1 + $0x414] ss:$8 sps:$4 sm:$0xff]   ;;  %v1553_v26 = vld [vmem:[%s2046_s1 + $0x410] ss:$8 sps:$4 sm:$0xff]  }
  0x55   :  { %1048 = vmatprep.subr.bf16.mxu1 %v1470_v27  ;;  %v1558_v27 = vld [vmem:[%s2046_s1 + $0x404] ss:$8 sps:$4 sm:$0xff]  }
  0x57   :  { %1008 = vmatpush1.bf16.msra.mxu0 %v1465_v28  ;;  %v1556_v28 = vld [vmem:[%s2046_s1 + $0x400] ss:$8 sps:$4 sm:$0xff]  }
  0x58   :  { %1049 = vmatpush1.bf16.msra.mxu1 %v1468_v29  ;;  %1009 = vmatprep.subr.bf16.mxu0 %v1473_v30  ;;  %v1559_v29 = vld [vmem:[%s2047_s0 + $0x20] ss:$0 sps:$4 sm:$0xff]  }
  0x59   :  { %1050 = vmatprep.subr.bf16.mxu1 %v1476_v31 }
  0x5b   :  { %1010 = vmatpush1.bf16.msra.mxu0 %v1471_v33 }
  0x5c   :  { %1051 = vmatpush1.bf16.msra.mxu1 %v1474_v34  ;;  %1011 = vmatprep.subr.bf16.mxu0 %v1479_v37 }
  0x5d   :  { %1052 = vmatprep.subr.bf16.mxu1 %v1482_v39 }
  0x5f   :  { %1012 = vmatpush1.bf16.msra.mxu0 %v1477_v40 }
  0x60   :  { %1053 = vmatpush1.bf16.msra.mxu1 %v1480_v41  ;;  %1013 = vmatprep.subr.bf16.mxu0 %v1485_v42 }
  0x61   :  { %1054 = vmatprep.subr.bf16.mxu1 %v1488_v43 }
  0x63   :  { %1014 = vmatpush2.bf16.msra.mxu0 %v1483_v44 }
  0x64   :  { %1055 = vmatpush2.bf16.msra.mxu1 %v1486_v45  ;;  %1015 = vmatprep.subr.bf16.mxu0 %v1491_v46 }
  0x65   :  { %1056 = vmatprep.subr.bf16.mxu1 %v1494_v47 }
  0x67   :  { %1016 = vmatpush2.bf16.msra.mxu0 %v1489_v48 }
  0x68   :  { %1057 = vmatpush2.bf16.msra.mxu1 %v1492_v49  ;;  %1017 = vmatprep.subr.bf16.mxu0 %v1497_v50 }
  0x69   :  { %1058 = vmatprep.subr.bf16.mxu1 %v1500_v51 }
  0x6b   :  { %1018 = vmatpush2.bf16.msra.mxu0 %v1495_v52 }
  0x6c   :  { %1059 = vmatpush2.bf16.msra.mxu1 %v1498_v53  ;;  %1019 = vmatprep.subr.bf16.mxu0 %v1503_v54 }
  0x6d   :  { %1060 = vmatprep.subr.bf16.mxu1 %v1506_v55 }
  0x6f   :  { %1020 = vmatpush2.bf16.msra.mxu0 %v1501_v56 }
  0x70   :  { %1061 = vmatpush2.bf16.msra.mxu1 %v1504_v57  ;;  %1021 = vmatprep.subr.bf16.mxu0 %v1509_v58 }
  0x71   :  { %1062 = vmatprep.subr.bf16.mxu1 %v1512_v59 }
  0x73   :  { %1022 = vmatpush2.bf16.msra.mxu0 %v1507_v60 }
  0x74   :  { %1063 = vmatpush2.bf16.msra.mxu1 %v1510_v61  ;;  %1023 = vmatprep.subr.bf16.mxu0 %v1515_v62 }
  0x75   :  { %1064 = vmatprep.subr.bf16.mxu1 %v1518_v63 }
  0x77   :  { %1024 = vmatpush2.bf16.msra.mxu0 %v1513_v0 }
  0x78   :  { %1065 = vmatpush2.bf16.msra.mxu1 %v1516_v1  ;;  %1025 = vmatprep.subr.bf16.mxu0 %v1521_v2 }
  0x79   :  { %1066 = vmatprep.subr.bf16.mxu1 %v1524_v3 }
  0x7b   :  { %1026 = vmatpush2.bf16.msra.mxu0 %v1519_v4 }
  0x7c   :  { %1067 = vmatpush2.bf16.msra.mxu1 %v1522_v5  ;;  %1027 = vmatprep.subr.bf16.mxu0 %v1527_v6 }
  0x7d   :  { %1068 = vmatprep.subr.bf16.mxu1 %v1530_v7 }
  0x7f   :  { %1028 = vmatpush2.bf16.msra.mxu0 %v1525_v8 }
  0x80   :  { %1069 = vmatpush2.bf16.msra.mxu1 %v1528_v9  ;;  %1079 = vmatprep.subr.bf16.mxu0 %v1535_v10 }
  0x82   :  { %1030 = vmatmul.mubr.bf16.vlgmr.msra.gmra.mxu0 %v1182_v11 }
  0x83   :  { %1071 = vmatmul.mubr.bf16.vlgmr.msra.gmra.mxu1 %v1184_v12  ;;  %1080 = vmatpush1.bf16.msra.mxu0 %v1533_v13 }
  0x84   :  { %1111 = vmatprep.mubr.bf16.mxu0 %v1560_v16  ;;  %1081 = vmatprep.subr.bf16.mxu0 %v1540_v14 }
  0x87   :  { %1082 = vmatpush1.bf16.msra.mxu0 %v1538_v15 }
  0x88   :  { %1083 = vmatprep.subr.bf16.mxu0 %v1543_v17 }
  0x8b   :  { %1084 = vmatpush1.bf16.msra.mxu0 %v1541_v18 }
  0x8c   :  { %1085 = vmatprep.subr.bf16.mxu0 %v1546_v19 }
  0x8f   :  { %1086 = vmatpush1.bf16.msra.mxu0 %v1544_v20 }
  0x90   :  { %1087 = vmatprep.subr.bf16.mxu0 %v1549_v21 }
  0x93   :  { %1088 = vmatpush1.bf16.msra.mxu0 %v1547_v22 }
  0x94   :  { %1089 = vmatprep.subr.bf16.mxu0 %v1552_v23 }
  0x97   :  { %1090 = vmatpush1.bf16.msra.mxu0 %v1550_v24 }
  0x98   :  { %1091 = vmatprep.subr.bf16.mxu0 %v1555_v25 }
  0x9b   :  { %1092 = vmatpush1.bf16.msra.mxu0 %v1553_v26 }
  0x9c   :  { %1093 = vmatprep.subr.bf16.mxu0 %v1558_v27 }
  0x9f   :  { %1094 = vmatpush1.bf16.msra.mxu0 %v1556_v28 }
  0xa2   :  { %1112 = vmatmul.mubr.bf16.vlgmr.msra.gmra.mxu0 %v1559_v29 }
 0x102   :  { %v949_v30 = vpop.f32.mrf.mxu0 }
 0x103   :  { %v990_v31 = vpop.f32.mrf.mxu1 }
 0x104   :  { %v991_v32 = vadd.f32 %v990_v31, %v949_v30  ;;  %v951_v33 = vpop.f32.mrf.mxu0 }
 0x105   :  { %v992_v34 = vpop.f32.mrf.mxu1 }
 0x106   :  { %v993_v35 = vadd.f32 %v992_v34, %v951_v33  ;;  %v953_v36 = vpop.f32.mrf.mxu0 }
 0x107   :  { %v994_v37 = vpop.f32.mrf.mxu1 }
 0x108   :  { %v954_v38 = vpop.f32.mrf.mxu0 }
 0x109   :  { %v995_v39 = vpop.f32.mrf.mxu1 }
 0x142   :  { %v1031_v40 = vpop.f32.mrf.mxu0 }
 0x143   :  { %v1072_v41 = vpop.f32.mrf.mxu1  ;;  %v1032_v48 = vadd.f32 %v1031_v40, %v991_v32 }
 0x144   :  { %v1033_v42 = vpop.f32.mrf.mxu0 }
 0x145   :  { %v1074_v43 = vpop.f32.mrf.mxu1  ;;  %v1034_v49 = vadd.f32 %v1033_v42, %v993_v35  ;;  %v1073_v50 = vadd.f32 %v1072_v41, %v1032_v48 }
 0x146   :  { %v1035_v44 = vpop.f32.mrf.mxu0 }
 0x147   :  { %v1076_v45 = vpop.f32.mrf.mxu1  ;;  %v1075_v52 = vadd.f32 %v1074_v43, %v1034_v49 }
 0x148   :  { %v1036_v46 = vpop.f32.mrf.mxu0 }
 0x149   :  { %v1077_v47 = vpop.f32.mrf.mxu1 }
 0x162   :  { %v1113_v51 = vpop.f32.mrf.mxu0 }
 0x163   :  { %v1114_v53 = vadd.f32 %v1113_v51, %v1073_v50 }
 0x164   :  { %v1115_v54 = vpop.f32.mrf.mxu0 }
 0x165   :  { %v1129_v55 = vrot.slane %v1114_v53, 4  ;;  %v1141_v56 = vmul.f32 %v1114_v53, %v1114_v53  ;;  %v1116_v57 = vadd.f32 %v1115_v54, %v1075_v52 }
 0x166   :  { %v1117_v58 = vpop.f32.mrf.mxu0 }
 0x167   :  { %v1130_v59 = vadd.f32 %v1129_v55, %v1114_v53  ;;  %v1143_v60 = vrot.slane %v1141_v56, 4  ;;  %v1333_v61 = vpack.c.bf16 %v1116_v57, %v1114_v53  ;;  %v1135_v62 = vrot.slane %v1116_v57, 4 }
 0x168   :  { %v1142_v63 = vmul.f32 %v1116_v57, %v1116_v57  ;;  %v1118_v0 = vpop.f32.mrf.mxu0 }
 0x169   :  { %v1131_v1 = vrot.slane %v1130_v59, 2  ;;  %v1144_v2 = vadd.f32 %v1143_v60, %v1141_v56  ;;  %1128 = vst [vmem:[%s2048_s2] sm:$0xff] %v1333_v61  ;;  %v1136_v3 = vadd.f32 %v1135_v62, %v1116_v57 }
 0x16a   :  { %v1149_v4 = vrot.slane %v1142_v63, 4 }
 0x16b   :  { %v1145_v5 = vrot.slane %v1144_v2, 2  ;;  %v1137_v6 = vrot.slane %v1136_v3, 2  ;;  %v1132_v7 = vadd.f32 %v1131_v1, %v1130_v59 }
 0x16c   :  { %v1150_v8 = vadd.f32 %v1149_v4, %v1142_v63 }
 0x16d   :  { %v1146_v9 = vadd.f32 %v1145_v5, %v1144_v2  ;;  %v1138_v10 = vadd.f32 %v1137_v6, %v1136_v3  ;;  %v1133_v13 = vrot.slane %v1132_v7, 1 }
 0x16e   :  { %v1151_v11 = vrot.slane %v1150_v8, 2 }
 0x16f   :  { %v1147_v12 = vrot.slane %v1146_v9, 1  ;;  %v1139_v14 = vrot.slane %v1138_v10, 1  ;;  %v1134_v18 = vadd.f32 %v1133_v13, %v1132_v7 }
 0x170   :  { %v1152_v15 = vadd.f32 %v1151_v11, %v1150_v8 }
 0x171   :  { %v1148_v16 = vadd.f32 %v1147_v12, %v1146_v9  ;;  %v1140_v19 = vadd.f32 %v1139_v14, %v1138_v10 }
 0x172   :  { %v1153_v17 = vrot.slane %v1152_v15, 1 }
 0x173   :  { %v1156_v21 = vsel %vm1155_vm0, %v1134_v18, %v1148_v16 }
 0x174   :  { %v1154_v20 = vadd.f32 %v1153_v17, %v1152_v15 }
 0x176   :  { %v1157_v22 = vsel %vm1155_vm0, %v1140_v19, %v1154_v20 }
 0x177   :  { %v1160_v23 = vcombine.low %v1156_v21, %v1157_v22 }
 0x179   :  { %1332 = vst.sshfl [vmem:[%s2049_s3] sm:$0x33 pattern:$0x76325410] %v1160_v23 }

// kernel: squeeze.104
= control target key start
LH: loop header
LB: loop body
LE: loop exit
PB: predicated region body
PF: predicated region fallthrough
CT: control target
= control target key end

     0   :  { %s40_s8 = smov 32   ;;  %vm8_vm0 = vcmask 261120   ;;  %s41_s9 = smov 64   ;;  %s58_s0 = inlined_call_operand.vmem [shape: f32[128], index: 0, kind: input, shape index: {}]   ;;  %s59_s1 = inlined_call_operand.vmem [shape: f32[4,32], index: 1, kind: output, shape index: {}]  }
   0x1   :  { %v5_v0 = vld [vmem:[%s58_s0] sm:$0x1]  ;;  %s39_s0 = smov 96  }
   0x2   :  { %6 = vst [vmem:[#allocation1] sm:$0x1] %v5_v0 }
   0x9   :  { %v10_v1 = vld [vmem:[#allocation1] sm:$0x1]  }
   0xa   :  { %v22_v2 = vld [vmem:[#allocation1] sm:$0x1]   ;;  %11 = vrot.lane.b32.xlu0 %v10_v1, %s39_s0 }
   0xb   :  { %23 = vrot.lane.b32.xlu1 %v22_v2, %s40_s8  ;;  %v7_v3 = vld [vmem:[#allocation1] sm:$0x1]  }
   0xc   :  { %v16_v4 = vld [vmem:[#allocation1] sm:$0x1]   ;;  %9 = vst.msk [vmem:[#allocation0] sm:$0x1] %vm8_vm0, %v7_v3  }
   0xe   :  { %17 = vrot.lane.b32.xlu0 %v16_v4, %s41_s9 }
  0x7c   :  { %v12_v5 = vpop.permute.xlu0 %11  }
  0x7d   :  { %v24_v6 = vpop.permute.xlu1 %23   ;;  %15 = vst.msk [vmem:[#allocation0 + $0x1] sm:$0x1] %vm8_vm0, %v12_v5  }
  0x7e   :  { %27 = vst.msk [vmem:[#allocation0 + $0x3] sm:$0x1] %vm8_vm0, %v24_v6  }
  0x80   :  { %v18_v7 = vpop.permute.xlu0 %17  }
  0x81   :  { %21 = vst.msk [vmem:[#allocation0 + $0x2] sm:$0x1] %vm8_vm0, %v18_v7  }
  0x88   :  { %v32_v8 = vld [vmem:[#allocation0] sm:$0xf] }
  0x89   :  { %35 = vst [vmem:[%s59_s1] sm:$0xf] %v32_v8 }

// kernel: tile.60
= control target key start
LH: loop header
LB: loop body
LE: loop exit
PB: predicated region body
PF: predicated region fallthrough
CT: control target
= control target key end

     0   :  { %s22_s0 = inlined_call_operand.vmem [shape: f32[32], index: 0, kind: input, shape index: {}]   ;;  %s23_s1 = inlined_call_operand.vmem [shape: f32[4,32], index: 1, kind: output, shape index: {}]  }
   0x1   :  { %v4_v0 = vld [vmem:[%s22_s0] ss:$0 sm:$0xff] }
   0x2   :  { %5 = vst [vmem:[%s23_s1] sm:$0xf] %v4_v0 }

// kernel: tile.61
= control target key start
LH: loop header
LB: loop body
LE: loop exit
PB: predicated region body
PF: predicated region fallthrough
CT: control target
= control target key end

     0   :  { %vm8_vm0 = vcmask 261120   ;;  %s40_s8 = smov 32   ;;  %s41_s9 = smov 64   ;;  %vm14_vm1 = vcmask 1048320   ;;  %vm20_vm2 = vcmask 785920   ;;  %vm26_vm3 = vcmask 523520   ;;  %s58_s0 = inlined_call_operand.vmem [shape: f32[4,32], index: 0, kind: input, shape index: {}]   ;;  %s59_s1 = inlined_call_operand.vmem [shape: f32[1,128], index: 1, kind: output, shape index: {}]  }
   0x1   :  { %v5_v0 = vld [vmem:[%s58_s0] sm:$0xf]  ;;  %s39_s0 = smov 96  }
   0x2   :  { %6 = vst [vmem:[#allocation1] sm:$0xf] %v5_v0 }
   0x9   :  { %v11_v1 = vld [vmem:[#allocation1 + $0x3] sm:$0x1]   ;;  %v23_v2 = vld [vmem:[#allocation1 + $0x1] sm:$0x1]   ;;  %v7_v3 = vld [vmem:[#allocation1] sm:$0x1]  }
   0xa   :  { %12 = vrot.lane.b32.xlu0 %v11_v1, %s39_s0  ;;  %24 = vrot.lane.b32.xlu1 %v23_v2, %s40_s8  ;;  %v17_v4 = vld [vmem:[#allocation1 + $0x2] sm:$0x1]   ;;  %9 = vst.msk [vmem:[#allocation0] sm:$0x1] %vm8_vm0, %v7_v3  }
   0xe   :  { %18 = vrot.lane.b32.xlu0 %v17_v4, %s41_s9 }
  0x7c   :  { %v13_v5 = vpop.permute.xlu0 %12   ;;  %v25_v6 = vpop.permute.xlu1 %24  }
  0x7d   :  { %15 = vst.msk [vmem:[#allocation0] sm:$0x1] %vm14_vm1, %v13_v5  }
  0x80   :  { %v19_v7 = vpop.permute.xlu0 %18  }
  0x81   :  { %21 = vst.msk [vmem:[#allocation0] sm:$0x1] %vm20_vm2, %v19_v7  }
  0x82   :  { %27 = vst.msk [vmem:[#allocation0] sm:$0x1] %vm26_vm3, %v25_v6  }
  0x89   :  { %v32_v8 = vld [vmem:[#allocation0] sm:$0x1] }
  0x8a   :  { %35 = vst [vmem:[%s59_s1] sm:$0x1] %v32_v8 }

// kernel: unet_generator_forward.23
= control target key start
LH: loop header
LB: loop body
LE: loop exit
PB: predicated region body
PF: predicated region fallthrough
CT: control target
= control target key end

     0   :  { %v666_v36 = vmov 0.0   ;;  %vm667_vm0 = vmmov 0   ;;  %vm490_vm1 = vcmask 1040384   ;;  %s823_s1 = inlined_call_operand.vmem [shape: bf16[640,128], index: 1, kind: input, shape index: {}]   ;;  %s824_s0 = inlined_call_operand.vmem [shape: bf16[8,640], index: 0, kind: input, shape index: {}]   ;;  %s825_s2 = inlined_call_operand.vmem [shape: bf16[8,128], index: 2, kind: output, shape index: {0}]   ;;  %s826_s3 = inlined_call_operand.vmem [shape: f32[1,2,128], index: 3, kind: output, shape index: {1}]  }
   0x1   :  { %v621_v0 = vld [vmem:[%s823_s1 + $0x78] sm:$0xff]   ;;  %v625_v4 = vld [vmem:[%s823_s1 + $0x70] sm:$0xff]   ;;  %v629_v8 = vld [vmem:[%s823_s1 + $0x68] sm:$0xff]  }
   0x2   :  { %v622_v1 = vld [vmem:[%s823_s1 + $0xf8] sm:$0xff]   ;;  %546 = vmatprep.subr.bf16.mxu0 %v621_v0  ;;  %v626_v5 = vld [vmem:[%s823_s1 + $0xf0] sm:$0xff]   ;;  %v630_v9 = vld [vmem:[%s823_s1 + $0xe8] sm:$0xff]  }
   0x3   :  { %v623_v2 = vld [vmem:[%s823_s1 + $0x38] sm:$0xff]   ;;  %568 = vmatprep.subr.bf16.mxu1 %v622_v1  ;;  %v627_v6 = vld [vmem:[%s823_s1 + $0x30] sm:$0xff]   ;;  %v631_v10 = vld [vmem:[%s823_s1 + $0x28] sm:$0xff]  }
   0x4   :  { %v624_v3 = vld [vmem:[%s823_s1 + $0xb8] sm:$0xff]   ;;  %547 = vmatpush3.bf16.msra.mxu0 %v623_v2  ;;  %v628_v7 = vld [vmem:[%s823_s1 + $0xb0] sm:$0xff]   ;;  %v632_v11 = vld [vmem:[%s823_s1 + $0xa8] sm:$0xff]  }
   0x5   :  { %569 = vmatpush3.bf16.msra.mxu1 %v624_v3  ;;  %548 = vmatprep.subr.bf16.mxu0 %v625_v4  ;;  %v633_v12 = vld [vmem:[%s823_s1 + $0x60] sm:$0xff]   ;;  %v637_v16 = vld [vmem:[%s823_s1 + $0x58] sm:$0xff]   ;;  %v641_v20 = vld [vmem:[%s823_s1 + $0x50] sm:$0xff]  }
   0x6   :  { %570 = vmatprep.subr.bf16.mxu1 %v626_v5  ;;  %v634_v13 = vld [vmem:[%s823_s1 + $0xe0] sm:$0xff]   ;;  %v638_v17 = vld [vmem:[%s823_s1 + $0xd8] sm:$0xff]   ;;  %v642_v21 = vld [vmem:[%s823_s1 + $0xd0] sm:$0xff]  }
   0x7   :  { %v635_v14 = vld [vmem:[%s823_s1 + $0x20] sm:$0xff]   ;;  %v639_v18 = vld [vmem:[%s823_s1 + $0x18] sm:$0xff]   ;;  %v643_v22 = vld [vmem:[%s823_s1 + $0x10] sm:$0xff]  }
   0x8   :  { %549 = vmatpush3.bf16.msra.mxu0 %v627_v6  ;;  %v636_v15 = vld [vmem:[%s823_s1 + $0xa0] sm:$0xff]   ;;  %v640_v19 = vld [vmem:[%s823_s1 + $0x98] sm:$0xff]   ;;  %v644_v23 = vld [vmem:[%s823_s1 + $0x90] sm:$0xff]  }
   0x9   :  { %571 = vmatpush3.bf16.msra.mxu1 %v628_v7  ;;  %550 = vmatprep.subr.bf16.mxu0 %v629_v8  ;;  %v645_v24 = vld [vmem:[%s823_s1 + $0x48] sm:$0xff]   ;;  %v649_v28 = vld [vmem:[%s823_s1 + $0x40] sm:$0xff]   ;;  %v658_v39 = vld [vmem:[%s823_s1 + $0x138] sm:$0xff]  }
   0xa   :  { %572 = vmatprep.subr.bf16.mxu1 %v630_v9  ;;  %v646_v25 = vld [vmem:[%s823_s1 + $0xc8] sm:$0xff]   ;;  %v650_v29 = vld [vmem:[%s823_s1 + $0xc0] sm:$0xff]   ;;  %v659_v40 = vld [vmem:[%s823_s1 + $0x130] sm:$0xff]  }
   0xb   :  { %v647_v26 = vld [vmem:[%s823_s1 + $0x8] sm:$0xff]   ;;  %v651_v30 = vld [vmem:[%s823_s1] sm:$0xff]   ;;  %v662_v43 = vld [vmem:[%s823_s1 + $0x118] sm:$0xff]  }
   0xc   :  { %551 = vmatpush3.bf16.msra.mxu0 %v631_v10  ;;  %v648_v27 = vld [vmem:[%s823_s1 + $0x88] sm:$0xff]   ;;  %v652_v31 = vld [vmem:[%s823_s1 + $0x80] sm:$0xff]   ;;  %v663_v44 = vld [vmem:[%s823_s1 + $0x110] sm:$0xff]  }
   0xd   :  { %573 = vmatpush3.bf16.msra.mxu1 %v632_v11  ;;  %552 = vmatprep.subr.bf16.mxu0 %v633_v12  ;;  %v14_v32 = vld [vmem:[%s824_s0] sm:$0xff]  ;;  %v15_v35 = vld [vmem:[%s824_s0 + $0x8] sm:$0xff]  ;;  %v655_v47 = vld [vmem:[%s824_s0 + $0x10] ss:$0 sps:$4 sm:$0xff]  }
   0xe   :  { %574 = vmatprep.subr.bf16.mxu1 %v634_v13  ;;  %v501_v33 = vcombine.low %v14_v32, %v14_v32  ;;  %v502_v34 = vcombine.high %v14_v32, %v14_v32  ;;  %v503_v37 = vcombine.low %v15_v35, %v15_v35  ;;  %v504_v38 = vcombine.high %v15_v35, %v15_v35  ;;  %v660_v41 = vld [vmem:[%s823_s1 + $0x128] sm:$0xff]   ;;  %v661_v42 = vld [vmem:[%s823_s1 + $0x120] sm:$0xff]  }
   0xf   :  { %v664_v45 = vld [vmem:[%s823_s1 + $0x108] sm:$0xff]   ;;  %v665_v46 = vld [vmem:[%s823_s1 + $0x100] sm:$0xff]  }
  0x10   :  { %553 = vmatpush3.bf16.msra.mxu0 %v635_v14  ;;  %387 = vmatprep.mubr.bf16.mxu0 %v502_v34 }
  0x11   :  { %575 = vmatpush3.bf16.msra.mxu1 %v636_v15  ;;  %554 = vmatprep.subr.bf16.mxu0 %v637_v16 }
  0x12   :  { %576 = vmatprep.subr.bf16.mxu1 %v638_v17  ;;  %427 = vmatprep.mubr.bf16.mxu1 %v504_v38 }
  0x14   :  { %555 = vmatpush3.bf16.msra.mxu0 %v639_v18 }
  0x15   :  { %577 = vmatpush3.bf16.msra.mxu1 %v640_v19  ;;  %556 = vmatprep.subr.bf16.mxu0 %v641_v20 }
  0x16   :  { %578 = vmatprep.subr.bf16.mxu1 %v642_v21 }
  0x18   :  { %557 = vmatpush3.bf16.msra.mxu0 %v643_v22 }
  0x19   :  { %579 = vmatpush3.bf16.msra.mxu1 %v644_v23  ;;  %558 = vmatprep.subr.bf16.mxu0 %v645_v24 }
  0x1a   :  { %580 = vmatprep.subr.bf16.mxu1 %v646_v25 }
  0x1c   :  { %559 = vmatpush3.bf16.msra.mxu0 %v647_v26 }
  0x1d   :  { %581 = vmatpush3.bf16.msra.mxu1 %v648_v27  ;;  %560 = vmatprep.subr.bf16.mxu0 %v649_v28 }
  0x1e   :  { %582 = vmatprep.subr.bf16.mxu1 %v650_v29 }
  0x20   :  { %561 = vmatpush3.bf16.msra.mxu0 %v651_v30 }
  0x21   :  { %583 = vmatpush3.bf16.msra.mxu1 %v652_v31  ;;  %599 = vmatprep.subr.bf16.mxu0 %v666_v36 }
  0x23   :  { %388 = vmatmul.mubr.bf16.vlgmr.msra.gmra.mxu0 %v501_v33 }
  0x24   :  { %428 = vmatmul.mubr.bf16.vlgmr.msra.gmra.mxu1 %v503_v37  ;;  %600 = vmatpush3.bf16.msra.mxu0 %v658_v39 }
  0x25   :  { %601 = vmatprep.subr.bf16.mxu0 %v666_v36  ;;  %615 = vmatprep.mubr.msk.bf16.mxu0 %vm667_vm0, %v666_v36 }
  0x28   :  { %602 = vmatpush3.bf16.msra.mxu0 %v659_v40 }
  0x29   :  { %603 = vmatprep.subr.bf16.mxu0 %v666_v36 }
  0x2c   :  { %604 = vmatpush3.bf16.msra.mxu0 %v660_v41 }
  0x2d   :  { %605 = vmatprep.subr.bf16.mxu0 %v666_v36 }
  0x30   :  { %606 = vmatpush3.bf16.msra.mxu0 %v661_v42 }
  0x31   :  { %607 = vmatprep.subr.bf16.mxu0 %v666_v36 }
  0x34   :  { %608 = vmatpush3.bf16.msra.mxu0 %v662_v43 }
  0x35   :  { %609 = vmatprep.subr.bf16.mxu0 %v666_v36 }
  0x38   :  { %610 = vmatpush3.bf16.msra.mxu0 %v663_v44 }
  0x39   :  { %611 = vmatprep.subr.bf16.mxu0 %v666_v36 }
  0x3c   :  { %612 = vmatpush3.bf16.msra.mxu0 %v664_v45 }
  0x3d   :  { %613 = vmatprep.subr.bf16.mxu0 %v666_v36 }
  0x40   :  { %614 = vmatpush3.bf16.msra.mxu0 %v665_v46 }
  0x43   :  { %616 = vmatmul.mubr.bf16.vlgmr.msra.gmra.mxu0 %v655_v47 }
  0xe3   :  { %v562_v48 = vpop.f32.mrf.mxu0 }
  0xe4   :  { %v584_v49 = vpop.f32.mrf.mxu1 }
  0xe5   :  { %v563_v50 = vpop.f32.mrf.mxu0 }
  0xe6   :  { %v585_v51 = vpop.f32.mrf.mxu1  ;;  %v564_v56 = vadd.f32 %v563_v50, %v562_v48 }
  0xe7   :  { %v565_v52 = vpop.f32.mrf.mxu0  ;;  %v586_v57 = vadd.f32 %v585_v51, %v584_v49 }
  0xe8   :  { %v587_v53 = vpop.f32.mrf.mxu1 }
  0xe9   :  { %v566_v54 = vpop.f32.mrf.mxu0  ;;  %v430_v58 = vadd.f32 %v586_v57, %v564_v56 }
  0xea   :  { %v588_v55 = vpop.f32.mrf.mxu1 }
 0x103   :  { %v469_v59 = vpop.f32.mrf.mxu0 }
 0x104   :  { %v470_v60 = vadd.f32 %v469_v59, %v430_v58 }
 0x105   :  { %v617_v61 = vpop.f32.mrf.mxu0 }
 0x106   :  { %v475_v62 = vpack.c.bf16 %v470_v60, %v470_v60  ;;  %v477_v63 = vrot.slane %v470_v60, 4  ;;  %v483_v0 = vmul.f32 %v470_v60, %v470_v60 }
 0x107   :  { %v472_v1 = vpop.f32.mrf.mxu0 }
 0x108   :  { %476 = vst [vmem:[%s825_s2] sm:$0xf] %v475_v62  ;;  %v478_v2 = vadd.f32 %v477_v63, %v470_v60  ;;  %v484_v3 = vrot.slane %v483_v0, 4 }
 0x109   :  { %v618_v4 = vpop.f32.mrf.mxu0 }
 0x10a   :  { %v479_v5 = vrot.slane %v478_v2, 2  ;;  %v485_v6 = vadd.f32 %v484_v3, %v483_v0 }
 0x10c   :  { %v480_v7 = vadd.f32 %v479_v5, %v478_v2  ;;  %v486_v8 = vrot.slane %v485_v6, 2 }
 0x10e   :  { %v481_v9 = vrot.slane %v480_v7, 1  ;;  %v487_v10 = vadd.f32 %v486_v8, %v485_v6 }
 0x110   :  { %v488_v11 = vrot.slane %v487_v10, 1  ;;  %v482_v12 = vadd.f32 %v481_v9, %v480_v7 }
 0x112   :  { %v489_v13 = vadd.f32 %v488_v11, %v487_v10 }
 0x114   :  { %v491_v14 = vsel %vm490_vm1, %v482_v12, %v489_v13 }
 0x115   :  { %492 = vst [vmem:[%s826_s3] sm:$0x3] %v491_v14 }

// kernel: unet_generator_forward.24
= control target key start
LH: loop header
LB: loop body
LE: loop exit
PB: predicated region body
PF: predicated region fallthrough
CT: control target
= control target key end

     0   :  { %s73_s0 = inlined_call_operand.vmem [shape: bf16[8,128], index: 0, kind: input, shape index: {}]   ;;  %s74_s1 = inlined_call_operand.vmem [shape: f32[1,128], index: 1, kind: input, shape index: {}]   ;;  %s75_s2 = inlined_call_operand.vmem [shape: f32[1,128], index: 2, kind: input, shape index: {}]   ;;  %s76_s3 = inlined_call_operand.vmem [shape: bf16[8,128], index: 3, kind: output, shape index: {}]  }
   0x1   :  { %v14_v0 = vld [vmem:[%s73_s0] sm:$0xf] }
   0x2   :  { %v39_v1 = vld [vmem:[%s74_s1] ss:$0 sm:$0xff]  ;;  %v15_v2 = vunpack.c.l.bf16 %v14_v0 }
   0x3   :  { %v40_v3 = vld [vmem:[%s75_s2] ss:$0 sm:$0xff] }
   0x4   :  { %v23_v4 = vmul.f32 %v39_v1, %v15_v2 }
   0x6   :  { %v31_v5 = vadd.f32 %v40_v3, %v23_v4 }
   0x8   :  { %v32_v6 = vmax.f32 %v31_v5, 0.0 }
   0xa   :  { %v33_v7 = vpack.c.bf16 %v32_v6, %v32_v6 }
   0xc   :  { %34 = vst [vmem:[%s76_s3] sm:$0xf] %v33_v7 }

// kernel: unet_generator_forward.25
= control target key start
LH: loop header
LB: loop body
LE: loop exit
PB: predicated region body
PF: predicated region fallthrough
CT: control target
= control target key end

     0   :  { %vm386_vm0 = vcmask 1040384   ;;  %s655_s1 = inlined_call_operand.vmem [shape: bf16[384,128], index: 1, kind: input, shape index: {}]   ;;  %s656_s0 = inlined_call_operand.vmem [shape: bf16[32,384], index: 0, kind: input, shape index: {}]   ;;  %s657_s2 = inlined_call_operand.vmem [shape: bf16[32,128], index: 2, kind: output, shape index: {0}]   ;;  %s658_s3 = inlined_call_operand.vmem [shape: f32[1,2,128], index: 3, kind: output, shape index: {1}]  }
   0x1   :  { %v504_v0 = vld [vmem:[%s655_s1 + $0x78] sm:$0xff]   ;;  %v507_v3 = vld [vmem:[%s655_s1 + $0x70] sm:$0xff]   ;;  %v510_v6 = vld [vmem:[%s655_s1 + $0x68] sm:$0xff]  }
   0x2   :  { %v505_v1 = vld [vmem:[%s655_s1 + $0xb8] sm:$0xff]   ;;  %446 = vmatprep.subr.bf16.mxu0 %v504_v0  ;;  %v508_v4 = vld [vmem:[%s655_s1 + $0xb0] sm:$0xff]   ;;  %v511_v7 = vld [vmem:[%s655_s1 + $0xa8] sm:$0xff]  }
   0x3   :  { %v506_v2 = vld [vmem:[%s655_s1 + $0x38] sm:$0xff]   ;;  %484 = vmatprep.subr.bf16.mxu1 %v505_v1  ;;  %v509_v5 = vld [vmem:[%s655_s1 + $0x30] sm:$0xff]   ;;  %v512_v8 = vld [vmem:[%s655_s1 + $0x28] sm:$0xff]  }
   0x4   :  { %447 = vmatpush3.bf16.msra.mxu0 %v506_v2  ;;  %485 = vmatpush3.bf16.msra.mxu1 %v505_v1  ;;  %v513_v9 = vld [vmem:[%s655_s1 + $0x60] sm:$0xff]   ;;  %v516_v12 = vld [vmem:[%s655_s1 + $0x58] sm:$0xff]   ;;  %v519_v15 = vld [vmem:[%s655_s1 + $0x50] sm:$0xff]  }
   0x5   :  { %448 = vmatprep.subr.bf16.mxu0 %v507_v3  ;;  %486 = vmatprep.subr.bf16.mxu1 %v508_v4  ;;  %v514_v10 = vld [vmem:[%s655_s1 + $0xa0] sm:$0xff]   ;;  %v517_v13 = vld [vmem:[%s655_s1 + $0x98] sm:$0xff]   ;;  %v520_v16 = vld [vmem:[%s655_s1 + $0x90] sm:$0xff]  }
   0x6   :  { %v515_v11 = vld [vmem:[%s655_s1 + $0x20] sm:$0xff]   ;;  %v518_v14 = vld [vmem:[%s655_s1 + $0x18] sm:$0xff]   ;;  %v521_v17 = vld [vmem:[%s655_s1 + $0x10] sm:$0xff]  }
   0x7   :  { %v522_v18 = vld [vmem:[%s655_s1 + $0x48] sm:$0xff]   ;;  %v525_v21 = vld [vmem:[%s655_s1 + $0x40] sm:$0xff]  }
   0x8   :  { %449 = vmatpush3.bf16.msra.mxu0 %v509_v5  ;;  %487 = vmatpush3.bf16.msra.mxu1 %v508_v4  ;;  %v523_v19 = vld [vmem:[%s655_s1 + $0x88] sm:$0xff]   ;;  %v526_v22 = vld [vmem:[%s655_s1 + $0x80] sm:$0xff]  }
   0x9   :  { %450 = vmatprep.subr.bf16.mxu0 %v510_v6  ;;  %488 = vmatprep.subr.bf16.mxu1 %v511_v7  ;;  %v524_v20 = vld [vmem:[%s655_s1 + $0x8] sm:$0xff]   ;;  %v530_v23 = vld [vmem:[%s656_s0 + $0x4] ss:$12 sps:$4 sm:$0xff]  }
   0xa   :  { %v531_v24 = vld [vmem:[%s656_s0 + $0x8] ss:$12 sps:$4 sm:$0xff]   ;;  %278 = vmatprep.mubr.bf16.mxu0 %v530_v23  ;;  %v527_v25 = vld [vmem:[%s655_s1] sm:$0xff]  }
   0xb   :  { %500 = vmatprep.mubr.bf16.mxu1 %v531_v24  ;;  %v528_v26 = vld [vmem:[%s656_s0] ss:$12 sps:$4 sm:$0xff]   ;;  %v533_v28 = vld [vmem:[%s656_s0 + $0x1c] ss:$12 sps:$4 sm:$0xff]   ;;  %v535_v29 = vld [vmem:[%s656_s0 + $0x18] ss:$12 sps:$4 sm:$0xff]  }
   0xc   :  { %451 = vmatpush3.bf16.msra.mxu0 %v512_v8  ;;  %489 = vmatpush3.bf16.msra.mxu1 %v511_v7  ;;  %v532_v27 = vld [vmem:[%s656_s0 + $0x20] ss:$12 sps:$4 sm:$0xff]  }
   0xd   :  { %452 = vmatprep.subr.bf16.mxu0 %v513_v9  ;;  %490 = vmatprep.subr.bf16.mxu1 %v514_v10 }
  0x10   :  { %453 = vmatpush3.bf16.msra.mxu0 %v515_v11  ;;  %491 = vmatpush3.bf16.msra.mxu1 %v514_v10 }
  0x11   :  { %454 = vmatprep.subr.bf16.mxu0 %v516_v12  ;;  %492 = vmatprep.subr.bf16.mxu1 %v517_v13 }
  0x14   :  { %455 = vmatpush3.bf16.msra.mxu0 %v518_v14  ;;  %493 = vmatpush3.bf16.msra.mxu1 %v517_v13 }
  0x15   :  { %456 = vmatprep.subr.bf16.mxu0 %v519_v15  ;;  %494 = vmatprep.subr.bf16.mxu1 %v520_v16 }
  0x18   :  { %457 = vmatpush3.bf16.msra.mxu0 %v521_v17  ;;  %495 = vmatpush3.bf16.msra.mxu1 %v520_v16 }
  0x19   :  { %458 = vmatprep.subr.bf16.mxu0 %v522_v18  ;;  %496 = vmatprep.subr.bf16.mxu1 %v523_v19 }
  0x1c   :  { %459 = vmatpush3.bf16.msra.mxu0 %v524_v20  ;;  %497 = vmatpush3.bf16.msra.mxu1 %v523_v19 }
  0x1d   :  { %460 = vmatprep.subr.bf16.mxu0 %v525_v21  ;;  %498 = vmatprep.subr.bf16.mxu1 %v526_v22 }
  0x20   :  { %461 = vmatpush3.bf16.msra.mxu0 %v527_v25  ;;  %499 = vmatpush3.bf16.msra.mxu1 %v526_v22 }
  0x23   :  { %279 = vmatmul.mubr.bf16.vlgmr.msra.gmra.mxu0 %v528_v26  ;;  %501 = vmatmul.mubr.bf16.vlgmr.msra.gmra.mxu1 %v532_v27 }
  0x24   :  { %286 = vmatprep.mubr.bf16.mxu0 %v533_v28 }
  0x2b   :  { %287 = vmatmul.mubr.bf16.gmra.mxu0 %v535_v29 }
  0xe3   :  { %v462_v30 = vpop.f32.mrf.mxu0  ;;  %v502_v31 = vpop.f32.mrf.mxu1 }
  0xe5   :  { %v463_v32 = vpop.f32.mrf.mxu0  ;;  %v329_v33 = vpop.f32.mrf.mxu1 }
  0xe6   :  { %v464_v36 = vadd.f32 %v463_v32, %v462_v30 }
  0xe7   :  { %v465_v34 = vpop.f32.mrf.mxu0  ;;  %v503_v35 = vpop.f32.mrf.mxu1 }
  0xe8   :  { %v330_v41 = vadd.f32 %v464_v36, %v329_v33 }
  0xe9   :  { %v466_v37 = vpop.f32.mrf.mxu0  ;;  %v332_v39 = vpop.f32.mrf.mxu1 }
  0xea   :  { %v467_v38 = vadd.f32 %v466_v37, %v465_v34  ;;  %v373_v50 = vmul.f32 %v330_v41, %v330_v41 }
  0xeb   :  { %v468_v40 = vpop.f32.mrf.mxu0 }
  0xec   :  { %v333_v42 = vadd.f32 %v467_v38, %v332_v39 }
  0xed   :  { %v469_v43 = vpop.f32.mrf.mxu0 }
  0xee   :  { %v438_v44 = vpack.c.bf16 %v333_v42, %v330_v41  ;;  %v470_v45 = vadd.f32 %v469_v43, %v468_v40  ;;  %v374_v47 = vmul.f32 %v333_v42, %v333_v42  ;;  %v364_v51 = vadd.f32 %v333_v42, %v330_v41 }
  0xef   :  { %v471_v46 = vpop.f32.mrf.mxu0 }
  0xf0   :  { %439 = vst [vmem:[%s657_s2] sm:$0xff] %v438_v44   ;;  %v338_v48 = vadd.f32 %v502_v31, %v470_v45  ;;  %v377_v54 = vadd.f32 %v374_v47, %v373_v50 }
  0xf1   :  { %v472_v49 = vpop.f32.mrf.mxu0 }
  0xf2   :  { %v375_v52 = vmul.f32 %v338_v48, %v338_v48  ;;  %v473_v53 = vadd.f32 %v472_v49, %v471_v46  ;;  %v365_v55 = vadd.f32 %v364_v51, %v338_v48 }
  0xf4   :  { %v341_v56 = vadd.f32 %v503_v35, %v473_v53  ;;  %v378_v57 = vadd.f32 %v377_v54, %v375_v52 }
  0xf6   :  { %v443_v58 = vpack.c.bf16 %v341_v56, %v338_v48  ;;  %v366_v59 = vadd.f32 %v365_v55, %v341_v56  ;;  %v376_v60 = vmul.f32 %v341_v56, %v341_v56 }
  0xf8   :  { %445 = vst [vmem:[%s657_s2 + $0x8] sm:$0xff] %v443_v58   ;;  %v367_v61 = vrot.slane %v366_v59, 4  ;;  %v379_v62 = vadd.f32 %v378_v57, %v376_v60 }
  0xfa   :  { %v368_v63 = vadd.f32 %v367_v61, %v366_v59  ;;  %v380_v0 = vrot.slane %v379_v62, 4 }
  0xfc   :  { %v369_v1 = vrot.slane %v368_v63, 2  ;;  %v381_v2 = vadd.f32 %v380_v0, %v379_v62 }
  0xfe   :  { %v370_v3 = vadd.f32 %v369_v1, %v368_v63  ;;  %v382_v4 = vrot.slane %v381_v2, 2 }
 0x100   :  { %v371_v5 = vrot.slane %v370_v3, 1  ;;  %v383_v6 = vadd.f32 %v382_v4, %v381_v2 }
 0x102   :  { %v384_v7 = vrot.slane %v383_v6, 1  ;;  %v372_v8 = vadd.f32 %v371_v5, %v370_v3 }
 0x104   :  { %v385_v9 = vadd.f32 %v384_v7, %v383_v6 }
 0x106   :  { %v387_v10 = vsel %vm386_vm0, %v372_v8, %v385_v9 }
 0x107   :  { %388 = vst [vmem:[%s658_s3] sm:$0x3] %v387_v10 }

// kernel: unet_generator_forward.26
= control target key start
LH: loop header
LB: loop body
LE: loop exit
PB: predicated region body
PF: predicated region fallthrough
CT: control target
= control target key end

     0   :  { %s140_s0 = inlined_call_operand.vmem [shape: bf16[32,128], index: 0, kind: input, shape index: {}]   ;;  %s141_s1 = inlined_call_operand.vmem [shape: f32[1,128], index: 1, kind: input, shape index: {}]   ;;  %s142_s2 = inlined_call_operand.vmem [shape: f32[1,128], index: 2, kind: input, shape index: {}]   ;;  %s143_s3 = inlined_call_operand.vmem [shape: bf16[32,128], index: 3, kind: output, shape index: {}]  }
   0x1   :  { %v83_v0 = vld [vmem:[%s140_s0] sm:$0xff]   ;;  %v100_v4 = vld [vmem:[%s140_s0 + $0x8] sm:$0xff]  }
   0x2   :  { %v72_v1 = vld [vmem:[%s141_s1] ss:$0 sm:$0xff]  ;;  %v84_v2 = vunpack.c.l.bf16 %v83_v0  ;;  %v85_v3 = vunpack.c.h.bf16 %v83_v0  ;;  %v88_v6 = vunpack.c.l.bf16 %v100_v4  ;;  %v89_v7 = vunpack.c.h.bf16 %v100_v4 }
   0x3   :  { %v73_v5 = vld [vmem:[%s142_s2] ss:$0 sm:$0xff] }
   0x4   :  { %v29_v8 = vmul.f32 %v84_v2, %v72_v1  ;;  %v30_v9 = vmul.f32 %v85_v3, %v72_v1  ;;  %v31_v10 = vmul.f32 %v88_v6, %v72_v1  ;;  %v32_v11 = vmul.f32 %v89_v7, %v72_v1 }
   0x6   :  { %v40_v12 = vadd.f32 %v73_v5, %v29_v8  ;;  %v41_v13 = vadd.f32 %v73_v5, %v30_v9  ;;  %v42_v14 = vadd.f32 %v73_v5, %v31_v10  ;;  %v43_v15 = vadd.f32 %v73_v5, %v32_v11 }
   0x8   :  { %v44_v16 = vmax.f32 %v40_v12, 0.0  ;;  %v45_v17 = vmax.f32 %v41_v13, 0.0  ;;  %v46_v18 = vmax.f32 %v42_v14, 0.0  ;;  %v47_v19 = vmax.f32 %v43_v15, 0.0 }
   0xa   :  { %v93_v20 = vpack.c.bf16 %v45_v17, %v44_v16  ;;  %v98_v21 = vpack.c.bf16 %v47_v19, %v46_v18 }
   0xc   :  { %94 = vst [vmem:[%s143_s3] sm:$0xff] %v93_v20   ;;  %101 = vst [vmem:[%s143_s3 + $0x8] sm:$0xff] %v98_v21  }

// kernel: unet_generator_forward.27
= control target key start
LH: loop header
LB: loop body
LE: loop exit
PB: predicated region body
PF: predicated region fallthrough
CT: control target
= control target key end

     0   :  { %s749_s1 = inlined_call_operand.vmem [shape: bf16[256,128], index: 1, kind: input, shape index: {}]   ;;  %s750_s0 = inlined_call_operand.vmem [shape: bf16[128,256], index: 0, kind: input, shape index: {}]   ;;  %s751_s2 = inlined_call_operand.vmem [shape: f32[1,128], index: 2, kind: input, shape index: {}]   ;;  %s752_s3 = inlined_call_operand.vmem [shape: f32[128,128], index: 3, kind: output, shape index: {}]  }
   0x1   :  { %v492_v0 = vld [vmem:[%s749_s1 + $0x78] sm:$0xff]   ;;  %v494_v2 = vld [vmem:[%s749_s1 + $0x70] sm:$0xff]   ;;  %v496_v4 = vld [vmem:[%s749_s1 + $0x68] sm:$0xff]  }
   0x2   :  { %v493_v1 = vld [vmem:[%s749_s1 + $0x38] sm:$0xff]   ;;  %412 = vmatprep.subr.bf16.mxu0 %v492_v0  ;;  %476 = vmatprep.subr.bf16.mxu1 %v492_v0  ;;  %v495_v3 = vld [vmem:[%s749_s1 + $0x30] sm:$0xff]   ;;  %v497_v5 = vld [vmem:[%s749_s1 + $0x28] sm:$0xff]  }
   0x3   :  { %413 = vmatpush3.bf16.msra.mxu0 %v493_v1  ;;  %484 = vmatpush3.bf16.msra.mxu1 %v493_v1  ;;  %v498_v6 = vld [vmem:[%s749_s1 + $0x60] sm:$0xff]   ;;  %v500_v8 = vld [vmem:[%s749_s1 + $0x58] sm:$0xff]   ;;  %v502_v10 = vld [vmem:[%s749_s1 + $0x50] sm:$0xff]  }
   0x4   :  { %414 = vmatprep.subr.bf16.mxu0 %v494_v2  ;;  %477 = vmatprep.subr.bf16.mxu1 %v494_v2  ;;  %v499_v7 = vld [vmem:[%s749_s1 + $0x20] sm:$0xff]   ;;  %v501_v9 = vld [vmem:[%s749_s1 + $0x18] sm:$0xff]   ;;  %v503_v13 = vld [vmem:[%s749_s1 + $0x10] sm:$0xff]  }
   0x5   :  { %v510_v11 = vld [vmem:[%s750_s0 + $0x4] ss:$8 sps:$4 sm:$0xff]   ;;  %v508_v18 = vld [vmem:[%s750_s0] ss:$8 sps:$4 sm:$0xff]   ;;  %v514_v20 = vld [vmem:[%s750_s0 + $0x14] ss:$8 sps:$4 sm:$0xff]  }
   0x6   :  { %v513_v12 = vld [vmem:[%s750_s0 + $0x44] ss:$8 sps:$4 sm:$0xff]   ;;  %278 = vmatprep.mubr.bf16.mxu0 %v510_v11  ;;  %v511_v19 = vld [vmem:[%s750_s0 + $0x40] ss:$8 sps:$4 sm:$0xff]   ;;  %v516_v21 = vld [vmem:[%s750_s0 + $0x54] ss:$8 sps:$4 sm:$0xff]  }
   0x7   :  { %415 = vmatpush3.bf16.msra.mxu0 %v495_v3  ;;  %485 = vmatpush3.bf16.msra.mxu1 %v495_v3  ;;  %v504_v14 = vld [vmem:[%s749_s1 + $0x48] sm:$0xff]   ;;  %v506_v16 = vld [vmem:[%s749_s1 + $0x40] sm:$0xff]   ;;  %v518_v22 = vld [vmem:[%s750_s0 + $0x10] ss:$8 sps:$4 sm:$0xff]  }
   0x8   :  { %416 = vmatprep.subr.bf16.mxu0 %v496_v4  ;;  %478 = vmatprep.subr.bf16.mxu1 %v496_v4  ;;  %v505_v15 = vld [vmem:[%s749_s1 + $0x8] sm:$0xff]   ;;  %v507_v17 = vld [vmem:[%s749_s1] sm:$0xff]   ;;  %v519_v23 = vld [vmem:[%s750_s0 + $0x50] ss:$8 sps:$4 sm:$0xff]  }
   0x9   :  { %310 = vmatprep.mubr.bf16.mxu1 %v513_v12  ;;  %v520_v24 = vld [vmem:[%s750_s0 + $0x24] ss:$8 sps:$4 sm:$0xff]   ;;  %v524_v26 = vld [vmem:[%s750_s0 + $0x20] ss:$8 sps:$4 sm:$0xff]   ;;  %v526_v28 = vld [vmem:[%s750_s0 + $0x34] ss:$8 sps:$4 sm:$0xff]  }
   0xa   :  { %v522_v25 = vld [vmem:[%s750_s0 + $0x64] ss:$8 sps:$4 sm:$0xff]   ;;  %v525_v27 = vld [vmem:[%s750_s0 + $0x60] ss:$8 sps:$4 sm:$0xff]   ;;  %v528_v29 = vld [vmem:[%s750_s0 + $0x74] ss:$8 sps:$4 sm:$0xff]  }
   0xb   :  { %417 = vmatpush3.bf16.msra.mxu0 %v497_v5  ;;  %486 = vmatpush3.bf16.msra.mxu1 %v497_v5  ;;  %v530_v30 = vld [vmem:[%s750_s0 + $0x30] ss:$8 sps:$4 sm:$0xff]   ;;  %v683_v34 = vld [vmem:[%s751_s2] ss:$0 sm:$0xff] }
   0xc   :  { %418 = vmatprep.subr.bf16.mxu0 %v498_v6  ;;  %479 = vmatprep.subr.bf16.mxu1 %v498_v6  ;;  %v531_v31 = vld [vmem:[%s750_s0 + $0x70] ss:$8 sps:$4 sm:$0xff]  }
   0xf   :  { %419 = vmatpush3.bf16.msra.mxu0 %v499_v7  ;;  %487 = vmatpush3.bf16.msra.mxu1 %v499_v7 }
  0x10   :  { %420 = vmatprep.subr.bf16.mxu0 %v500_v8  ;;  %480 = vmatprep.subr.bf16.mxu1 %v500_v8 }
  0x13   :  { %421 = vmatpush3.bf16.msra.mxu0 %v501_v9  ;;  %488 = vmatpush3.bf16.msra.mxu1 %v501_v9 }
  0x14   :  { %422 = vmatprep.subr.bf16.mxu0 %v502_v10  ;;  %481 = vmatprep.subr.bf16.mxu1 %v502_v10 }
  0x17   :  { %423 = vmatpush3.bf16.msra.mxu0 %v503_v13  ;;  %489 = vmatpush3.bf16.msra.mxu1 %v503_v13 }
  0x18   :  { %424 = vmatprep.subr.bf16.mxu0 %v504_v14  ;;  %482 = vmatprep.subr.bf16.mxu1 %v504_v14 }
  0x1b   :  { %425 = vmatpush3.bf16.msra.mxu0 %v505_v15  ;;  %490 = vmatpush3.bf16.msra.mxu1 %v505_v15 }
  0x1c   :  { %426 = vmatprep.subr.bf16.mxu0 %v506_v16  ;;  %483 = vmatprep.subr.bf16.mxu1 %v506_v16 }
  0x1f   :  { %427 = vmatpush3.bf16.msra.mxu0 %v507_v17  ;;  %491 = vmatpush3.bf16.msra.mxu1 %v507_v17 }
  0x22   :  { %279 = vmatmul.mubr.bf16.vlgmr.msra.gmra.mxu0 %v508_v18  ;;  %311 = vmatmul.mubr.bf16.vlgmr.msra.gmra.mxu1 %v511_v19 }
  0x23   :  { %286 = vmatprep.mubr.bf16.mxu0 %v514_v20  ;;  %318 = vmatprep.mubr.bf16.mxu1 %v516_v21 }
  0x2a   :  { %287 = vmatmul.mubr.bf16.gmra.mxu0 %v518_v22  ;;  %319 = vmatmul.mubr.bf16.gmra.mxu1 %v519_v23 }
  0x2b   :  { %294 = vmatprep.mubr.bf16.mxu0 %v520_v24  ;;  %326 = vmatprep.mubr.bf16.mxu1 %v522_v25 }
  0x32   :  { %295 = vmatmul.mubr.bf16.gmra.mxu0 %v524_v26  ;;  %327 = vmatmul.mubr.bf16.gmra.mxu1 %v525_v27 }
  0x33   :  { %302 = vmatprep.mubr.bf16.mxu0 %v526_v28  ;;  %334 = vmatprep.mubr.bf16.mxu1 %v528_v29 }
  0x3a   :  { %303 = vmatmul.mubr.bf16.gmra.mxu0 %v530_v30  ;;  %335 = vmatmul.mubr.bf16.gmra.mxu1 %v531_v31 }
  0xe2   :  { %v428_v32 = vpop.f32.mrf.mxu0  ;;  %v452_v33 = vpop.f32.mrf.mxu1 }
  0xe4   :  { %v429_v35 = vpop.f32.mrf.mxu0  ;;  %v453_v36 = vpop.f32.mrf.mxu1 }
  0xe5   :  { %v430_v37 = vadd.f32 %v429_v35, %v428_v32  ;;  %v454_v38 = vadd.f32 %v453_v36, %v452_v33 }
  0xe6   :  { %v431_v39 = vpop.f32.mrf.mxu0  ;;  %v455_v40 = vpop.f32.mrf.mxu1 }
  0xe7   :  { %v281_v41 = vadd.f32 %v430_v37, %v683_v34  ;;  %v313_v42 = vadd.f32 %v454_v38, %v683_v34 }
  0xe8   :  { %v432_v43 = vpop.f32.mrf.mxu0  ;;  %v456_v44 = vpop.f32.mrf.mxu1 }
  0xe9   :  { %532 = vtanh.f32 %v281_v41  ;;  %v433_v45 = vadd.f32 %v432_v43, %v431_v39  ;;  %v457_v46 = vadd.f32 %v456_v44, %v455_v40 }
  0xea   :  { %534 = vtanh.f32 %v313_v42  ;;  %v434_v47 = vpop.f32.mrf.mxu0  ;;  %v458_v48 = vpop.f32.mrf.mxu1 }
  0xeb   :  { %v284_v49 = vadd.f32 %v433_v45, %v683_v34  ;;  %v316_v50 = vadd.f32 %v457_v46, %v683_v34 }
  0xec   :  { %v435_v51 = vpop.f32.mrf.mxu0  ;;  %v459_v52 = vpop.f32.mrf.mxu1 }
  0xed   :  { %536 = vtanh.f32 %v284_v49  ;;  %v436_v53 = vadd.f32 %v435_v51, %v434_v47  ;;  %v460_v54 = vadd.f32 %v459_v52, %v458_v48 }
  0xee   :  { %538 = vtanh.f32 %v316_v50  ;;  %v437_v55 = vpop.f32.mrf.mxu0  ;;  %v461_v56 = vpop.f32.mrf.mxu1 }
  0xef   :  { %v289_v57 = vadd.f32 %v436_v53, %v683_v34  ;;  %v321_v58 = vadd.f32 %v460_v54, %v683_v34 }
  0xf0   :  { %v438_v59 = vpop.f32.mrf.mxu0  ;;  %v462_v60 = vpop.f32.mrf.mxu1 }
  0xf1   :  { %540 = vtanh.f32 %v289_v57  ;;  %v439_v61 = vadd.f32 %v438_v59, %v437_v55  ;;  %v463_v62 = vadd.f32 %v462_v60, %v461_v56 }
  0xf2   :  { %542 = vtanh.f32 %v321_v58  ;;  %v440_v63 = vpop.f32.mrf.mxu0  ;;  %v464_v0 = vpop.f32.mrf.mxu1 }
  0xf3   :  { %v292_v1 = vadd.f32 %v439_v61, %v683_v34  ;;  %v324_v2 = vadd.f32 %v463_v62, %v683_v34 }
  0xf4   :  { %v441_v3 = vpop.f32.mrf.mxu0  ;;  %v465_v4 = vpop.f32.mrf.mxu1 }
  0xf5   :  { %544 = vtanh.f32 %v292_v1  ;;  %v442_v5 = vadd.f32 %v441_v3, %v440_v63  ;;  %v466_v6 = vadd.f32 %v465_v4, %v464_v0 }
  0xf6   :  { %v533_v7 = vpop.eup %532  ;;  %546 = vtanh.f32 %v324_v2  ;;  %v443_v8 = vpop.f32.mrf.mxu0 }
  0xf7   :  { %v467_v9 = vpop.f32.mrf.mxu1  ;;  %v535_v10 = vpop.eup %534  ;;  %359 = vst [vmem:[%s752_s3] sm:$0xff] %v533_v7  ;;  %v297_v11 = vadd.f32 %v442_v5, %v683_v34  ;;  %v329_v12 = vadd.f32 %v466_v6, %v683_v34 }
  0xf8   :  { %367 = vst [vmem:[%s752_s3 + $0x40] sm:$0xff] %v535_v10  ;;  %v444_v13 = vpop.f32.mrf.mxu0 }
  0xf9   :  { %v468_v14 = vpop.f32.mrf.mxu1  ;;  %548 = vtanh.f32 %v297_v11  ;;  %v445_v15 = vadd.f32 %v444_v13, %v443_v8 }
  0xfa   :  { %v469_v16 = vadd.f32 %v468_v14, %v467_v9  ;;  %v537_v17 = vpop.eup %536  ;;  %550 = vtanh.f32 %v329_v12  ;;  %v446_v18 = vpop.f32.mrf.mxu0 }
  0xfb   :  { %v470_v19 = vpop.f32.mrf.mxu1  ;;  %v539_v20 = vpop.eup %538  ;;  %360 = vst [vmem:[%s752_s3 + $0x8] sm:$0xff] %v537_v17  ;;  %v300_v21 = vadd.f32 %v445_v15, %v683_v34 }
  0xfc   :  { %v332_v22 = vadd.f32 %v469_v16, %v683_v34  ;;  %368 = vst [vmem:[%s752_s3 + $0x48] sm:$0xff] %v539_v20  ;;  %v447_v23 = vpop.f32.mrf.mxu0 }
  0xfd   :  { %v471_v24 = vpop.f32.mrf.mxu1  ;;  %552 = vtanh.f32 %v300_v21  ;;  %v448_v25 = vadd.f32 %v447_v23, %v446_v18 }
  0xfe   :  { %v472_v26 = vadd.f32 %v471_v24, %v470_v19  ;;  %v541_v27 = vpop.eup %540  ;;  %554 = vtanh.f32 %v332_v22  ;;  %v449_v28 = vpop.f32.mrf.mxu0 }
  0xff   :  { %v473_v29 = vpop.f32.mrf.mxu1  ;;  %v543_v30 = vpop.eup %542  ;;  %361 = vst [vmem:[%s752_s3 + $0x10] sm:$0xff] %v541_v27  ;;  %v305_v31 = vadd.f32 %v448_v25, %v683_v34 }
 0x100   :  { %v337_v32 = vadd.f32 %v472_v26, %v683_v34  ;;  %369 = vst [vmem:[%s752_s3 + $0x50] sm:$0xff] %v543_v30  ;;  %v450_v33 = vpop.f32.mrf.mxu0 }
 0x101   :  { %v474_v35 = vpop.f32.mrf.mxu1  ;;  %556 = vtanh.f32 %v305_v31  ;;  %v451_v36 = vadd.f32 %v450_v33, %v449_v28 }
 0x102   :  { %v475_v37 = vadd.f32 %v474_v35, %v473_v29  ;;  %v545_v38 = vpop.eup %544  ;;  %558 = vtanh.f32 %v337_v32 }
 0x103   :  { %v547_v39 = vpop.eup %546  ;;  %362 = vst [vmem:[%s752_s3 + $0x18] sm:$0xff] %v545_v38  ;;  %v308_v40 = vadd.f32 %v451_v36, %v683_v34 }
 0x104   :  { %v340_v41 = vadd.f32 %v475_v37, %v683_v34  ;;  %370 = vst [vmem:[%s752_s3 + $0x58] sm:$0xff] %v547_v39 }
 0x105   :  { %560 = vtanh.f32 %v308_v40 }
 0x106   :  { %v549_v42 = vpop.eup %548  ;;  %562 = vtanh.f32 %v340_v41 }
 0x107   :  { %v551_v43 = vpop.eup %550  ;;  %363 = vst [vmem:[%s752_s3 + $0x20] sm:$0xff] %v549_v42 }
 0x108   :  { %371 = vst [vmem:[%s752_s3 + $0x60] sm:$0xff] %v551_v43 }
 0x10a   :  { %v553_v44 = vpop.eup %552 }
 0x10b   :  { %v555_v45 = vpop.eup %554  ;;  %364 = vst [vmem:[%s752_s3 + $0x28] sm:$0xff] %v553_v44 }
 0x10c   :  { %372 = vst [vmem:[%s752_s3 + $0x68] sm:$0xff] %v555_v45 }
 0x10e   :  { %v557_v34 = vpop.eup %556 }
 0x10f   :  { %v559_v46 = vpop.eup %558  ;;  %365 = vst [vmem:[%s752_s3 + $0x30] sm:$0xff] %v557_v34 }
 0x110   :  { %373 = vst [vmem:[%s752_s3 + $0x70] sm:$0xff] %v559_v46 }
 0x112   :  { %v561_v47 = vpop.eup %560 }
 0x113   :  { %v563_v48 = vpop.eup %562  ;;  %366 = vst [vmem:[%s752_s3 + $0x38] sm:$0xff] %v561_v47 }
 0x114   :  { %374 = vst [vmem:[%s752_s3 + $0x78] sm:$0xff] %v563_v48 }

</bundles_post_ra>
